<compile_context>
chip_gen: v7x
topology: tpu7x:2x2x1
jax: 0.10.0
libtpu: 0.0.40
codegen_flags: <defaults>
</compile_context>

<pallas_src>
import functools
import math

import jax
import jax.numpy as jnp
import numpy as np
from jax import lax
from jax.experimental import pallas as pl
from jax.experimental.pallas import tpu as pltpu

# Explicit scoped-VMEM budget: above the v5e/v6e defaults (16/32 MiB), at-or-below
# v7x physical (64 MiB).  It is a ceiling, not a reservation -- actual usage at the
# toy shapes below is tiny.
_VMEM_LIMIT_BYTES = 48 * 1024 * 1024

# Constant weight blocks are requested single-buffered (pl.Buffered(1)); if the
# running jax build rejects pipeline_mode on the top-level pallas_call we fall back
# to default double-buffering once and remember that decision.
_SINGLE_BUFFER_OK = [True]


# ---------------------------------------------------------------------------
# helpers
# ---------------------------------------------------------------------------
def _layernorm(x, g, b, eps=1e-5):
    mu = jnp.mean(x, axis=-1, keepdims=True)
    var = jnp.mean(jnp.square(x - mu), axis=-1, keepdims=True)
    return (x - mu) * lax.rsqrt(var + eps) * g + b


def _mix_dtype():
    # bf16 head-mix / time-weighting math on bf16-capable VALUs (v6e/v7x);
    # keep f32 on v5e-and-older generations (no bf16 VPU there).
    try:
        kind = jax.devices()[0].device_kind.lower()
    except Exception:
        return jnp.bfloat16
    if any(t in kind for t in ("v2", "v3", "v4", "v5")):
        return jnp.float32
    return jnp.bfloat16


def _const_spec(shape, single_buffer):
    rank = len(shape)
    index_map = lambda b: (0,) * rank
    if single_buffer:
        return pl.BlockSpec(shape, index_map, pipeline_mode=pl.Buffered(1))
    return pl.BlockSpec(shape, index_map)


# ---------------------------------------------------------------------------
# fused Block kernel: one grid step == one batch element
# ---------------------------------------------------------------------------
def block_kernel(hm_ref,                       # SMEM (H, H) head-mix matrix (f32)
                 x_ref,                        # (1, T, C) f32
                 ln1_g_ref, ln1_b_ref,         # (1, C) f32
                 wqkv_ref, bqkv_ref,           # (C, 3C) bf16, (1, 3C) f32
                 tw_ref,                       # (H, T, T) bf16 time weighting
                 wp_ref, bp_ref,               # (C, C) bf16, (1, C) f32
                 ln2_g_ref, ln2_b_ref,         # (1, C) f32
                 wg_ref, bg_ref,               # (C, 6C) bf16, (1, 6C) f32 (SelfGate)
                 w2_ref, b2_ref,               # (3C, C) bf16, (1, C) f32
                 out_ref,                      # (1, T, C) f32
                 *, n_head, mix_dtype):
    f32 = jnp.float32
    bf16 = jnp.bfloat16

    x = x_ref[0]                               # (T, C) f32
    T, C = x.shape
    H = n_head
    D = C // H
    scale = 1.0 / math.sqrt(D)

    # ---- ln1 ----------------------------------------------------------------
    h = _layernorm(x, ln1_g_ref[...], ln1_b_ref[...])

    # ---- time shift: row t reads h[t-1] (row 0 -> zeros), first C//2 channels.
    # XLU sublane roll + iota mask -- no VMEM staging scratch, no MXU matmul.
    rolled = pltpu.roll(h, shift=1, axis=0)                # out[t] = h[t-1] (wraps)
    row = lax.broadcasted_iota(jnp.int32, (T, C), 0)
    shifted = jnp.where(row == 0, jnp.zeros_like(rolled), rolled)
    chan = lax.broadcasted_iota(jnp.int32, (T, C), 1)
    hs = jnp.where(chan < (C // 2), shifted, h)            # (T, C) f32

    # ---- fused QKV: one lane-dense (T,C)@(C,3C) matmul, bf16 in / f32 accum --
    qkv = jnp.dot(hs.astype(bf16), wqkv_ref[...],
                  preferred_element_type=f32) + bqkv_ref[...]          # (T, 3C) f32
    # fold the 1/sqrt(D) attention scale into q once (T*C multiplies, not H*T^2)
    q_b = (qkv[:, 0 * C:1 * C] * scale).astype(bf16)
    k_b = qkv[:, 1 * C:2 * C].astype(bf16)
    v_b = qkv[:, 2 * C:3 * C].astype(bf16)

    # ---- causal mask ---------------------------------------------------------
    rr = lax.broadcasted_iota(jnp.int32, (T, T), 0)
    cc = lax.broadcasted_iota(jnp.int32, (T, T), 1)
    causal = cc <= rr

    # ---- per-head attention probs (f32 softmax, time weighting in mix_dtype) -
    atts = []
    for hd in range(H):
        qh = q_b[:, hd * D:(hd + 1) * D]
        kh = k_b[:, hd * D:(hd + 1) * D]
        s = lax.dot_general(qh, kh, (((1,), (1,)), ((), ())),
                            preferred_element_type=f32)               # (T, T)
        s = jnp.where(causal, s, -jnp.inf)
        m = jnp.max(s, axis=-1, keepdims=True)
        e = jnp.exp(s - m)
        inv = pl.reciprocal(jnp.sum(e, axis=-1, keepdims=True), approx=True)
        p = (e * inv).astype(mix_dtype) * tw_ref[hd].astype(mix_dtype)
        atts.append(p)                                                 # post-softmax tw

    # ---- head_mix (1x1 conv over heads, mix_dtype VPU) + att @ v -------------
    # Per-head (T,D) results are concatenated lane-dense in registers and fed to
    # one (T,C)@(C,C) projection matmul (no partial-width scratch stores).
    ys = []
    for o in range(H):
        mixed = atts[0] * hm_ref[o, 0].astype(mix_dtype)
        for hd in range(1, H):
            mixed = mixed + atts[hd] * hm_ref[o, hd].astype(mix_dtype)
        ys.append(jnp.dot(mixed.astype(bf16), v_b[:, o * D:(o + 1) * D],
                          preferred_element_type=f32))                 # (T, D)
    y = jnp.concatenate(ys, axis=-1)                                   # (T, C)

    attn_out = jnp.dot(y.astype(bf16), wp_ref[...],
                       preferred_element_type=f32) + bp_ref[...]
    # attn_drop / resid_drop: identity (eval mode)
    x1 = x + attn_out

    # ---- MLP: ln2 -> SelfGate (one (C,6C) matmul) -> Linear(3C -> C) ---------
    h2 = _layernorm(x1, ln2_g_ref[...], ln2_b_ref[...])
    g6 = jnp.dot(h2.astype(bf16), wg_ref[...],
                 preferred_element_type=f32) + bg_ref[...]             # (T, 6C)
    a = g6[:, :3 * C]
    gate = g6[:, 3 * C:]
    sp = jnp.where(gate > 20.0, gate, jnp.log1p(jnp.exp(jnp.minimum(gate, 20.0))))
    mlp_h = a * (gate * jnp.tanh(sp))                                  # x * mish(gate)
    mlp_out = jnp.dot(mlp_h.astype(bf16), w2_ref[...],
                      preferred_element_type=f32) + b2_ref[...]
    # mlp Dropout: identity (eval mode)

    out_ref[0] = (x1 + mlp_out).astype(out_ref.dtype)


def block_forward(x, p, n_head, mix_dtype):
    B, T, C = x.shape
    kern = functools.partial(block_kernel, n_head=n_head, mix_dtype=mix_dtype)

    operands = (p["hm"], x,
                p["ln1_g"], p["ln1_b"],
                p["wqkv"], p["bqkv"], p["tw"], p["wp"], p["bp"],
                p["ln2_g"], p["ln2_b"],
                p["wg"], p["bg"], p["w2"], p["b2"])

    def call(single_buffer):
        in_specs = [pl.BlockSpec(memory_space=pltpu.MemorySpace.SMEM),   # hm (H, H)
                    pl.BlockSpec((1, T, C), lambda b: (b, 0, 0))]        # x
        for arr in operands[2:]:                                         # constants
            in_specs.append(_const_spec(arr.shape, single_buffer))
        return pl.pallas_call(
            kern,
            out_shape=jax.ShapeDtypeStruct((B, T, C), x.dtype),
            grid=(B,),
            in_specs=in_specs,
            out_specs=pl.BlockSpec((1, T, C), lambda b: (b, 0, 0)),
            compiler_params=pltpu.CompilerParams(
                dimension_semantics=("parallel",),
                vmem_limit_bytes=_VMEM_LIMIT_BYTES),
        )(*operands)

    if _SINGLE_BUFFER_OK[0]:
        try:
            return call(True)
        except Exception:                       # pipeline_mode unsupported: fall back
            _SINGLE_BUFFER_OK[0] = False
    return call(False)


# ---------------------------------------------------------------------------
# final LayerNorm + LM head kernel (vocab-tiled)
# ---------------------------------------------------------------------------
def lm_head_kernel(x_ref, g_ref, b_ref, w_ref, out_ref):
    h = _layernorm(x_ref[0], g_ref[...], b_ref[...])
    out_ref[0] = jnp.dot(h.astype(jnp.bfloat16), w_ref[...],
                         preferred_element_type=jnp.float32).astype(out_ref.dtype)


def lm_head_forward(x, g, b, w_bf16, max_tile_v=2048):
    B, T, C = x.shape
    V = w_bf16.shape[1]
    # lane-dense vocab tile (multiple of 128 dividing V when possible)
    tv = V
    if V > max_tile_v:
        for cand in range(max_tile_v, 127, -128):
            if V % cand == 0:
                tv = cand
                break
    nv = V // tv
    return pl.pallas_call(
        lm_head_kernel,
        out_shape=jax.ShapeDtypeStruct((B, T, V), jnp.float32),
        grid=(B, nv),
        in_specs=[
            pl.BlockSpec((1, T, C), lambda i, j: (i, 0, 0)),
            pl.BlockSpec(g.shape, lambda i, j: (0, 0)),
            pl.BlockSpec(b.shape, lambda i, j: (0, 0)),
            pl.BlockSpec((C, tv), lambda i, j: (0, j)),
        ],
        out_specs=pl.BlockSpec((1, T, tv), lambda i, j: (i, 0, j)),
        compiler_params=pltpu.CompilerParams(
            dimension_semantics=("parallel", "parallel"),
            vmem_limit_bytes=_VMEM_LIMIT_BYTES),
    )(x, g, b, w_bf16)


# ---------------------------------------------------------------------------
# one-time parameter preparation (hoisted out of the per-step forward)
# ---------------------------------------------------------------------------
def prepare_params(params, T):
    bf16 = jnp.bfloat16
    blocks = []
    for p in params["blocks"]:
        blocks.append({
            "hm": p["hm"],
            "ln1_g": p["ln1_g"], "ln1_b": p["ln1_b"],
            "wqkv": jnp.concatenate([p["wq"], p["wk"], p["wv"]], axis=1).astype(bf16),
            "bqkv": jnp.concatenate([p["bq"], p["bk"], p["bv"]], axis=1),
            "tw": p["tw"][:, :T, :T].astype(bf16),
            "wp": p["wp"].astype(bf16), "bp": p["bp"],
            "ln2_g": p["ln2_g"], "ln2_b": p["ln2_b"],
            "wg": p["wg"].astype(bf16), "bg": p["bg"],
            "w2": p["w2"].astype(bf16), "b2": p["b2"],
        })
    return {
        "tok_emb": params["tok_emb"],
        "pos_emb": params["pos_emb"],
        "blocks": blocks,
        "ln_f_g": params["ln_f_g"], "ln_f_b": params["ln_f_b"],
        "head_w": params["head_w"].astype(bf16),
    }


# ---------------------------------------------------------------------------
# GPT forward (eval mode, targets=None path)
# ---------------------------------------------------------------------------
def gpt_forward(idx, prepped, n_head):
    T = idx.shape[1]
    mix_dtype = _mix_dtype()
    # TODO(synk): token-embedding gather stays at the JAX level (dynamic row gather
    # has no clean small-scale Pallas equivalent); embedding dropout is identity.
    x = jnp.take(prepped["tok_emb"], idx, axis=0) + prepped["pos_emb"][:, :T, :]
    for bp in prepped["blocks"]:
        x = block_forward(x, bp, n_head, mix_dtype)
    return lm_head_forward(x, prepped["ln_f_g"], prepped["ln_f_b"], prepped["head_w"])


# ---------------------------------------------------------------------------
# pure-JAX reference (mirrors the PyTorch forward exactly, all f32)
# ---------------------------------------------------------------------------
def _ln_ref(y, g, b):
    mu = y.mean(-1, keepdims=True)
    var = ((y - mu) ** 2).mean(-1, keepdims=True)
    return (y - mu) / jnp.sqrt(var + 1e-5) * g + b


def block_reference(x, p, n_head):
    B, T, C = x.shape
    H = n_head
    D = C // H
    h = _ln_ref(x, p["ln1_g"], p["ln1_b"])
    shifted = jnp.pad(h, ((0, 0), (1, 0), (0, 0)))[:, :T, :]
    hs = jnp.concatenate([shifted[:, :, :C // 2], h[:, :, C // 2:]], axis=-1)
    q = (hs @ p["wq"] + p["bq"]).reshape(B, T, H, D).transpose(0, 2, 1, 3)
    k = (hs @ p["wk"] + p["bk"]).reshape(B, T, H, D).transpose(0, 2, 1, 3)
    v = (hs @ p["wv"] + p["bv"]).reshape(B, T, H, D).transpose(0, 2, 1, 3)
    att = (q @ k.transpose(0, 1, 3, 2)) / math.sqrt(D)
    mask = jnp.tril(jnp.ones((T, T)))
    att = jnp.where(mask == 0, -jnp.inf, att)
    att = jax.nn.softmax(att, axis=-1)
    att = att * p["tw"][None, :, :T, :T]
    att = jnp.einsum("oh,bhts->bots", p["hm"], att)
    y = (att @ v).transpose(0, 2, 1, 3).reshape(B, T, C)
    x1 = x + (y @ p["wp"] + p["bp"])
    h2 = _ln_ref(x1, p["ln2_g"], p["ln2_b"])
    g6 = h2 @ p["wg"] + p["bg"]
    a, gate = jnp.split(g6, 2, axis=-1)
    mish = gate * jnp.tanh(jax.nn.softplus(gate))
    return x1 + (a * mish) @ p["w2"] + p["b2"]


def gpt_reference(idx, params, n_head):
    T = idx.shape[1]
    x = params["tok_emb"][idx] + params["pos_emb"][:, :T, :]
    for bp in params["blocks"]:
        x = block_reference(x, bp, n_head)
    x = _ln_ref(x, params["ln_f_g"], params["ln_f_b"])
    return x @ params["head_w"]


# ---------------------------------------------------------------------------
def make_params(key, vocab, C, H, block_size, n_layer):
    keys = jax.random.split(key, n_layer + 3)

    def lin(k, fi, fo, scale=0.02):
        kw, kb = jax.random.split(k)
        return (scale * jax.random.normal(kw, (fi, fo), jnp.float32),
                scale * jax.random.normal(kb, (1, fo), jnp.float32))

    def block_params(k):
        ks = jax.random.split(k, 10)
        wq, bq = lin(ks[0], C, C)
        wk, bk = lin(ks[1], C, C)
        wv, bv = lin(ks[2], C, C)
        wp, bp = lin(ks[3], C, C)
        wg, bg = lin(ks[4], C, 6 * C)
        w2, b2 = lin(ks[5], 3 * C, C)
        return {
            "ln1_g": 1.0 + 0.1 * jax.random.normal(ks[6], (1, C), jnp.float32),
            "ln1_b": 0.05 * jax.random.normal(ks[7], (1, C), jnp.float32),
            "wq": wq, "bq": bq, "wk": wk, "bk": bk, "wv": wv, "bv": bv,
            "tw": jnp.ones((H, block_size, block_size), jnp.float32)
                  + 0.05 * jax.random.normal(ks[8], (H, block_size, block_size),
                                             jnp.float32),
            "hm": 0.3 * jax.random.normal(ks[9], (H, H), jnp.float32),
            "wp": wp, "bp": bp,
            "ln2_g": jnp.ones((1, C), jnp.float32),
            "ln2_b": jnp.zeros((1, C), jnp.float32),
            "wg": wg, "bg": bg, "w2": w2, "b2": b2,
        }

    return {
        "tok_emb": 0.02 * jax.random.normal(keys[0], (vocab, C), jnp.float32),
        "pos_emb": 0.02 * jax.random.normal(keys[1], (1, block_size, C), jnp.float32),
        "blocks": [block_params(keys[2 + i]) for i in range(n_layer)],
        "ln_f_g": jnp.ones((1, C), jnp.float32),
        "ln_f_b": jnp.zeros((1, C), jnp.float32),
        "head_w": 0.02 * jax.random.normal(keys[2 + n_layer], (C, vocab), jnp.float32),
    }


if __name__ == "__main__":
    B, T, C, H, V, L = 2, 8, 32, 4, 64, 2       # block_size == T, n_layer == L
    key = jax.random.PRNGKey(0)
    k_idx, k_p = jax.random.split(key)
    idx = jax.random.randint(k_idx, (B, T), 0, V, dtype=jnp.int32)
    params = make_params(k_p, V, C, H, T, L)

    prepped = prepare_params(params, T)          # one-time weight prep (reused per step)
    logits = gpt_forward(idx, prepped, n_head=H)
    logits = jax.block_until_ready(logits)

    with jax.default_matmul_precision("highest"):
        ref = jax.block_until_ready(gpt_reference(idx, params, n_head=H))

    assert logits.shape == (B, T, V)
    assert bool(jnp.all(jnp.isfinite(logits)))
    np.testing.assert_allclose(np.asarray(logits), np.asarray(ref),
                               rtol=5e-2, atol=2e-2)
    print("KERNEL_OK")
</pallas_src>

<mosaic_0001>
module attributes {stable_mosaic.version = 11 : i64} {
  func.func @block_kernel(%arg0: i32, %arg1: memref<4x4xf32, #tpu.memory_space<smem>>, %arg2: memref<1x8x32xf32, #tpu.memory_space<vmem>>, %arg3: memref<1x32xf32, #tpu.memory_space<vmem>>, %arg4: memref<1x32xf32, #tpu.memory_space<vmem>>, %arg5: memref<32x96xbf16, #tpu.memory_space<vmem>>, %arg6: memref<1x96xf32, #tpu.memory_space<vmem>>, %arg7: memref<4x8x8xbf16, #tpu.memory_space<vmem>>, %arg8: memref<32x32xbf16, #tpu.memory_space<vmem>>, %arg9: memref<1x32xf32, #tpu.memory_space<vmem>>, %arg10: memref<1x32xf32, #tpu.memory_space<vmem>>, %arg11: memref<1x32xf32, #tpu.memory_space<vmem>>, %arg12: memref<32x192xbf16, #tpu.memory_space<vmem>>, %arg13: memref<1x192xf32, #tpu.memory_space<vmem>>, %arg14: memref<96x32xbf16, #tpu.memory_space<vmem>>, %arg15: memref<1x32xf32, #tpu.memory_space<vmem>>, %arg16: memref<1x8x32xf32, #tpu.memory_space<vmem>>) attributes {dimension_semantics = [#tpu.dimension_semantics<parallel>], iteration_bounds = array<i64: 2>, scalar_prefetch = 0 : i64, scratch_operands = 0 : i64, tpu.core_type = #tpu.core_type<tc>, window_params = [{transform_indices = @transform_0, window_bounds = array<i64: 4, 4>}, {transform_indices = @transform_1, window_bounds = array<i64: 1, 8, 32>}, {pipeline_mode = #tpu.pipeline_mode<synchronous>, transform_indices = @transform_2, window_bounds = array<i64: 1, 32>}, {pipeline_mode = #tpu.pipeline_mode<synchronous>, transform_indices = @transform_3, window_bounds = array<i64: 1, 32>}, {pipeline_mode = #tpu.pipeline_mode<synchronous>, transform_indices = @transform_4, window_bounds = array<i64: 32, 96>}, {pipeline_mode = #tpu.pipeline_mode<synchronous>, transform_indices = @transform_5, window_bounds = array<i64: 1, 96>}, {pipeline_mode = #tpu.pipeline_mode<synchronous>, transform_indices = @transform_6, window_bounds = array<i64: 4, 8, 8>}, {pipeline_mode = #tpu.pipeline_mode<synchronous>, transform_indices = @transform_7, window_bounds = array<i64: 32, 32>}, {pipeline_mode = #tpu.pipeline_mode<synchronous>, transform_indices = @transform_8, window_bounds = array<i64: 1, 32>}, {pipeline_mode = #tpu.pipeline_mode<synchronous>, transform_indices = @transform_9, window_bounds = array<i64: 1, 32>}, {pipeline_mode = #tpu.pipeline_mode<synchronous>, transform_indices = @transform_10, window_bounds = array<i64: 1, 32>}, {pipeline_mode = #tpu.pipeline_mode<synchronous>, transform_indices = @transform_11, window_bounds = array<i64: 32, 192>}, {pipeline_mode = #tpu.pipeline_mode<synchronous>, transform_indices = @transform_12, window_bounds = array<i64: 1, 192>}, {pipeline_mode = #tpu.pipeline_mode<synchronous>, transform_indices = @transform_13, window_bounds = array<i64: 96, 32>}, {pipeline_mode = #tpu.pipeline_mode<synchronous>, transform_indices = @transform_14, window_bounds = array<i64: 1, 32>}, {transform_indices = @transform_15, window_bounds = array<i64: 1, 8, 32>}]} {
    %c0 = arith.constant 0 : index
    %c0_0 = arith.constant 0 : index
    %c0_1 = arith.constant 0 : index
    %0 = vector.load %arg2[%c0, %c0_0, %c0_1] : memref<1x8x32xf32, #tpu.memory_space<vmem>>, vector<1x8x32xf32>
    %1 = vector.shape_cast %0 : vector<1x8x32xf32> to vector<8x32xf32>
    %c0_2 = arith.constant 0 : index
    %c0_3 = arith.constant 0 : index
    %2 = vector.load %arg3[%c0_2, %c0_3] : memref<1x32xf32, #tpu.memory_space<vmem>>, vector<1x32xf32>
    %c0_4 = arith.constant 0 : index
    %c0_5 = arith.constant 0 : index
    %3 = vector.load %arg4[%c0_4, %c0_5] : memref<1x32xf32, #tpu.memory_space<vmem>>, vector<1x32xf32>
    %cst = arith.constant dense<0.000000e+00> : vector<8xf32>
    %4 = vector.multi_reduction <add>, %1, %cst [1] : vector<8x32xf32> to vector<8xf32>
    %5 = vector.shape_cast %4 : vector<8xf32> to vector<8x1xf32>
    %cst_6 = arith.constant 3.200000e+01 : f32
    %6 = vector.broadcast %cst_6 : f32 to vector<8x1xf32>
    %7 = arith.divf %5, %6 : vector<8x1xf32>
    %8 = vector.broadcast %7 : vector<8x1xf32> to vector<8x32xf32>
    %9 = arith.subf %1, %8 : vector<8x32xf32>
    %10 = arith.mulf %9, %9 : vector<8x32xf32>
    %cst_7 = arith.constant dense<0.000000e+00> : vector<8xf32>
    %11 = vector.multi_reduction <add>, %10, %cst_7 [1] : vector<8x32xf32> to vector<8xf32>
    %12 = vector.shape_cast %11 : vector<8xf32> to vector<8x1xf32>
    %cst_8 = arith.constant 3.200000e+01 : f32
    %13 = vector.broadcast %cst_8 : f32 to vector<8x1xf32>
    %14 = arith.divf %12, %13 : vector<8x1xf32>
    %15 = vector.broadcast %7 : vector<8x1xf32> to vector<8x32xf32>
    %16 = arith.subf %1, %15 : vector<8x32xf32>
    %cst_9 = arith.constant 9.99999974E-6 : f32
    %17 = vector.broadcast %cst_9 : f32 to vector<8x1xf32>
    %18 = arith.addf %14, %17 : vector<8x1xf32>
    %19 = math.rsqrt %18 : vector<8x1xf32>
    %20 = vector.broadcast %19 : vector<8x1xf32> to vector<8x32xf32>
    %21 = arith.mulf %16, %20 : vector<8x32xf32>
    %22 = vector.broadcast %2 : vector<1x32xf32> to vector<8x32xf32>
    %23 = arith.mulf %21, %22 : vector<8x32xf32>
    %24 = vector.broadcast %3 : vector<1x32xf32> to vector<8x32xf32>
    %25 = arith.addf %23, %24 : vector<8x32xf32>
    %c1_i32 = arith.constant 1 : i32
    %26 = tpu.dynamic_rotate %25 by %c1_i32 dim 0 : vector<8x32xf32>, i32 -> vector<8x32xf32>
    %27 = tpu.iota {dimensions = array<i32: 0>} : vector<8x32xi32>
    %c0_i32 = arith.constant 0 : i32
    %28 = vector.broadcast %c0_i32 : i32 to vector<8x32xi32>
    %29 = arith.cmpi eq, %27, %28 : vector<8x32xi32>
    %cst_10 = arith.constant 0.000000e+00 : f32
    %30 = vector.broadcast %cst_10 : f32 to vector<8x32xf32>
    %31 = arith.select %29, %30, %26 : vector<8x32xi1>, vector<8x32xf32>
    %32 = tpu.iota {dimensions = array<i32: 1>} : vector<8x32xi32>
    %c16_i32 = arith.constant 16 : i32
    %33 = vector.broadcast %c16_i32 : i32 to vector<8x32xi32>
    %34 = arith.cmpi slt, %32, %33 : vector<8x32xi32>
    %35 = arith.select %34, %31, %25 : vector<8x32xi1>, vector<8x32xf32>
    %36 = arith.truncf %35 : vector<8x32xf32> to vector<8x32xbf16>
    %c0_11 = arith.constant 0 : index
    %c0_12 = arith.constant 0 : index
    %37 = vector.load %arg5[%c0_11, %c0_12] : memref<32x96xbf16, #tpu.memory_space<vmem>>, vector<32x96xbf16>
    %cst_13 = arith.constant dense<0.000000e+00> : vector<8x96xf32>
    %38 = tpu.matmul %36, %37, %cst_13 {dimension_numbers = #tpu.dot_dimension_numbers<[1], [0], [0], [1], [0, 0, 1, 1], [], []>} : vector<8x32xbf16>, vector<32x96xbf16>, vector<8x96xf32> -> vector<8x96xf32>
    %c0_14 = arith.constant 0 : index
    %c0_15 = arith.constant 0 : index
    %39 = vector.load %arg6[%c0_14, %c0_15] : memref<1x96xf32, #tpu.memory_space<vmem>>, vector<1x96xf32>
    %40 = vector.broadcast %39 : vector<1x96xf32> to vector<8x96xf32>
    %41 = arith.addf %38, %40 : vector<8x96xf32>
    %42 = vector.extract_strided_slice %41 {offsets = [0, 0], sizes = [8, 32], strides = [1, 1]} : vector<8x96xf32> to vector<8x32xf32>
    %cst_16 = arith.constant 0.353553385 : f32
    %43 = vector.broadcast %cst_16 : f32 to vector<8x32xf32>
    %44 = arith.mulf %42, %43 : vector<8x32xf32>
    %45 = arith.truncf %44 : vector<8x32xf32> to vector<8x32xbf16>
    %46 = vector.extract_strided_slice %41 {offsets = [0, 32], sizes = [8, 32], strides = [1, 1]} : vector<8x96xf32> to vector<8x32xf32>
    %47 = arith.truncf %46 : vector<8x32xf32> to vector<8x32xbf16>
    %48 = vector.extract_strided_slice %41 {offsets = [0, 64], sizes = [8, 32], strides = [1, 1]} : vector<8x96xf32> to vector<8x32xf32>
    %49 = arith.truncf %48 : vector<8x32xf32> to vector<8x32xbf16>
    %50 = tpu.iota {dimensions = array<i32: 0>} : vector<8x8xi32>
    %51 = tpu.iota {dimensions = array<i32: 1>} : vector<8x8xi32>
    %52 = arith.cmpi sle, %51, %50 : vector<8x8xi32>
    %53 = vector.extract_strided_slice %45 {offsets = [0, 0], sizes = [8, 8], strides = [1, 1]} : vector<8x32xbf16> to vector<8x8xbf16>
    %54 = vector.extract_strided_slice %47 {offsets = [0, 0], sizes = [8, 8], strides = [1, 1]} : vector<8x32xbf16> to vector<8x8xbf16>
    %cst_17 = arith.constant dense<0.000000e+00> : vector<8x8xf32>
    %55 = tpu.matmul %53, %54, %cst_17 {dimension_numbers = #tpu.dot_dimension_numbers<[1], [1], [0], [0], [0, 0, 1, 0], [], []>} : vector<8x8xbf16>, vector<8x8xbf16>, vector<8x8xf32> -> vector<8x8xf32>
    %cst_18 = arith.constant 0xFF800000 : f32
    %56 = vector.broadcast %cst_18 : f32 to vector<8x8xf32>
    %57 = arith.select %52, %55, %56 : vector<8x8xi1>, vector<8x8xf32>
    %cst_19 = arith.constant dense<0xFF800000> : vector<8xf32>
    %58 = vector.multi_reduction <maximumf>, %57, %cst_19 [1] : vector<8x8xf32> to vector<8xf32>
    %59 = vector.shape_cast %58 : vector<8xf32> to vector<8x1xf32>
    %60 = vector.broadcast %59 : vector<8x1xf32> to vector<8x8xf32>
    %61 = arith.subf %57, %60 : vector<8x8xf32>
    %62 = math.exp %61 : vector<8x8xf32>
    %cst_20 = arith.constant dense<0.000000e+00> : vector<8xf32>
    %63 = vector.multi_reduction <add>, %62, %cst_20 [1] : vector<8x8xf32> to vector<8xf32>
    %64 = vector.shape_cast %63 : vector<8xf32> to vector<8x1xf32>
    %65 = tpu.reciprocal %64 {approx = true} : vector<8x1xf32> -> vector<8x1xf32>
    %66 = vector.broadcast %65 : vector<8x1xf32> to vector<8x8xf32>
    %67 = arith.mulf %62, %66 : vector<8x8xf32>
    %68 = arith.truncf %67 : vector<8x8xf32> to vector<8x8xbf16>
    %c0_21 = arith.constant 0 : index
    %c0_22 = arith.constant 0 : index
    %c0_23 = arith.constant 0 : index
    %69 = vector.load %arg7[%c0_21, %c0_22, %c0_23] : memref<4x8x8xbf16, #tpu.memory_space<vmem>>, vector<1x8x8xbf16>
    %70 = vector.shape_cast %69 : vector<1x8x8xbf16> to vector<8x8xbf16>
    %71 = arith.mulf %68, %70 : vector<8x8xbf16>
    %72 = vector.extract_strided_slice %45 {offsets = [0, 8], sizes = [8, 8], strides = [1, 1]} : vector<8x32xbf16> to vector<8x8xbf16>
    %73 = vector.extract_strided_slice %47 {offsets = [0, 8], sizes = [8, 8], strides = [1, 1]} : vector<8x32xbf16> to vector<8x8xbf16>
    %cst_24 = arith.constant dense<0.000000e+00> : vector<8x8xf32>
    %74 = tpu.matmul %72, %73, %cst_24 {dimension_numbers = #tpu.dot_dimension_numbers<[1], [1], [0], [0], [0, 0, 1, 0], [], []>} : vector<8x8xbf16>, vector<8x8xbf16>, vector<8x8xf32> -> vector<8x8xf32>
    %cst_25 = arith.constant 0xFF800000 : f32
    %75 = vector.broadcast %cst_25 : f32 to vector<8x8xf32>
    %76 = arith.select %52, %74, %75 : vector<8x8xi1>, vector<8x8xf32>
    %cst_26 = arith.constant dense<0xFF800000> : vector<8xf32>
    %77 = vector.multi_reduction <maximumf>, %76, %cst_26 [1] : vector<8x8xf32> to vector<8xf32>
    %78 = vector.shape_cast %77 : vector<8xf32> to vector<8x1xf32>
    %79 = vector.broadcast %78 : vector<8x1xf32> to vector<8x8xf32>
    %80 = arith.subf %76, %79 : vector<8x8xf32>
    %81 = math.exp %80 : vector<8x8xf32>
    %cst_27 = arith.constant dense<0.000000e+00> : vector<8xf32>
    %82 = vector.multi_reduction <add>, %81, %cst_27 [1] : vector<8x8xf32> to vector<8xf32>
    %83 = vector.shape_cast %82 : vector<8xf32> to vector<8x1xf32>
    %84 = tpu.reciprocal %83 {approx = true} : vector<8x1xf32> -> vector<8x1xf32>
    %85 = vector.broadcast %84 : vector<8x1xf32> to vector<8x8xf32>
    %86 = arith.mulf %81, %85 : vector<8x8xf32>
    %87 = arith.truncf %86 : vector<8x8xf32> to vector<8x8xbf16>
    %c1 = arith.constant 1 : index
    %c0_28 = arith.constant 0 : index
    %c0_29 = arith.constant 0 : index
    %88 = vector.load %arg7[%c1, %c0_28, %c0_29] : memref<4x8x8xbf16, #tpu.memory_space<vmem>>, vector<1x8x8xbf16>
    %89 = vector.shape_cast %88 : vector<1x8x8xbf16> to vector<8x8xbf16>
    %90 = arith.mulf %87, %89 : vector<8x8xbf16>
    %91 = vector.extract_strided_slice %45 {offsets = [0, 16], sizes = [8, 8], strides = [1, 1]} : vector<8x32xbf16> to vector<8x8xbf16>
    %92 = vector.extract_strided_slice %47 {offsets = [0, 16], sizes = [8, 8], strides = [1, 1]} : vector<8x32xbf16> to vector<8x8xbf16>
    %cst_30 = arith.constant dense<0.000000e+00> : vector<8x8xf32>
    %93 = tpu.matmul %91, %92, %cst_30 {dimension_numbers = #tpu.dot_dimension_numbers<[1], [1], [0], [0], [0, 0, 1, 0], [], []>} : vector<8x8xbf16>, vector<8x8xbf16>, vector<8x8xf32> -> vector<8x8xf32>
    %cst_31 = arith.constant 0xFF800000 : f32
    %94 = vector.broadcast %cst_31 : f32 to vector<8x8xf32>
    %95 = arith.select %52, %93, %94 : vector<8x8xi1>, vector<8x8xf32>
    %cst_32 = arith.constant dense<0xFF800000> : vector<8xf32>
    %96 = vector.multi_reduction <maximumf>, %95, %cst_32 [1] : vector<8x8xf32> to vector<8xf32>
    %97 = vector.shape_cast %96 : vector<8xf32> to vector<8x1xf32>
    %98 = vector.broadcast %97 : vector<8x1xf32> to vector<8x8xf32>
    %99 = arith.subf %95, %98 : vector<8x8xf32>
    %100 = math.exp %99 : vector<8x8xf32>
    %cst_33 = arith.constant dense<0.000000e+00> : vector<8xf32>
    %101 = vector.multi_reduction <add>, %100, %cst_33 [1] : vector<8x8xf32> to vector<8xf32>
    %102 = vector.shape_cast %101 : vector<8xf32> to vector<8x1xf32>
    %103 = tpu.reciprocal %102 {approx = true} : vector<8x1xf32> -> vector<8x1xf32>
    %104 = vector.broadcast %103 : vector<8x1xf32> to vector<8x8xf32>
    %105 = arith.mulf %100, %104 : vector<8x8xf32>
    %106 = arith.truncf %105 : vector<8x8xf32> to vector<8x8xbf16>
    %c2 = arith.constant 2 : index
    %c0_34 = arith.constant 0 : index
    %c0_35 = arith.constant 0 : index
    %107 = vector.load %arg7[%c2, %c0_34, %c0_35] : memref<4x8x8xbf16, #tpu.memory_space<vmem>>, vector<1x8x8xbf16>
    %108 = vector.shape_cast %107 : vector<1x8x8xbf16> to vector<8x8xbf16>
    %109 = arith.mulf %106, %108 : vector<8x8xbf16>
    %110 = vector.extract_strided_slice %45 {offsets = [0, 24], sizes = [8, 8], strides = [1, 1]} : vector<8x32xbf16> to vector<8x8xbf16>
    %111 = vector.extract_strided_slice %47 {offsets = [0, 24], sizes = [8, 8], strides = [1, 1]} : vector<8x32xbf16> to vector<8x8xbf16>
    %cst_36 = arith.constant dense<0.000000e+00> : vector<8x8xf32>
    %112 = tpu.matmul %110, %111, %cst_36 {dimension_numbers = #tpu.dot_dimension_numbers<[1], [1], [0], [0], [0, 0, 1, 0], [], []>} : vector<8x8xbf16>, vector<8x8xbf16>, vector<8x8xf32> -> vector<8x8xf32>
    %cst_37 = arith.constant 0xFF800000 : f32
    %113 = vector.broadcast %cst_37 : f32 to vector<8x8xf32>
    %114 = arith.select %52, %112, %113 : vector<8x8xi1>, vector<8x8xf32>
    %cst_38 = arith.constant dense<0xFF800000> : vector<8xf32>
    %115 = vector.multi_reduction <maximumf>, %114, %cst_38 [1] : vector<8x8xf32> to vector<8xf32>
    %116 = vector.shape_cast %115 : vector<8xf32> to vector<8x1xf32>
    %117 = vector.broadcast %116 : vector<8x1xf32> to vector<8x8xf32>
    %118 = arith.subf %114, %117 : vector<8x8xf32>
    %119 = math.exp %118 : vector<8x8xf32>
    %cst_39 = arith.constant dense<0.000000e+00> : vector<8xf32>
    %120 = vector.multi_reduction <add>, %119, %cst_39 [1] : vector<8x8xf32> to vector<8xf32>
    %121 = vector.shape_cast %120 : vector<8xf32> to vector<8x1xf32>
    %122 = tpu.reciprocal %121 {approx = true} : vector<8x1xf32> -> vector<8x1xf32>
    %123 = vector.broadcast %122 : vector<8x1xf32> to vector<8x8xf32>
    %124 = arith.mulf %119, %123 : vector<8x8xf32>
    %125 = arith.truncf %124 : vector<8x8xf32> to vector<8x8xbf16>
    %c3 = arith.constant 3 : index
    %c0_40 = arith.constant 0 : index
    %c0_41 = arith.constant 0 : index
    %126 = vector.load %arg7[%c3, %c0_40, %c0_41] : memref<4x8x8xbf16, #tpu.memory_space<vmem>>, vector<1x8x8xbf16>
    %127 = vector.shape_cast %126 : vector<1x8x8xbf16> to vector<8x8xbf16>
    %128 = arith.mulf %125, %127 : vector<8x8xbf16>
    %c0_42 = arith.constant 0 : index
    %c0_43 = arith.constant 0 : index
    %129 = memref.load %arg1[%c0_42, %c0_43] : memref<4x4xf32, #tpu.memory_space<smem>>
    %130 = arith.truncf %129 : f32 to bf16
    %131 = vector.broadcast %130 : bf16 to vector<8x8xbf16>
    %132 = arith.mulf %71, %131 : vector<8x8xbf16>
    %c0_44 = arith.constant 0 : index
    %c1_45 = arith.constant 1 : index
    %133 = memref.load %arg1[%c0_44, %c1_45] : memref<4x4xf32, #tpu.memory_space<smem>>
    %134 = arith.truncf %133 : f32 to bf16
    %135 = vector.broadcast %134 : bf16 to vector<8x8xbf16>
    %136 = arith.mulf %90, %135 : vector<8x8xbf16>
    %137 = arith.addf %132, %136 : vector<8x8xbf16>
    %c0_46 = arith.constant 0 : index
    %c2_47 = arith.constant 2 : index
    %138 = memref.load %arg1[%c0_46, %c2_47] : memref<4x4xf32, #tpu.memory_space<smem>>
    %139 = arith.truncf %138 : f32 to bf16
    %140 = vector.broadcast %139 : bf16 to vector<8x8xbf16>
    %141 = arith.mulf %109, %140 : vector<8x8xbf16>
    %142 = arith.addf %137, %141 : vector<8x8xbf16>
    %c0_48 = arith.constant 0 : index
    %c3_49 = arith.constant 3 : index
    %143 = memref.load %arg1[%c0_48, %c3_49] : memref<4x4xf32, #tpu.memory_space<smem>>
    %144 = arith.truncf %143 : f32 to bf16
    %145 = vector.broadcast %144 : bf16 to vector<8x8xbf16>
    %146 = arith.mulf %128, %145 : vector<8x8xbf16>
    %147 = arith.addf %142, %146 : vector<8x8xbf16>
    %148 = vector.extract_strided_slice %49 {offsets = [0, 0], sizes = [8, 8], strides = [1, 1]} : vector<8x32xbf16> to vector<8x8xbf16>
    %cst_50 = arith.constant dense<0.000000e+00> : vector<8x8xf32>
    %149 = tpu.matmul %147, %148, %cst_50 {dimension_numbers = #tpu.dot_dimension_numbers<[1], [0], [0], [1], [0, 0, 1, 1], [], []>} : vector<8x8xbf16>, vector<8x8xbf16>, vector<8x8xf32> -> vector<8x8xf32>
    %c1_51 = arith.constant 1 : index
    %c0_52 = arith.constant 0 : index
    %150 = memref.load %arg1[%c1_51, %c0_52] : memref<4x4xf32, #tpu.memory_space<smem>>
    %151 = arith.truncf %150 : f32 to bf16
    %152 = vector.broadcast %151 : bf16 to vector<8x8xbf16>
    %153 = arith.mulf %71, %152 : vector<8x8xbf16>
    %c1_53 = arith.constant 1 : index
    %c1_54 = arith.constant 1 : index
    %154 = memref.load %arg1[%c1_53, %c1_54] : memref<4x4xf32, #tpu.memory_space<smem>>
    %155 = arith.truncf %154 : f32 to bf16
    %156 = vector.broadcast %155 : bf16 to vector<8x8xbf16>
    %157 = arith.mulf %90, %156 : vector<8x8xbf16>
    %158 = arith.addf %153, %157 : vector<8x8xbf16>
    %c1_55 = arith.constant 1 : index
    %c2_56 = arith.constant 2 : index
    %159 = memref.load %arg1[%c1_55, %c2_56] : memref<4x4xf32, #tpu.memory_space<smem>>
    %160 = arith.truncf %159 : f32 to bf16
    %161 = vector.broadcast %160 : bf16 to vector<8x8xbf16>
    %162 = arith.mulf %109, %161 : vector<8x8xbf16>
    %163 = arith.addf %158, %162 : vector<8x8xbf16>
    %c1_57 = arith.constant 1 : index
    %c3_58 = arith.constant 3 : index
    %164 = memref.load %arg1[%c1_57, %c3_58] : memref<4x4xf32, #tpu.memory_space<smem>>
    %165 = arith.truncf %164 : f32 to bf16
    %166 = vector.broadcast %165 : bf16 to vector<8x8xbf16>
    %167 = arith.mulf %128, %166 : vector<8x8xbf16>
    %168 = arith.addf %163, %167 : vector<8x8xbf16>
    %169 = vector.extract_strided_slice %49 {offsets = [0, 8], sizes = [8, 8], strides = [1, 1]} : vector<8x32xbf16> to vector<8x8xbf16>
    %cst_59 = arith.constant dense<0.000000e+00> : vector<8x8xf32>
    %170 = tpu.matmul %168, %169, %cst_59 {dimension_numbers = #tpu.dot_dimension_numbers<[1], [0], [0], [1], [0, 0, 1, 1], [], []>} : vector<8x8xbf16>, vector<8x8xbf16>, vector<8x8xf32> -> vector<8x8xf32>
    %c2_60 = arith.constant 2 : index
    %c0_61 = arith.constant 0 : index
    %171 = memref.load %arg1[%c2_60, %c0_61] : memref<4x4xf32, #tpu.memory_space<smem>>
    %172 = arith.truncf %171 : f32 to bf16
    %173 = vector.broadcast %172 : bf16 to vector<8x8xbf16>
    %174 = arith.mulf %71, %173 : vector<8x8xbf16>
    %c2_62 = arith.constant 2 : index
    %c1_63 = arith.constant 1 : index
    %175 = memref.load %arg1[%c2_62, %c1_63] : memref<4x4xf32, #tpu.memory_space<smem>>
    %176 = arith.truncf %175 : f32 to bf16
    %177 = vector.broadcast %176 : bf16 to vector<8x8xbf16>
    %178 = arith.mulf %90, %177 : vector<8x8xbf16>
    %179 = arith.addf %174, %178 : vector<8x8xbf16>
    %c2_64 = arith.constant 2 : index
    %c2_65 = arith.constant 2 : index
    %180 = memref.load %arg1[%c2_64, %c2_65] : memref<4x4xf32, #tpu.memory_space<smem>>
    %181 = arith.truncf %180 : f32 to bf16
    %182 = vector.broadcast %181 : bf16 to vector<8x8xbf16>
    %183 = arith.mulf %109, %182 : vector<8x8xbf16>
    %184 = arith.addf %179, %183 : vector<8x8xbf16>
    %c2_66 = arith.constant 2 : index
    %c3_67 = arith.constant 3 : index
    %185 = memref.load %arg1[%c2_66, %c3_67] : memref<4x4xf32, #tpu.memory_space<smem>>
    %186 = arith.truncf %185 : f32 to bf16
    %187 = vector.broadcast %186 : bf16 to vector<8x8xbf16>
    %188 = arith.mulf %128, %187 : vector<8x8xbf16>
    %189 = arith.addf %184, %188 : vector<8x8xbf16>
    %190 = vector.extract_strided_slice %49 {offsets = [0, 16], sizes = [8, 8], strides = [1, 1]} : vector<8x32xbf16> to vector<8x8xbf16>
    %cst_68 = arith.constant dense<0.000000e+00> : vector<8x8xf32>
    %191 = tpu.matmul %189, %190, %cst_68 {dimension_numbers = #tpu.dot_dimension_numbers<[1], [0], [0], [1], [0, 0, 1, 1], [], []>} : vector<8x8xbf16>, vector<8x8xbf16>, vector<8x8xf32> -> vector<8x8xf32>
    %c3_69 = arith.constant 3 : index
    %c0_70 = arith.constant 0 : index
    %192 = memref.load %arg1[%c3_69, %c0_70] : memref<4x4xf32, #tpu.memory_space<smem>>
    %193 = arith.truncf %192 : f32 to bf16
    %194 = vector.broadcast %193 : bf16 to vector<8x8xbf16>
    %195 = arith.mulf %71, %194 : vector<8x8xbf16>
    %c3_71 = arith.constant 3 : index
    %c1_72 = arith.constant 1 : index
    %196 = memref.load %arg1[%c3_71, %c1_72] : memref<4x4xf32, #tpu.memory_space<smem>>
    %197 = arith.truncf %196 : f32 to bf16
    %198 = vector.broadcast %197 : bf16 to vector<8x8xbf16>
    %199 = arith.mulf %90, %198 : vector<8x8xbf16>
    %200 = arith.addf %195, %199 : vector<8x8xbf16>
    %c3_73 = arith.constant 3 : index
    %c2_74 = arith.constant 2 : index
    %201 = memref.load %arg1[%c3_73, %c2_74] : memref<4x4xf32, #tpu.memory_space<smem>>
    %202 = arith.truncf %201 : f32 to bf16
    %203 = vector.broadcast %202 : bf16 to vector<8x8xbf16>
    %204 = arith.mulf %109, %203 : vector<8x8xbf16>
    %205 = arith.addf %200, %204 : vector<8x8xbf16>
    %c3_75 = arith.constant 3 : index
    %c3_76 = arith.constant 3 : index
    %206 = memref.load %arg1[%c3_75, %c3_76] : memref<4x4xf32, #tpu.memory_space<smem>>
    %207 = arith.truncf %206 : f32 to bf16
    %208 = vector.broadcast %207 : bf16 to vector<8x8xbf16>
    %209 = arith.mulf %128, %208 : vector<8x8xbf16>
    %210 = arith.addf %205, %209 : vector<8x8xbf16>
    %211 = vector.extract_strided_slice %49 {offsets = [0, 24], sizes = [8, 8], strides = [1, 1]} : vector<8x32xbf16> to vector<8x8xbf16>
    %cst_77 = arith.constant dense<0.000000e+00> : vector<8x8xf32>
    %212 = tpu.matmul %210, %211, %cst_77 {dimension_numbers = #tpu.dot_dimension_numbers<[1], [0], [0], [1], [0, 0, 1, 1], [], []>} : vector<8x8xbf16>, vector<8x8xbf16>, vector<8x8xf32> -> vector<8x8xf32>
    %213 = tpu.concatenate %149, %170, %191, %212 in 1 : vector<8x8xf32>, vector<8x8xf32>, vector<8x8xf32>, vector<8x8xf32> -> vector<8x32xf32>
    %214 = arith.truncf %213 : vector<8x32xf32> to vector<8x32xbf16>
    %c0_78 = arith.constant 0 : index
    %c0_79 = arith.constant 0 : index
    %215 = vector.load %arg8[%c0_78, %c0_79] : memref<32x32xbf16, #tpu.memory_space<vmem>>, vector<32x32xbf16>
    %cst_80 = arith.constant dense<0.000000e+00> : vector<8x32xf32>
    %216 = tpu.matmul %214, %215, %cst_80 {dimension_numbers = #tpu.dot_dimension_numbers<[1], [0], [0], [1], [0, 0, 1, 1], [], []>} : vector<8x32xbf16>, vector<32x32xbf16>, vector<8x32xf32> -> vector<8x32xf32>
    %c0_81 = arith.constant 0 : index
    %c0_82 = arith.constant 0 : index
    %217 = vector.load %arg9[%c0_81, %c0_82] : memref<1x32xf32, #tpu.memory_space<vmem>>, vector<1x32xf32>
    %218 = vector.broadcast %217 : vector<1x32xf32> to vector<8x32xf32>
    %219 = arith.addf %216, %218 : vector<8x32xf32>
    %220 = arith.addf %1, %219 : vector<8x32xf32>
    %c0_83 = arith.constant 0 : index
    %c0_84 = arith.constant 0 : index
    %221 = vector.load %arg10[%c0_83, %c0_84] : memref<1x32xf32, #tpu.memory_space<vmem>>, vector<1x32xf32>
    %c0_85 = arith.constant 0 : index
    %c0_86 = arith.constant 0 : index
    %222 = vector.load %arg11[%c0_85, %c0_86] : memref<1x32xf32, #tpu.memory_space<vmem>>, vector<1x32xf32>
    %cst_87 = arith.constant dense<0.000000e+00> : vector<8xf32>
    %223 = vector.multi_reduction <add>, %220, %cst_87 [1] : vector<8x32xf32> to vector<8xf32>
    %224 = vector.shape_cast %223 : vector<8xf32> to vector<8x1xf32>
    %cst_88 = arith.constant 3.200000e+01 : f32
    %225 = vector.broadcast %cst_88 : f32 to vector<8x1xf32>
    %226 = arith.divf %224, %225 : vector<8x1xf32>
    %227 = vector.broadcast %226 : vector<8x1xf32> to vector<8x32xf32>
    %228 = arith.subf %220, %227 : vector<8x32xf32>
    %229 = arith.mulf %228, %228 : vector<8x32xf32>
    %cst_89 = arith.constant dense<0.000000e+00> : vector<8xf32>
    %230 = vector.multi_reduction <add>, %229, %cst_89 [1] : vector<8x32xf32> to vector<8xf32>
    %231 = vector.shape_cast %230 : vector<8xf32> to vector<8x1xf32>
    %cst_90 = arith.constant 3.200000e+01 : f32
    %232 = vector.broadcast %cst_90 : f32 to vector<8x1xf32>
    %233 = arith.divf %231, %232 : vector<8x1xf32>
    %234 = vector.broadcast %226 : vector<8x1xf32> to vector<8x32xf32>
    %235 = arith.subf %220, %234 : vector<8x32xf32>
    %cst_91 = arith.constant 9.99999974E-6 : f32
    %236 = vector.broadcast %cst_91 : f32 to vector<8x1xf32>
    %237 = arith.addf %233, %236 : vector<8x1xf32>
    %238 = math.rsqrt %237 : vector<8x1xf32>
    %239 = vector.broadcast %238 : vector<8x1xf32> to vector<8x32xf32>
    %240 = arith.mulf %235, %239 : vector<8x32xf32>
    %241 = vector.broadcast %221 : vector<1x32xf32> to vector<8x32xf32>
    %242 = arith.mulf %240, %241 : vector<8x32xf32>
    %243 = vector.broadcast %222 : vector<1x32xf32> to vector<8x32xf32>
    %244 = arith.addf %242, %243 : vector<8x32xf32>
    %245 = arith.truncf %244 : vector<8x32xf32> to vector<8x32xbf16>
    %c0_92 = arith.constant 0 : index
    %c0_93 = arith.constant 0 : index
    %246 = vector.load %arg12[%c0_92, %c0_93] : memref<32x192xbf16, #tpu.memory_space<vmem>>, vector<32x192xbf16>
    %cst_94 = arith.constant dense<0.000000e+00> : vector<8x192xf32>
    %247 = tpu.matmul %245, %246, %cst_94 {dimension_numbers = #tpu.dot_dimension_numbers<[1], [0], [0], [1], [0, 0, 1, 1], [], []>} : vector<8x32xbf16>, vector<32x192xbf16>, vector<8x192xf32> -> vector<8x192xf32>
    %c0_95 = arith.constant 0 : index
    %c0_96 = arith.constant 0 : index
    %248 = vector.load %arg13[%c0_95, %c0_96] : memref<1x192xf32, #tpu.memory_space<vmem>>, vector<1x192xf32>
    %249 = vector.broadcast %248 : vector<1x192xf32> to vector<8x192xf32>
    %250 = arith.addf %247, %249 : vector<8x192xf32>
    %251 = vector.extract_strided_slice %250 {offsets = [0, 0], sizes = [8, 96], strides = [1, 1]} : vector<8x192xf32> to vector<8x96xf32>
    %252 = vector.extract_strided_slice %250 {offsets = [0, 96], sizes = [8, 96], strides = [1, 1]} : vector<8x192xf32> to vector<8x96xf32>
    %cst_97 = arith.constant 2.000000e+01 : f32
    %253 = vector.broadcast %cst_97 : f32 to vector<8x96xf32>
    %254 = arith.cmpf ogt, %252, %253 : vector<8x96xf32>
    %cst_98 = arith.constant 2.000000e+01 : f32
    %255 = vector.broadcast %cst_98 : f32 to vector<8x96xf32>
    %256 = arith.minimumf %252, %255 : vector<8x96xf32>
    %257 = math.exp %256 : vector<8x96xf32>
    %258 = math.log1p %257 : vector<8x96xf32>
    %259 = arith.select %254, %252, %258 : vector<8x96xi1>, vector<8x96xf32>
    %260 = math.tanh %259 : vector<8x96xf32>
    %261 = arith.mulf %252, %260 : vector<8x96xf32>
    %262 = arith.mulf %251, %261 : vector<8x96xf32>
    %263 = arith.truncf %262 : vector<8x96xf32> to vector<8x96xbf16>
    %c0_99 = arith.constant 0 : index
    %c0_100 = arith.constant 0 : index
    %264 = vector.load %arg14[%c0_99, %c0_100] : memref<96x32xbf16, #tpu.memory_space<vmem>>, vector<96x32xbf16>
    %cst_101 = arith.constant dense<0.000000e+00> : vector<8x32xf32>
    %265 = tpu.matmul %263, %264, %cst_101 {dimension_numbers = #tpu.dot_dimension_numbers<[1], [0], [0], [1], [0, 0, 1, 1], [], []>} : vector<8x96xbf16>, vector<96x32xbf16>, vector<8x32xf32> -> vector<8x32xf32>
    %c0_102 = arith.constant 0 : index
    %c0_103 = arith.constant 0 : index
    %266 = vector.load %arg15[%c0_102, %c0_103] : memref<1x32xf32, #tpu.memory_space<vmem>>, vector<1x32xf32>
    %267 = vector.broadcast %266 : vector<1x32xf32> to vector<8x32xf32>
    %268 = arith.addf %265, %267 : vector<8x32xf32>
    %269 = arith.addf %220, %268 : vector<8x32xf32>
    %c0_104 = arith.constant 0 : index
    %c0_105 = arith.constant 0 : index
    %c0_106 = arith.constant 0 : index
    %270 = vector.load %arg16[%c0_104, %c0_105, %c0_106] : memref<1x8x32xf32, #tpu.memory_space<vmem>>, vector<1x8x32xf32>
    %271 = vector.shape_cast %270 : vector<1x8x32xf32> to vector<8x32xf32>
    %272 = vector.shape_cast %269 : vector<8x32xf32> to vector<1x8x32xf32>
    tpu.vector_store %arg16[%c0_104, %c0_105, %c0_106], %272 {strides = array<i32>} : memref<1x8x32xf32, #tpu.memory_space<vmem>>, vector<1x8x32xf32>,
    return
  }
  func.func @transform_0(%arg0: i32) -> (i32, i32) {
    %c0_i32 = arith.constant 0 : i32
    %c0_i32_0 = arith.constant 0 : i32
    %c0_i32_1 = arith.constant 0 : i32
    return %c0_i32, %c0_i32_0 : i32, i32
  }
  func.func @transform_1(%arg0: i32) -> (i32, i32, i32) {
    %c0_i32 = arith.constant 0 : i32
    %c0_i32_0 = arith.constant 0 : i32
    %c0_i32_1 = arith.constant 0 : i32
    return %arg0, %c0_i32, %c0_i32_0 : i32, i32, i32
  }
  func.func @transform_2(%arg0: i32) -> (i32, i32) {
    %c0_i32 = arith.constant 0 : i32
    %c0_i32_0 = arith.constant 0 : i32
    %c0_i32_1 = arith.constant 0 : i32
    return %c0_i32, %c0_i32_0 : i32, i32
  }
  func.func @transform_3(%arg0: i32) -> (i32, i32) {
    %c0_i32 = arith.constant 0 : i32
    %c0_i32_0 = arith.constant 0 : i32
    %c0_i32_1 = arith.constant 0 : i32
    return %c0_i32, %c0_i32_0 : i32, i32
  }
  func.func @transform_4(%arg0: i32) -> (i32, i32) {
    %c0_i32 = arith.constant 0 : i32
    %c0_i32_0 = arith.constant 0 : i32
    %c0_i32_1 = arith.constant 0 : i32
    return %c0_i32, %c0_i32_0 : i32, i32
  }
  func.func @transform_5(%arg0: i32) -> (i32, i32) {
    %c0_i32 = arith.constant 0 : i32
    %c0_i32_0 = arith.constant 0 : i32
    %c0_i32_1 = arith.constant 0 : i32
    return %c0_i32, %c0_i32_0 : i32, i32
  }
  func.func @transform_6(%arg0: i32) -> (i32, i32, i32) {
    %c0_i32 = arith.constant 0 : i32
    %c0_i32_0 = arith.constant 0 : i32
    %c0_i32_1 = arith.constant 0 : i32
    %c0_i32_2 = arith.constant 0 : i32
    return %c0_i32, %c0_i32_0, %c0_i32_1 : i32, i32, i32
  }
  func.func @transform_7(%arg0: i32) -> (i32, i32) {
    %c0_i32 = arith.constant 0 : i32
    %c0_i32_0 = arith.constant 0 : i32
    %c0_i32_1 = arith.constant 0 : i32
    return %c0_i32, %c0_i32_0 : i32, i32
  }
  func.func @transform_8(%arg0: i32) -> (i32, i32) {
    %c0_i32 = arith.constant 0 : i32
    %c0_i32_0 = arith.constant 0 : i32
    %c0_i32_1 = arith.constant 0 : i32
    return %c0_i32, %c0_i32_0 : i32, i32
  }
  func.func @transform_9(%arg0: i32) -> (i32, i32) {
    %c0_i32 = arith.constant 0 : i32
    %c0_i32_0 = arith.constant 0 : i32
    %c0_i32_1 = arith.constant 0 : i32
    return %c0_i32, %c0_i32_0 : i32, i32
  }
  func.func @transform_10(%arg0: i32) -> (i32, i32) {
    %c0_i32 = arith.constant 0 : i32
    %c0_i32_0 = arith.constant 0 : i32
    %c0_i32_1 = arith.constant 0 : i32
    return %c0_i32, %c0_i32_0 : i32, i32
  }
  func.func @transform_11(%arg0: i32) -> (i32, i32) {
    %c0_i32 = arith.constant 0 : i32
    %c0_i32_0 = arith.constant 0 : i32
    %c0_i32_1 = arith.constant 0 : i32
    return %c0_i32, %c0_i32_0 : i32, i32
  }
  func.func @transform_12(%arg0: i32) -> (i32, i32) {
    %c0_i32 = arith.constant 0 : i32
    %c0_i32_0 = arith.constant 0 : i32
    %c0_i32_1 = arith.constant 0 : i32
    return %c0_i32, %c0_i32_0 : i32, i32
  }
  func.func @transform_13(%arg0: i32) -> (i32, i32) {
    %c0_i32 = arith.constant 0 : i32
    %c0_i32_0 = arith.constant 0 : i32
    %c0_i32_1 = arith.constant 0 : i32
    return %c0_i32, %c0_i32_0 : i32, i32
  }
  func.func @transform_14(%arg0: i32) -> (i32, i32) {
    %c0_i32 = arith.constant 0 : i32
    %c0_i32_0 = arith.constant 0 : i32
    %c0_i32_1 = arith.constant 0 : i32
    return %c0_i32, %c0_i32_0 : i32, i32
  }
  func.func @transform_15(%arg0: i32) -> (i32, i32, i32) {
    %c0_i32 = arith.constant 0 : i32
    %c0_i32_0 = arith.constant 0 : i32
    %c0_i32_1 = arith.constant 0 : i32
    return %arg0, %c0_i32, %c0_i32_0 : i32, i32, i32
  }
}

module attributes {stable_mosaic.version = 11 : i64} {
  func.func @block_kernel(%arg0: i32, %arg1: memref<4x4xf32, #tpu.memory_space<smem>>, %arg2: memref<1x8x32xf32, #tpu.memory_space<vmem>>, %arg3: memref<1x32xf32, #tpu.memory_space<vmem>>, %arg4: memref<1x32xf32, #tpu.memory_space<vmem>>, %arg5: memref<32x96xbf16, #tpu.memory_space<vmem>>, %arg6: memref<1x96xf32, #tpu.memory_space<vmem>>, %arg7: memref<4x8x8xbf16, #tpu.memory_space<vmem>>, %arg8: memref<32x32xbf16, #tpu.memory_space<vmem>>, %arg9: memref<1x32xf32, #tpu.memory_space<vmem>>, %arg10: memref<1x32xf32, #tpu.memory_space<vmem>>, %arg11: memref<1x32xf32, #tpu.memory_space<vmem>>, %arg12: memref<32x192xbf16, #tpu.memory_space<vmem>>, %arg13: memref<1x192xf32, #tpu.memory_space<vmem>>, %arg14: memref<96x32xbf16, #tpu.memory_space<vmem>>, %arg15: memref<1x32xf32, #tpu.memory_space<vmem>>, %arg16: memref<1x8x32xf32, #tpu.memory_space<vmem>>) attributes {dimension_semantics = [#tpu.dimension_semantics<parallel>], iteration_bounds = array<i64: 2>, scalar_prefetch = 0 : i64, scratch_operands = 0 : i64, tpu.core_type = #tpu.core_type<tc>, window_params = [{transform_indices = @transform_0, window_bounds = array<i64: 4, 4>}, {transform_indices = @transform_1, window_bounds = array<i64: 1, 8, 32>}, {pipeline_mode = #tpu.pipeline_mode<synchronous>, transform_indices = @transform_2, window_bounds = array<i64: 1, 32>}, {pipeline_mode = #tpu.pipeline_mode<synchronous>, transform_indices = @transform_3, window_bounds = array<i64: 1, 32>}, {pipeline_mode = #tpu.pipeline_mode<synchronous>, transform_indices = @transform_4, window_bounds = array<i64: 32, 96>}, {pipeline_mode = #tpu.pipeline_mode<synchronous>, transform_indices = @transform_5, window_bounds = array<i64: 1, 96>}, {pipeline_mode = #tpu.pipeline_mode<synchronous>, transform_indices = @transform_6, window_bounds = array<i64: 4, 8, 8>}, {pipeline_mode = #tpu.pipeline_mode<synchronous>, transform_indices = @transform_7, window_bounds = array<i64: 32, 32>}, {pipeline_mode = #tpu.pipeline_mode<synchronous>, transform_indices = @transform_8, window_bounds = array<i64: 1, 32>}, {pipeline_mode = #tpu.pipeline_mode<synchronous>, transform_indices = @transform_9, window_bounds = array<i64: 1, 32>}, {pipeline_mode = #tpu.pipeline_mode<synchronous>, transform_indices = @transform_10, window_bounds = array<i64: 1, 32>}, {pipeline_mode = #tpu.pipeline_mode<synchronous>, transform_indices = @transform_11, window_bounds = array<i64: 32, 192>}, {pipeline_mode = #tpu.pipeline_mode<synchronous>, transform_indices = @transform_12, window_bounds = array<i64: 1, 192>}, {pipeline_mode = #tpu.pipeline_mode<synchronous>, transform_indices = @transform_13, window_bounds = array<i64: 96, 32>}, {pipeline_mode = #tpu.pipeline_mode<synchronous>, transform_indices = @transform_14, window_bounds = array<i64: 1, 32>}, {transform_indices = @transform_15, window_bounds = array<i64: 1, 8, 32>}]} {
    %c0 = arith.constant 0 : index
    %c0_0 = arith.constant 0 : index
    %c0_1 = arith.constant 0 : index
    %0 = vector.load %arg2[%c0, %c0_0, %c0_1] : memref<1x8x32xf32, #tpu.memory_space<vmem>>, vector<1x8x32xf32>
    %1 = vector.shape_cast %0 : vector<1x8x32xf32> to vector<8x32xf32>
    %c0_2 = arith.constant 0 : index
    %c0_3 = arith.constant 0 : index
    %2 = vector.load %arg3[%c0_2, %c0_3] : memref<1x32xf32, #tpu.memory_space<vmem>>, vector<1x32xf32>
    %c0_4 = arith.constant 0 : index
    %c0_5 = arith.constant 0 : index
    %3 = vector.load %arg4[%c0_4, %c0_5] : memref<1x32xf32, #tpu.memory_space<vmem>>, vector<1x32xf32>
    %cst = arith.constant dense<0.000000e+00> : vector<8xf32>
    %4 = vector.multi_reduction <add>, %1, %cst [1] : vector<8x32xf32> to vector<8xf32>
    %5 = vector.shape_cast %4 : vector<8xf32> to vector<8x1xf32>
    %cst_6 = arith.constant 3.200000e+01 : f32
    %6 = vector.broadcast %cst_6 : f32 to vector<8x1xf32>
    %7 = arith.divf %5, %6 : vector<8x1xf32>
    %8 = vector.broadcast %7 : vector<8x1xf32> to vector<8x32xf32>
    %9 = arith.subf %1, %8 : vector<8x32xf32>
    %10 = arith.mulf %9, %9 : vector<8x32xf32>
    %cst_7 = arith.constant dense<0.000000e+00> : vector<8xf32>
    %11 = vector.multi_reduction <add>, %10, %cst_7 [1] : vector<8x32xf32> to vector<8xf32>
    %12 = vector.shape_cast %11 : vector<8xf32> to vector<8x1xf32>
    %cst_8 = arith.constant 3.200000e+01 : f32
    %13 = vector.broadcast %cst_8 : f32 to vector<8x1xf32>
    %14 = arith.divf %12, %13 : vector<8x1xf32>
    %15 = vector.broadcast %7 : vector<8x1xf32> to vector<8x32xf32>
    %16 = arith.subf %1, %15 : vector<8x32xf32>
    %cst_9 = arith.constant 9.99999974E-6 : f32
    %17 = vector.broadcast %cst_9 : f32 to vector<8x1xf32>
    %18 = arith.addf %14, %17 : vector<8x1xf32>
    %19 = math.rsqrt %18 : vector<8x1xf32>
    %20 = vector.broadcast %19 : vector<8x1xf32> to vector<8x32xf32>
    %21 = arith.mulf %16, %20 : vector<8x32xf32>
    %22 = vector.broadcast %2 : vector<1x32xf32> to vector<8x32xf32>
    %23 = arith.mulf %21, %22 : vector<8x32xf32>
    %24 = vector.broadcast %3 : vector<1x32xf32> to vector<8x32xf32>
    %25 = arith.addf %23, %24 : vector<8x32xf32>
    %c1_i32 = arith.constant 1 : i32
    %26 = tpu.dynamic_rotate %25 by %c1_i32 dim 0 : vector<8x32xf32>, i32 -> vector<8x32xf32>
    %27 = tpu.iota {dimensions = array<i32: 0>} : vector<8x32xi32>
    %c0_i32 = arith.constant 0 : i32
    %28 = vector.broadcast %c0_i32 : i32 to vector<8x32xi32>
    %29 = arith.cmpi eq, %27, %28 : vector<8x32xi32>
    %cst_10 = arith.constant 0.000000e+00 : f32
    %30 = vector.broadcast %cst_10 : f32 to vector<8x32xf32>
    %31 = arith.select %29, %30, %26 : vector<8x32xi1>, vector<8x32xf32>
    %32 = tpu.iota {dimensions = array<i32: 1>} : vector<8x32xi32>
    %c16_i32 = arith.constant 16 : i32
    %33 = vector.broadcast %c16_i32 : i32 to vector<8x32xi32>
    %34 = arith.cmpi slt, %32, %33 : vector<8x32xi32>
    %35 = arith.select %34, %31, %25 : vector<8x32xi1>, vector<8x32xf32>
    %36 = arith.truncf %35 : vector<8x32xf32> to vector<8x32xbf16>
    %c0_11 = arith.constant 0 : index
    %c0_12 = arith.constant 0 : index
    %37 = vector.load %arg5[%c0_11, %c0_12] : memref<32x96xbf16, #tpu.memory_space<vmem>>, vector<32x96xbf16>
    %cst_13 = arith.constant dense<0.000000e+00> : vector<8x96xf32>
    %38 = tpu.matmul %36, %37, %cst_13 {dimension_numbers = #tpu.dot_dimension_numbers<[1], [0], [0], [1], [0, 0, 1, 1], [], []>} : vector<8x32xbf16>, vector<32x96xbf16>, vector<8x96xf32> -> vector<8x96xf32>
    %c0_14 = arith.constant 0 : index
    %c0_15 = arith.constant 0 : index
    %39 = vector.load %arg6[%c0_14, %c0_15] : memref<1x96xf32, #tpu.memory_space<vmem>>, vector<1x96xf32>
    %40 = vector.broadcast %39 : vector<1x96xf32> to vector<8x96xf32>
    %41 = arith.addf %38, %40 : vector<8x96xf32>
    %42 = vector.extract_strided_slice %41 {offsets = [0, 0], sizes = [8, 32], strides = [1, 1]} : vector<8x96xf32> to vector<8x32xf32>
    %cst_16 = arith.constant 0.353553385 : f32
    %43 = vector.broadcast %cst_16 : f32 to vector<8x32xf32>
    %44 = arith.mulf %42, %43 : vector<8x32xf32>
    %45 = arith.truncf %44 : vector<8x32xf32> to vector<8x32xbf16>
    %46 = vector.extract_strided_slice %41 {offsets = [0, 32], sizes = [8, 32], strides = [1, 1]} : vector<8x96xf32> to vector<8x32xf32>
    %47 = arith.truncf %46 : vector<8x32xf32> to vector<8x32xbf16>
    %48 = vector.extract_strided_slice %41 {offsets = [0, 64], sizes = [8, 32], strides = [1, 1]} : vector<8x96xf32> to vector<8x32xf32>
    %49 = arith.truncf %48 : vector<8x32xf32> to vector<8x32xbf16>
    %50 = tpu.iota {dimensions = array<i32: 0>} : vector<8x8xi32>
    %51 = tpu.iota {dimensions = array<i32: 1>} : vector<8x8xi32>
    %52 = arith.cmpi sle, %51, %50 : vector<8x8xi32>
    %53 = vector.extract_strided_slice %45 {offsets = [0, 0], sizes = [8, 8], strides = [1, 1]} : vector<8x32xbf16> to vector<8x8xbf16>
    %54 = vector.extract_strided_slice %47 {offsets = [0, 0], sizes = [8, 8], strides = [1, 1]} : vector<8x32xbf16> to vector<8x8xbf16>
    %cst_17 = arith.constant dense<0.000000e+00> : vector<8x8xf32>
    %55 = tpu.matmul %53, %54, %cst_17 {dimension_numbers = #tpu.dot_dimension_numbers<[1], [1], [0], [0], [0, 0, 1, 0], [], []>} : vector<8x8xbf16>, vector<8x8xbf16>, vector<8x8xf32> -> vector<8x8xf32>
    %cst_18 = arith.constant 0xFF800000 : f32
    %56 = vector.broadcast %cst_18 : f32 to vector<8x8xf32>
    %57 = arith.select %52, %55, %56 : vector<8x8xi1>, vector<8x8xf32>
    %cst_19 = arith.constant dense<0xFF800000> : vector<8xf32>
    %58 = vector.multi_reduction <maximumf>, %57, %cst_19 [1] : vector<8x8xf32> to vector<8xf32>
    %59 = vector.shape_cast %58 : vector<8xf32> to vector<8x1xf32>
    %60 = vector.broadcast %59 : vector<8x1xf32> to vector<8x8xf32>
    %61 = arith.subf %57, %60 : vector<8x8xf32>
    %62 = math.exp %61 : vector<8x8xf32>
    %cst_20 = arith.constant dense<0.000000e+00> : vector<8xf32>
    %63 = vector.multi_reduction <add>, %62, %cst_20 [1] : vector<8x8xf32> to vector<8xf32>
    %64 = vector.shape_cast %63 : vector<8xf32> to vector<8x1xf32>
    %65 = tpu.reciprocal %64 {approx = true} : vector<8x1xf32> -> vector<8x1xf32>
    %66 = vector.broadcast %65 : vector<8x1xf32> to vector<8x8xf32>
    %67 = arith.mulf %62, %66 : vector<8x8xf32>
    %68 = arith.truncf %67 : vector<8x8xf32> to vector<8x8xbf16>
    %c0_21 = arith.constant 0 : index
    %c0_22 = arith.constant 0 : index
    %c0_23 = arith.constant 0 : index
    %69 = vector.load %arg7[%c0_21, %c0_22, %c0_23] : memref<4x8x8xbf16, #tpu.memory_space<vmem>>, vector<1x8x8xbf16>
    %70 = vector.shape_cast %69 : vector<1x8x8xbf16> to vector<8x8xbf16>
    %71 = arith.mulf %68, %70 : vector<8x8xbf16>
    %72 = vector.extract_strided_slice %45 {offsets = [0, 8], sizes = [8, 8], strides = [1, 1]} : vector<8x32xbf16> to vector<8x8xbf16>
    %73 = vector.extract_strided_slice %47 {offsets = [0, 8], sizes = [8, 8], strides = [1, 1]} : vector<8x32xbf16> to vector<8x8xbf16>
    %cst_24 = arith.constant dense<0.000000e+00> : vector<8x8xf32>
    %74 = tpu.matmul %72, %73, %cst_24 {dimension_numbers = #tpu.dot_dimension_numbers<[1], [1], [0], [0], [0, 0, 1, 0], [], []>} : vector<8x8xbf16>, vector<8x8xbf16>, vector<8x8xf32> -> vector<8x8xf32>
    %cst_25 = arith.constant 0xFF800000 : f32
    %75 = vector.broadcast %cst_25 : f32 to vector<8x8xf32>
    %76 = arith.select %52, %74, %75 : vector<8x8xi1>, vector<8x8xf32>
    %cst_26 = arith.constant dense<0xFF800000> : vector<8xf32>
    %77 = vector.multi_reduction <maximumf>, %76, %cst_26 [1] : vector<8x8xf32> to vector<8xf32>
    %78 = vector.shape_cast %77 : vector<8xf32> to vector<8x1xf32>
    %79 = vector.broadcast %78 : vector<8x1xf32> to vector<8x8xf32>
    %80 = arith.subf %76, %79 : vector<8x8xf32>
    %81 = math.exp %80 : vector<8x8xf32>
    %cst_27 = arith.constant dense<0.000000e+00> : vector<8xf32>
    %82 = vector.multi_reduction <add>, %81, %cst_27 [1] : vector<8x8xf32> to vector<8xf32>
    %83 = vector.shape_cast %82 : vector<8xf32> to vector<8x1xf32>
    %84 = tpu.reciprocal %83 {approx = true} : vector<8x1xf32> -> vector<8x1xf32>
    %85 = vector.broadcast %84 : vector<8x1xf32> to vector<8x8xf32>
    %86 = arith.mulf %81, %85 : vector<8x8xf32>
    %87 = arith.truncf %86 : vector<8x8xf32> to vector<8x8xbf16>
    %c1 = arith.constant 1 : index
    %c0_28 = arith.constant 0 : index
    %c0_29 = arith.constant 0 : index
    %88 = vector.load %arg7[%c1, %c0_28, %c0_29] : memref<4x8x8xbf16, #tpu.memory_space<vmem>>, vector<1x8x8xbf16>
    %89 = vector.shape_cast %88 : vector<1x8x8xbf16> to vector<8x8xbf16>
    %90 = arith.mulf %87, %89 : vector<8x8xbf16>
    %91 = vector.extract_strided_slice %45 {offsets = [0, 16], sizes = [8, 8], strides = [1, 1]} : vector<8x32xbf16> to vector<8x8xbf16>
    %92 = vector.extract_strided_slice %47 {offsets = [0, 16], sizes = [8, 8], strides = [1, 1]} : vector<8x32xbf16> to vector<8x8xbf16>
    %cst_30 = arith.constant dense<0.000000e+00> : vector<8x8xf32>
    %93 = tpu.matmul %91, %92, %cst_30 {dimension_numbers = #tpu.dot_dimension_numbers<[1], [1], [0], [0], [0, 0, 1, 0], [], []>} : vector<8x8xbf16>, vector<8x8xbf16>, vector<8x8xf32> -> vector<8x8xf32>
    %cst_31 = arith.constant 0xFF800000 : f32
    %94 = vector.broadcast %cst_31 : f32 to vector<8x8xf32>
    %95 = arith.select %52, %93, %94 : vector<8x8xi1>, vector<8x8xf32>
    %cst_32 = arith.constant dense<0xFF800000> : vector<8xf32>
    %96 = vector.multi_reduction <maximumf>, %95, %cst_32 [1] : vector<8x8xf32> to vector<8xf32>
    %97 = vector.shape_cast %96 : vector<8xf32> to vector<8x1xf32>
    %98 = vector.broadcast %97 : vector<8x1xf32> to vector<8x8xf32>
    %99 = arith.subf %95, %98 : vector<8x8xf32>
    %100 = math.exp %99 : vector<8x8xf32>
    %cst_33 = arith.constant dense<0.000000e+00> : vector<8xf32>
    %101 = vector.multi_reduction <add>, %100, %cst_33 [1] : vector<8x8xf32> to vector<8xf32>
    %102 = vector.shape_cast %101 : vector<8xf32> to vector<8x1xf32>
    %103 = tpu.reciprocal %102 {approx = true} : vector<8x1xf32> -> vector<8x1xf32>
    %104 = vector.broadcast %103 : vector<8x1xf32> to vector<8x8xf32>
    %105 = arith.mulf %100, %104 : vector<8x8xf32>
    %106 = arith.truncf %105 : vector<8x8xf32> to vector<8x8xbf16>
    %c2 = arith.constant 2 : index
    %c0_34 = arith.constant 0 : index
    %c0_35 = arith.constant 0 : index
    %107 = vector.load %arg7[%c2, %c0_34, %c0_35] : memref<4x8x8xbf16, #tpu.memory_space<vmem>>, vector<1x8x8xbf16>
    %108 = vector.shape_cast %107 : vector<1x8x8xbf16> to vector<8x8xbf16>
    %109 = arith.mulf %106, %108 : vector<8x8xbf16>
    %110 = vector.extract_strided_slice %45 {offsets = [0, 24], sizes = [8, 8], strides = [1, 1]} : vector<8x32xbf16> to vector<8x8xbf16>
    %111 = vector.extract_strided_slice %47 {offsets = [0, 24], sizes = [8, 8], strides = [1, 1]} : vector<8x32xbf16> to vector<8x8xbf16>
    %cst_36 = arith.constant dense<0.000000e+00> : vector<8x8xf32>
    %112 = tpu.matmul %110, %111, %cst_36 {dimension_numbers = #tpu.dot_dimension_numbers<[1], [1], [0], [0], [0, 0, 1, 0], [], []>} : vector<8x8xbf16>, vector<8x8xbf16>, vector<8x8xf32> -> vector<8x8xf32>
    %cst_37 = arith.constant 0xFF800000 : f32
    %113 = vector.broadcast %cst_37 : f32 to vector<8x8xf32>
    %114 = arith.select %52, %112, %113 : vector<8x8xi1>, vector<8x8xf32>
    %cst_38 = arith.constant dense<0xFF800000> : vector<8xf32>
    %115 = vector.multi_reduction <maximumf>, %114, %cst_38 [1] : vector<8x8xf32> to vector<8xf32>
    %116 = vector.shape_cast %115 : vector<8xf32> to vector<8x1xf32>
    %117 = vector.broadcast %116 : vector<8x1xf32> to vector<8x8xf32>
    %118 = arith.subf %114, %117 : vector<8x8xf32>
    %119 = math.exp %118 : vector<8x8xf32>
    %cst_39 = arith.constant dense<0.000000e+00> : vector<8xf32>
    %120 = vector.multi_reduction <add>, %119, %cst_39 [1] : vector<8x8xf32> to vector<8xf32>
    %121 = vector.shape_cast %120 : vector<8xf32> to vector<8x1xf32>
    %122 = tpu.reciprocal %121 {approx = true} : vector<8x1xf32> -> vector<8x1xf32>
    %123 = vector.broadcast %122 : vector<8x1xf32> to vector<8x8xf32>
    %124 = arith.mulf %119, %123 : vector<8x8xf32>
    %125 = arith.truncf %124 : vector<8x8xf32> to vector<8x8xbf16>
    %c3 = arith.constant 3 : index
    %c0_40 = arith.constant 0 : index
    %c0_41 = arith.constant 0 : index
    %126 = vector.load %arg7[%c3, %c0_40, %c0_41] : memref<4x8x8xbf16, #tpu.memory_space<vmem>>, vector<1x8x8xbf16>
    %127 = vector.shape_cast %126 : vector<1x8x8xbf16> to vector<8x8xbf16>
    %128 = arith.mulf %125, %127 : vector<8x8xbf16>
    %c0_42 = arith.constant 0 : index
    %c0_43 = arith.constant 0 : index
    %129 = memref.load %arg1[%c0_42, %c0_43] : memref<4x4xf32, #tpu.memory_space<smem>>
    %130 = arith.truncf %129 : f32 to bf16
    %131 = vector.broadcast %130 : bf16 to vector<8x8xbf16>
    %132 = arith.mulf %71, %131 : vector<8x8xbf16>
    %c0_44 = arith.constant 0 : index
    %c1_45 = arith.constant 1 : index
    %133 = memref.load %arg1[%c0_44, %c1_45] : memref<4x4xf32, #tpu.memory_space<smem>>
    %134 = arith.truncf %133 : f32 to bf16
    %135 = vector.broadcast %134 : bf16 to vector<8x8xbf16>
    %136 = arith.mulf %90, %135 : vector<8x8xbf16>
    %137 = arith.addf %132, %136 : vector<8x8xbf16>
    %c0_46 = arith.constant 0 : index
    %c2_47 = arith.constant 2 : index
    %138 = memref.load %arg1[%c0_46, %c2_47] : memref<4x4xf32, #tpu.memory_space<smem>>
    %139 = arith.truncf %138 : f32 to bf16
    %140 = vector.broadcast %139 : bf16 to vector<8x8xbf16>
    %141 = arith.mulf %109, %140 : vector<8x8xbf16>
    %142 = arith.addf %137, %141 : vector<8x8xbf16>
    %c0_48 = arith.constant 0 : index
    %c3_49 = arith.constant 3 : index
    %143 = memref.load %arg1[%c0_48, %c3_49] : memref<4x4xf32, #tpu.memory_space<smem>>
    %144 = arith.truncf %143 : f32 to bf16
    %145 = vector.broadcast %144 : bf16 to vector<8x8xbf16>
    %146 = arith.mulf %128, %145 : vector<8x8xbf16>
    %147 = arith.addf %142, %146 : vector<8x8xbf16>
    %148 = vector.extract_strided_slice %49 {offsets = [0, 0], sizes = [8, 8], strides = [1, 1]} : vector<8x32xbf16> to vector<8x8xbf16>
    %cst_50 = arith.constant dense<0.000000e+00> : vector<8x8xf32>
    %149 = tpu.matmul %147, %148, %cst_50 {dimension_numbers = #tpu.dot_dimension_numbers<[1], [0], [0], [1], [0, 0, 1, 1], [], []>} : vector<8x8xbf16>, vector<8x8xbf16>, vector<8x8xf32> -> vector<8x8xf32>
    %c1_51 = arith.constant 1 : index
    %c0_52 = arith.constant 0 : index
    %150 = memref.load %arg1[%c1_51, %c0_52] : memref<4x4xf32, #tpu.memory_space<smem>>
    %151 = arith.truncf %150 : f32 to bf16
    %152 = vector.broadcast %151 : bf16 to vector<8x8xbf16>
    %153 = arith.mulf %71, %152 : vector<8x8xbf16>
    %c1_53 = arith.constant 1 : index
    %c1_54 = arith.constant 1 : index
    %154 = memref.load %arg1[%c1_53, %c1_54] : memref<4x4xf32, #tpu.memory_space<smem>>
    %155 = arith.truncf %154 : f32 to bf16
    %156 = vector.broadcast %155 : bf16 to vector<8x8xbf16>
    %157 = arith.mulf %90, %156 : vector<8x8xbf16>
    %158 = arith.addf %153, %157 : vector<8x8xbf16>
    %c1_55 = arith.constant 1 : index
    %c2_56 = arith.constant 2 : index
    %159 = memref.load %arg1[%c1_55, %c2_56] : memref<4x4xf32, #tpu.memory_space<smem>>
    %160 = arith.truncf %159 : f32 to bf16
    %161 = vector.broadcast %160 : bf16 to vector<8x8xbf16>
    %162 = arith.mulf %109, %161 : vector<8x8xbf16>
    %163 = arith.addf %158, %162 : vector<8x8xbf16>
    %c1_57 = arith.constant 1 : index
    %c3_58 = arith.constant 3 : index
    %164 = memref.load %arg1[%c1_57, %c3_58] : memref<4x4xf32, #tpu.memory_space<smem>>
    %165 = arith.truncf %164 : f32 to bf16
    %166 = vector.broadcast %165 : bf16 to vector<8x8xbf16>
    %167 = arith.mulf %128, %166 : vector<8x8xbf16>
    %168 = arith.addf %163, %167 : vector<8x8xbf16>
    %169 = vector.extract_strided_slice %49 {offsets = [0, 8], sizes = [8, 8], strides = [1, 1]} : vector<8x32xbf16> to vector<8x8xbf16>
    %cst_59 = arith.constant dense<0.000000e+00> : vector<8x8xf32>
    %170 = tpu.matmul %168, %169, %cst_59 {dimension_numbers = #tpu.dot_dimension_numbers<[1], [0], [0], [1], [0, 0, 1, 1], [], []>} : vector<8x8xbf16>, vector<8x8xbf16>, vector<8x8xf32> -> vector<8x8xf32>
    %c2_60 = arith.constant 2 : index
    %c0_61 = arith.constant 0 : index
    %171 = memref.load %arg1[%c2_60, %c0_61] : memref<4x4xf32, #tpu.memory_space<smem>>
    %172 = arith.truncf %171 : f32 to bf16
    %173 = vector.broadcast %172 : bf16 to vector<8x8xbf16>
    %174 = arith.mulf %71, %173 : vector<8x8xbf16>
    %c2_62 = arith.constant 2 : index
    %c1_63 = arith.constant 1 : index
    %175 = memref.load %arg1[%c2_62, %c1_63] : memref<4x4xf32, #tpu.memory_space<smem>>
    %176 = arith.truncf %175 : f32 to bf16
    %177 = vector.broadcast %176 : bf16 to vector<8x8xbf16>
    %178 = arith.mulf %90, %177 : vector<8x8xbf16>
    %179 = arith.addf %174, %178 : vector<8x8xbf16>
    %c2_64 = arith.constant 2 : index
    %c2_65 = arith.constant 2 : index
    %180 = memref.load %arg1[%c2_64, %c2_65] : memref<4x4xf32, #tpu.memory_space<smem>>
    %181 = arith.truncf %180 : f32 to bf16
    %182 = vector.broadcast %181 : bf16 to vector<8x8xbf16>
    %183 = arith.mulf %109, %182 : vector<8x8xbf16>
    %184 = arith.addf %179, %183 : vector<8x8xbf16>
    %c2_66 = arith.constant 2 : index
    %c3_67 = arith.constant 3 : index
    %185 = memref.load %arg1[%c2_66, %c3_67] : memref<4x4xf32, #tpu.memory_space<smem>>
    %186 = arith.truncf %185 : f32 to bf16
    %187 = vector.broadcast %186 : bf16 to vector<8x8xbf16>
    %188 = arith.mulf %128, %187 : vector<8x8xbf16>
    %189 = arith.addf %184, %188 : vector<8x8xbf16>
    %190 = vector.extract_strided_slice %49 {offsets = [0, 16], sizes = [8, 8], strides = [1, 1]} : vector<8x32xbf16> to vector<8x8xbf16>
    %cst_68 = arith.constant dense<0.000000e+00> : vector<8x8xf32>
    %191 = tpu.matmul %189, %190, %cst_68 {dimension_numbers = #tpu.dot_dimension_numbers<[1], [0], [0], [1], [0, 0, 1, 1], [], []>} : vector<8x8xbf16>, vector<8x8xbf16>, vector<8x8xf32> -> vector<8x8xf32>
    %c3_69 = arith.constant 3 : index
    %c0_70 = arith.constant 0 : index
    %192 = memref.load %arg1[%c3_69, %c0_70] : memref<4x4xf32, #tpu.memory_space<smem>>
    %193 = arith.truncf %192 : f32 to bf16
    %194 = vector.broadcast %193 : bf16 to vector<8x8xbf16>
    %195 = arith.mulf %71, %194 : vector<8x8xbf16>
    %c3_71 = arith.constant 3 : index
    %c1_72 = arith.constant 1 : index
    %196 = memref.load %arg1[%c3_71, %c1_72] : memref<4x4xf32, #tpu.memory_space<smem>>
    %197 = arith.truncf %196 : f32 to bf16
    %198 = vector.broadcast %197 : bf16 to vector<8x8xbf16>
    %199 = arith.mulf %90, %198 : vector<8x8xbf16>
    %200 = arith.addf %195, %199 : vector<8x8xbf16>
    %c3_73 = arith.constant 3 : index
    %c2_74 = arith.constant 2 : index
    %201 = memref.load %arg1[%c3_73, %c2_74] : memref<4x4xf32, #tpu.memory_space<smem>>
    %202 = arith.truncf %201 : f32 to bf16
    %203 = vector.broadcast %202 : bf16 to vector<8x8xbf16>
    %204 = arith.mulf %109, %203 : vector<8x8xbf16>
    %205 = arith.addf %200, %204 : vector<8x8xbf16>
    %c3_75 = arith.constant 3 : index
    %c3_76 = arith.constant 3 : index
    %206 = memref.load %arg1[%c3_75, %c3_76] : memref<4x4xf32, #tpu.memory_space<smem>>
    %207 = arith.truncf %206 : f32 to bf16
    %208 = vector.broadcast %207 : bf16 to vector<8x8xbf16>
    %209 = arith.mulf %128, %208 : vector<8x8xbf16>
    %210 = arith.addf %205, %209 : vector<8x8xbf16>
    %211 = vector.extract_strided_slice %49 {offsets = [0, 24], sizes = [8, 8], strides = [1, 1]} : vector<8x32xbf16> to vector<8x8xbf16>
    %cst_77 = arith.constant dense<0.000000e+00> : vector<8x8xf32>
    %212 = tpu.matmul %210, %211, %cst_77 {dimension_numbers = #tpu.dot_dimension_numbers<[1], [0], [0], [1], [0, 0, 1, 1], [], []>} : vector<8x8xbf16>, vector<8x8xbf16>, vector<8x8xf32> -> vector<8x8xf32>
    %213 = tpu.concatenate %149, %170, %191, %212 in 1 : vector<8x8xf32>, vector<8x8xf32>, vector<8x8xf32>, vector<8x8xf32> -> vector<8x32xf32>
    %214 = arith.truncf %213 : vector<8x32xf32> to vector<8x32xbf16>
    %c0_78 = arith.constant 0 : index
    %c0_79 = arith.constant 0 : index
    %215 = vector.load %arg8[%c0_78, %c0_79] : memref<32x32xbf16, #tpu.memory_space<vmem>>, vector<32x32xbf16>
    %cst_80 = arith.constant dense<0.000000e+00> : vector<8x32xf32>
    %216 = tpu.matmul %214, %215, %cst_80 {dimension_numbers = #tpu.dot_dimension_numbers<[1], [0], [0], [1], [0, 0, 1, 1], [], []>} : vector<8x32xbf16>, vector<32x32xbf16>, vector<8x32xf32> -> vector<8x32xf32>
    %c0_81 = arith.constant 0 : index
    %c0_82 = arith.constant 0 : index
    %217 = vector.load %arg9[%c0_81, %c0_82] : memref<1x32xf32, #tpu.memory_space<vmem>>, vector<1x32xf32>
    %218 = vector.broadcast %217 : vector<1x32xf32> to vector<8x32xf32>
    %219 = arith.addf %216, %218 : vector<8x32xf32>
    %220 = arith.addf %1, %219 : vector<8x32xf32>
    %c0_83 = arith.constant 0 : index
    %c0_84 = arith.constant 0 : index
    %221 = vector.load %arg10[%c0_83, %c0_84] : memref<1x32xf32, #tpu.memory_space<vmem>>, vector<1x32xf32>
    %c0_85 = arith.constant 0 : index
    %c0_86 = arith.constant 0 : index
    %222 = vector.load %arg11[%c0_85, %c0_86] : memref<1x32xf32, #tpu.memory_space<vmem>>, vector<1x32xf32>
    %cst_87 = arith.constant dense<0.000000e+00> : vector<8xf32>
    %223 = vector.multi_reduction <add>, %220, %cst_87 [1] : vector<8x32xf32> to vector<8xf32>
    %224 = vector.shape_cast %223 : vector<8xf32> to vector<8x1xf32>
    %cst_88 = arith.constant 3.200000e+01 : f32
    %225 = vector.broadcast %cst_88 : f32 to vector<8x1xf32>
    %226 = arith.divf %224, %225 : vector<8x1xf32>
    %227 = vector.broadcast %226 : vector<8x1xf32> to vector<8x32xf32>
    %228 = arith.subf %220, %227 : vector<8x32xf32>
    %229 = arith.mulf %228, %228 : vector<8x32xf32>
    %cst_89 = arith.constant dense<0.000000e+00> : vector<8xf32>
    %230 = vector.multi_reduction <add>, %229, %cst_89 [1] : vector<8x32xf32> to vector<8xf32>
    %231 = vector.shape_cast %230 : vector<8xf32> to vector<8x1xf32>
    %cst_90 = arith.constant 3.200000e+01 : f32
    %232 = vector.broadcast %cst_90 : f32 to vector<8x1xf32>
    %233 = arith.divf %231, %232 : vector<8x1xf32>
    %234 = vector.broadcast %226 : vector<8x1xf32> to vector<8x32xf32>
    %235 = arith.subf %220, %234 : vector<8x32xf32>
    %cst_91 = arith.constant 9.99999974E-6 : f32
    %236 = vector.broadcast %cst_91 : f32 to vector<8x1xf32>
    %237 = arith.addf %233, %236 : vector<8x1xf32>
    %238 = math.rsqrt %237 : vector<8x1xf32>
    %239 = vector.broadcast %238 : vector<8x1xf32> to vector<8x32xf32>
    %240 = arith.mulf %235, %239 : vector<8x32xf32>
    %241 = vector.broadcast %221 : vector<1x32xf32> to vector<8x32xf32>
    %242 = arith.mulf %240, %241 : vector<8x32xf32>
    %243 = vector.broadcast %222 : vector<1x32xf32> to vector<8x32xf32>
    %244 = arith.addf %242, %243 : vector<8x32xf32>
    %245 = arith.truncf %244 : vector<8x32xf32> to vector<8x32xbf16>
    %c0_92 = arith.constant 0 : index
    %c0_93 = arith.constant 0 : index
    %246 = vector.load %arg12[%c0_92, %c0_93] : memref<32x192xbf16, #tpu.memory_space<vmem>>, vector<32x192xbf16>
    %cst_94 = arith.constant dense<0.000000e+00> : vector<8x192xf32>
    %247 = tpu.matmul %245, %246, %cst_94 {dimension_numbers = #tpu.dot_dimension_numbers<[1], [0], [0], [1], [0, 0, 1, 1], [], []>} : vector<8x32xbf16>, vector<32x192xbf16>, vector<8x192xf32> -> vector<8x192xf32>
    %c0_95 = arith.constant 0 : index
    %c0_96 = arith.constant 0 : index
    %248 = vector.load %arg13[%c0_95, %c0_96] : memref<1x192xf32, #tpu.memory_space<vmem>>, vector<1x192xf32>
    %249 = vector.broadcast %248 : vector<1x192xf32> to vector<8x192xf32>
    %250 = arith.addf %247, %249 : vector<8x192xf32>
    %251 = vector.extract_strided_slice %250 {offsets = [0, 0], sizes = [8, 96], strides = [1, 1]} : vector<8x192xf32> to vector<8x96xf32>
    %252 = vector.extract_strided_slice %250 {offsets = [0, 96], sizes = [8, 96], strides = [1, 1]} : vector<8x192xf32> to vector<8x96xf32>
    %cst_97 = arith.constant 2.000000e+01 : f32
    %253 = vector.broadcast %cst_97 : f32 to vector<8x96xf32>
    %254 = arith.cmpf ogt, %252, %253 : vector<8x96xf32>
    %cst_98 = arith.constant 2.000000e+01 : f32
    %255 = vector.broadcast %cst_98 : f32 to vector<8x96xf32>
    %256 = arith.minimumf %252, %255 : vector<8x96xf32>
    %257 = math.exp %256 : vector<8x96xf32>
    %258 = math.log1p %257 : vector<8x96xf32>
    %259 = arith.select %254, %252, %258 : vector<8x96xi1>, vector<8x96xf32>
    %260 = math.tanh %259 : vector<8x96xf32>
    %261 = arith.mulf %252, %260 : vector<8x96xf32>
    %262 = arith.mulf %251, %261 : vector<8x96xf32>
    %263 = arith.truncf %262 : vector<8x96xf32> to vector<8x96xbf16>
    %c0_99 = arith.constant 0 : index
    %c0_100 = arith.constant 0 : index
    %264 = vector.load %arg14[%c0_99, %c0_100] : memref<96x32xbf16, #tpu.memory_space<vmem>>, vector<96x32xbf16>
    %cst_101 = arith.constant dense<0.000000e+00> : vector<8x32xf32>
    %265 = tpu.matmul %263, %264, %cst_101 {dimension_numbers = #tpu.dot_dimension_numbers<[1], [0], [0], [1], [0, 0, 1, 1], [], []>} : vector<8x96xbf16>, vector<96x32xbf16>, vector<8x32xf32> -> vector<8x32xf32>
    %c0_102 = arith.constant 0 : index
    %c0_103 = arith.constant 0 : index
    %266 = vector.load %arg15[%c0_102, %c0_103] : memref<1x32xf32, #tpu.memory_space<vmem>>, vector<1x32xf32>
    %267 = vector.broadcast %266 : vector<1x32xf32> to vector<8x32xf32>
    %268 = arith.addf %265, %267 : vector<8x32xf32>
    %269 = arith.addf %220, %268 : vector<8x32xf32>
    %c0_104 = arith.constant 0 : index
    %c0_105 = arith.constant 0 : index
    %c0_106 = arith.constant 0 : index
    %270 = vector.load %arg16[%c0_104, %c0_105, %c0_106] : memref<1x8x32xf32, #tpu.memory_space<vmem>>, vector<1x8x32xf32>
    %271 = vector.shape_cast %270 : vector<1x8x32xf32> to vector<8x32xf32>
    %272 = vector.shape_cast %269 : vector<8x32xf32> to vector<1x8x32xf32>
    tpu.vector_store %arg16[%c0_104, %c0_105, %c0_106], %272 {strides = array<i32>} : memref<1x8x32xf32, #tpu.memory_space<vmem>>, vector<1x8x32xf32>,
    return
  }
  func.func @transform_0(%arg0: i32) -> (i32, i32) {
    %c0_i32 = arith.constant 0 : i32
    %c0_i32_0 = arith.constant 0 : i32
    %c0_i32_1 = arith.constant 0 : i32
    return %c0_i32, %c0_i32_0 : i32, i32
  }
  func.func @transform_1(%arg0: i32) -> (i32, i32, i32) {
    %c0_i32 = arith.constant 0 : i32
    %c0_i32_0 = arith.constant 0 : i32
    %c0_i32_1 = arith.constant 0 : i32
    return %arg0, %c0_i32, %c0_i32_0 : i32, i32, i32
  }
  func.func @transform_2(%arg0: i32) -> (i32, i32) {
    %c0_i32 = arith.constant 0 : i32
    %c0_i32_0 = arith.constant 0 : i32
    %c0_i32_1 = arith.constant 0 : i32
    return %c0_i32, %c0_i32_0 : i32, i32
  }
  func.func @transform_3(%arg0: i32) -> (i32, i32) {
    %c0_i32 = arith.constant 0 : i32
    %c0_i32_0 = arith.constant 0 : i32
    %c0_i32_1 = arith.constant 0 : i32
    return %c0_i32, %c0_i32_0 : i32, i32
  }
  func.func @transform_4(%arg0: i32) -> (i32, i32) {
    %c0_i32 = arith.constant 0 : i32
    %c0_i32_0 = arith.constant 0 : i32
    %c0_i32_1 = arith.constant 0 : i32
    return %c0_i32, %c0_i32_0 : i32, i32
  }
  func.func @transform_5(%arg0: i32) -> (i32, i32) {
    %c0_i32 = arith.constant 0 : i32
    %c0_i32_0 = arith.constant 0 : i32
    %c0_i32_1 = arith.constant 0 : i32
    return %c0_i32, %c0_i32_0 : i32, i32
  }
  func.func @transform_6(%arg0: i32) -> (i32, i32, i32) {
    %c0_i32 = arith.constant 0 : i32
    %c0_i32_0 = arith.constant 0 : i32
    %c0_i32_1 = arith.constant 0 : i32
    %c0_i32_2 = arith.constant 0 : i32
    return %c0_i32, %c0_i32_0, %c0_i32_1 : i32, i32, i32
  }
  func.func @transform_7(%arg0: i32) -> (i32, i32) {
    %c0_i32 = arith.constant 0 : i32
    %c0_i32_0 = arith.constant 0 : i32
    %c0_i32_1 = arith.constant 0 : i32
    return %c0_i32, %c0_i32_0 : i32, i32
  }
  func.func @transform_8(%arg0: i32) -> (i32, i32) {
    %c0_i32 = arith.constant 0 : i32
    %c0_i32_0 = arith.constant 0 : i32
    %c0_i32_1 = arith.constant 0 : i32
    return %c0_i32, %c0_i32_0 : i32, i32
  }
  func.func @transform_9(%arg0: i32) -> (i32, i32) {
    %c0_i32 = arith.constant 0 : i32
    %c0_i32_0 = arith.constant 0 : i32
    %c0_i32_1 = arith.constant 0 : i32
    return %c0_i32, %c0_i32_0 : i32, i32
  }
  func.func @transform_10(%arg0: i32) -> (i32, i32) {
    %c0_i32 = arith.constant 0 : i32
    %c0_i32_0 = arith.constant 0 : i32
    %c0_i32_1 = arith.constant 0 : i32
    return %c0_i32, %c0_i32_0 : i32, i32
  }
  func.func @transform_11(%arg0: i32) -> (i32, i32) {
    %c0_i32 = arith.constant 0 : i32
    %c0_i32_0 = arith.constant 0 : i32
    %c0_i32_1 = arith.constant 0 : i32
    return %c0_i32, %c0_i32_0 : i32, i32
  }
  func.func @transform_12(%arg0: i32) -> (i32, i32) {
    %c0_i32 = arith.constant 0 : i32
    %c0_i32_0 = arith.constant 0 : i32
    %c0_i32_1 = arith.constant 0 : i32
    return %c0_i32, %c0_i32_0 : i32, i32
  }
  func.func @transform_13(%arg0: i32) -> (i32, i32) {
    %c0_i32 = arith.constant 0 : i32
    %c0_i32_0 = arith.constant 0 : i32
    %c0_i32_1 = arith.constant 0 : i32
    return %c0_i32, %c0_i32_0 : i32, i32
  }
  func.func @transform_14(%arg0: i32) -> (i32, i32) {
    %c0_i32 = arith.constant 0 : i32
    %c0_i32_0 = arith.constant 0 : i32
    %c0_i32_1 = arith.constant 0 : i32
    return %c0_i32, %c0_i32_0 : i32, i32
  }
  func.func @transform_15(%arg0: i32) -> (i32, i32, i32) {
    %c0_i32 = arith.constant 0 : i32
    %c0_i32_0 = arith.constant 0 : i32
    %c0_i32_1 = arith.constant 0 : i32
    return %arg0, %c0_i32, %c0_i32_0 : i32, i32, i32
  }
}

</mosaic_0001>

<bundles_post_ra>
// kernel: tpu_custom_call.1
= control target key start
LH: loop header
LB: loop body
LE: loop exit
PB: predicated region body
PF: predicated region fallthrough
CT: control target
= control target key end

     0   :  { %s2976_s0 = inlined_call_operand.hbm [shape: f32[4,4], index: 0, kind: input, shape index: {}]   ;;  %s2977_s1 = inlined_call_operand.vmem [shape: f32[2,8,32], index: 1, kind: input, shape index: {}]   ;;  %s2978_s2 = inlined_call_operand.vmem [shape: f32[1,32], index: 2, kind: input, shape index: {}]   ;;  %s2979_s3 = inlined_call_operand.vmem [shape: f32[1,32], index: 3, kind: input, shape index: {}]   ;;  %s2980_s4 = inlined_call_operand.vmem [shape: bf16[32,96], index: 4, kind: input, shape index: {}]   ;;  %s2981_s5 = inlined_call_operand.vmem [shape: f32[1,96], index: 5, kind: input, shape index: {}]   ;;  %s2982_s6 = inlined_call_operand.hbm [shape: bf16[4,8,8], index: 6, kind: input, shape index: {}]   ;;  %s2983_s7 = inlined_call_operand.hbm [shape: bf16[32,32], index: 7, kind: input, shape index: {}]   ;;  %s2984_s8 = inlined_call_operand.vmem [shape: f32[1,32], index: 8, kind: input, shape index: {}]   ;;  %s2985_s9 = inlined_call_operand.vmem [shape: f32[1,32], index: 9, kind: input, shape index: {}]   ;;  %s2986_s10 = inlined_call_operand.vmem [shape: f32[1,32], index: 10, kind: input, shape index: {}]   ;;  %s2987_s11 = inlined_call_operand.vmem [shape: bf16[32,192], index: 11, kind: input, shape index: {}]   ;;  %s2988_s12 = inlined_call_operand.vmem [shape: f32[1,192], index: 12, kind: input, shape index: {}]   ;;  %s2989_s13 = inlined_call_operand.vmem [shape: bf16[96,32], index: 13, kind: input, shape index: {}]   ;;  %s2990_s14 = inlined_call_operand.vmem [shape: f32[1,32], index: 14, kind: input, shape index: {}]   ;;  %s2991_s15 = inlined_call_operand.hbm [shape: f32[2,8,32], index: 15, kind: output, shape index: {}]  }
   0x1   :  { %3006 = sst [smem:[#allocation23_spill]] %s2976_s0 }
   0x2   :  { %3007 = sst [smem:[#allocation24_spill]] %s2977_s1 }
   0x3   :  { %3008 = sst [smem:[#allocation25_spill]] %s2978_s2 }
   0x4   :  { %3009 = sst [smem:[#allocation26_spill]] %s2979_s3 }
   0x5   :  { %3010 = sst [smem:[#allocation27_spill]] %s2980_s4 }
   0x6   :  { %3011 = sst [smem:[#allocation28_spill]] %s2981_s5 }
   0x7   :  { %3012 = sst [smem:[#allocation29_spill]] %s2982_s6 }
   0x8   :  { %3013 = sst [smem:[#allocation30_spill]] %s2983_s7 }
   0x9   :  { %3014 = sst [smem:[#allocation31_spill]] %s2984_s8 }
   0xa   :  { %3015 = sst [smem:[#allocation32_spill]] %s2985_s9 }
   0xb   :  { %3016 = sst [smem:[#allocation33_spill]] %s2986_s10 }
   0xc   :  { %3017 = sst [smem:[#allocation34_spill]] %s2987_s11 }
   0xd   :  { %3018 = sst [smem:[#allocation35_spill]] %s2988_s12 }
   0xe   :  { %3019 = sst [smem:[#allocation36_spill]] %s2989_s13 }
   0xf   :  { %3020 = sst [smem:[#allocation37_spill]] %s2990_s14 }
  0x10   :  { %3021 = sst [smem:[#allocation38_spill]] %s2991_s15 }
  0x11   :  { %20 = vsyncpa [#allocation5], 0 }
  0x12   :  { %21 = vsyncpa [#allocation3], 0 }
  0x13   :  { %22 = vsyncpa [#allocation8], 0 }
  0x14   :  { %23 = vsyncpa [#allocation4], 0 }
  0x15   :  { %25 = vsyncpa [#allocation4 + $0x1], 0  ;;  %s2375_s18 = smov 0   ;;  %s2377_s19 = smov 0  }
  0x16   :  { %s2379_s20 = smov 0   ;;  %s2381_s21 = smov 0  }
  0x17 LB: > { %3022 = sst [smem:[#allocation14_spill]] %s2257_s18  ;;  %s2396_s22 = sadd.s32 4294967295, %s2269_s21   ;;  %s2269_s21 = sphi %s2381_s21, %s3065_s21   ;;  %s2265_s20 = sphi %s2379_s20, %s3068_s20   ;;  %s2261_s19 = sphi %s2377_s19, %s3067_s19   ;;  %s2257_s18 = sphi %s2375_s18, %s3066_s18  }
  0x18   : > { %3023 = sst [smem:[#allocation15_spill]] %s2261_s19  ;;  %s1815_s23 = sadd.s32 4294967294, %s2269_s21  }
  0x19   : > { %3024 = sst [smem:[#allocation16_spill]] %s2265_s20  ;;  %s2400_s24 = sadd.s32 1, %s2269_s21  }
  0x1a   : > { %3025 = sst [smem:[#allocation17_spill]] %s2269_s21  ;;  %s358_s25 = sadd.s32 1, %s2265_s20 }
  0x1b   : > { %3026 = sst [smem:[#allocation18_spill]] %s2396_s22  ;;  %s355_s26 = ssub.s32 %s2269_s21, %s2400_s24 }
  0x1c   : > { %3027 = sst [smem:[#allocation19_spill]] %s2400_s24  ;;  %p368_p0 = scmp.ne.s32.totalorder %s2265_s20, %s2261_s19 }
  0x1d   : > { %p356_p1 = scmp.eq.s32.totalorder %s355_s26, 0  ;;  %p369_p2 = scmp.eq.s32.totalorder %s2396_s22, 1 }
  0x1e   : > { %p374_p3 = scmp.ne.s32.totalorder %s2261_s19, %s2257_s18  ;;  %p375_p4 = scmp.eq.s32.totalorder %s1815_s23, 1 }
  0x1f   : > { %s2411_s27 = scalar_select %p356_p1, %s2265_s20, %s358_s25  }
  0x20   : > { %p2413_p5 = por %p369_p2, %p368_p0  ;;  %p2417_p6 = por %p375_p4, %p374_p3 }
  0x21   : > { %3028 = sst [smem:[#allocation20_spill]] %s2411_s27  ;;  %p1816_p7 = scmp.ge.s32.totalorder %s2269_s21, 1 }
  0x22   : > { %s3029_s28 = scalar_select %p2413_p5, 1, 0 }
  0x23   : > { %s3031_s29 = scalar_select %p2417_p6, 1, 0 }
  0x24   : > { %3030 = sst [smem:[#allocation21_spill]] %s3029_s28  ;;  %p382_p8 = scmp.lt.s32.totalorder %s2269_s21, 3 }
  0x25   : > { %3032 = sst [smem:[#allocation22_spill]] %s3031_s29  ;;  %p3002_p10 = scmp.eq.s32.totalorder %s2396_s22, 0 }
  0x26   : > { %p2423_p9 = pnand %p1816_p7, %p382_p8  ;;  %s2271_s16 = smov [#allocation6]  }
  0x27   : > { %s415_s17 = sshll.u32 %s2271_s16, 4  ;;  %s2272_s25 = smov [#allocation7]   ;;  %s2430_s17 = int_to_ptr.vmem [resolvable:$true] %s415_s17 }
  0x28   : > { %p2002_p11 = pneg %p2423_p9  ;;  %s428_s26 = sshll.u32 %s2272_s25, 4  ;;  %s2438_s26 = int_to_ptr.vmem [resolvable:$true] %s428_s26 }
  0x29   : > { %s3035_s0 = sld [smem:[#allocation23_spill]] }
  0x2a   : > { %p2434_p12 = pnand %p3002_p10, %p2002_p11 }
  0x2c   : > { %p2448_p0 = pneg %p2434_p12 }
  0x2f   : > { %s2126_s24 = scalar_lea.hbm %s3035_s0, 64 }
  0x30   : > { %p2127_p13 = scmp.ne.s32.totalorder %s3035_s0, %s2126_s24  ;;  %p2133_p3 = scmp.lt.u32.totalorder %s2126_s24, %s3035_s0 }
  0x32   : > { %p2129_p1 = pnand %p2448_p0, %p2127_p13 }
  0x34   : > { %p2130_p2 = pneg %p2129_p1 }
  0x36   : > { %p2135_p4 = pnand %p2133_p3, %p2130_p2 }
  0x38   : > { %2138 = shalt.err (!%p2135_p4)
}
  0x39   : > { %s2273_s20 = smov [#allocation2]   ;;  %s3037_s6 = sld [smem:[#allocation29_spill]] }
  0x3a   : > { %2005 = dma.hbm_to_smem (!%p2434_p12), %s3035_s0, 64, %s2273_s20, [#allocation5]  }
  0x3f   : > { %s2139_s28 = scalar_lea.hbm %s3037_s6, 256 }
  0x40   : > { %p2140_p7 = scmp.ne.s32.totalorder %s3037_s6, %s2139_s28  ;;  %p2146_p13 = scmp.lt.u32.totalorder %s2139_s28, %s3037_s6 }
  0x42   : > { %p2142_p8 = pnand %p2140_p7, %p2448_p0 }
  0x44   : > { %p2143_p11 = pneg %p2142_p8 }
  0x46   : > { %p2148_p1 = pnand %p2146_p13, %p2143_p11 }
  0x48   : > { %2151 = shalt.err (!%p2148_p1)
}
  0x49   : > { %s2152_s25 = scalar_lea.vmem %s2430_s17, 256  ;;  %p2160_p10 = scmp.lt.s32.totalorder %s2430_s17, %s2430_s17 }
  0x4a   : > { %p2153_p2 = scmp.ne.s32.totalorder %s2430_s17, %s2152_s25  ;;  %p2161_p6 = scmp.lt.s32.totalorder %s2152_s25, %s2152_s25 }
  0x4c   : > { %p2155_p3 = pnand %p2153_p2, %p2448_p0  ;;  %p2162_p7 = por %p2161_p6, %p2160_p10 }
  0x4e   : > { %p2156_p4 = pneg %p2155_p3 }
  0x50   : > { %p2163_p8 = pnand %p2162_p7, %p2156_p4 }
  0x52   : > { %2166 = shalt.err (!%p2163_p8)
}
  0x53   : > { %s2274_s14 = smov 64   ;;  %s2275_s15 = smov 4  }
  0x54   : > { %2008 = dma.hbm_to_vmem [thread:$0]  (!%p2434_p12), %s3037_s6, 256, %s2430_s17, [#allocation3], %s2274_s14, %s2274_s14, %s2275_s15  }
  0x55   : > { %s3038_s7 = sld [smem:[#allocation30_spill]] }
  0x5b   : > { %s2167_s27 = scalar_lea.hbm %s3038_s7, 256 }
  0x5c   : > { %p2168_p6 = scmp.ne.s32.totalorder %s3038_s7, %s2167_s27  ;;  %p2174_p13 = scmp.lt.u32.totalorder %s2167_s27, %s3038_s7 }
  0x5e   : > { %p2170_p10 = pnand %p2168_p6, %p2448_p0 }
  0x60   : > { %p2171_p11 = pneg %p2170_p10 }
  0x62   : > { %p2176_p1 = pnand %p2174_p13, %p2171_p11 }
  0x64   : > { %2179 = shalt.err (!%p2176_p1)
}
  0x65   : > { %s2180_s17 = scalar_lea.vmem %s2438_s26, 256  ;;  %p2188_p7 = scmp.lt.s32.totalorder %s2438_s26, %s2438_s26 }
  0x66   : > { %p2181_p2 = scmp.ne.s32.totalorder %s2438_s26, %s2180_s17  ;;  %p2189_p8 = scmp.lt.s32.totalorder %s2180_s17, %s2180_s17 }
  0x68   : > { %p2183_p3 = pnand %p2181_p2, %p2448_p0  ;;  %p2190_p6 = por %p2189_p8, %p2188_p7 }
  0x6a   : > { %p2184_p4 = pneg %p2183_p3 }
  0x6c   : > { %p2191_p10 = pnand %p2190_p6, %p2184_p4 }
  0x6e   : > { %2194 = shalt.err (!%p2191_p10)
}
  0x6f   : > { %2011 = dma.hbm_to_vmem [thread:$0]  (!%p2434_p12), %s3038_s7, 256, %s2438_s26, [#allocation8], %s2274_s14, %s2274_s14, %s2275_s15  }
  0x70   : > { %472 = sbr.rel (%p2423_p9) target bundleno = 2826 (0xb0a), region = 80  ;;  %p3039_p11 = scmp.eq.s32.totalorder (!%p2423_p9), %s2396_s22, 0 }
  0x77   : > { %2240 = dma.done.wait (%p3039_p11), [#allocation5], 64   ;;  %p3040_p0 = pmov %p3039_p11 }
  0x79   : > { %2242 = vsyncadd (%p3040_p0), [#allocation5], 4294967232  ;;  %p3041_p13 = pmov %p3040_p0 }
  0x7a   : > { %p3042_p1 = pmov %p3040_p0 }
  0x7b   : > { %2244 = dma.done.wait (%p3041_p13), [#allocation3], 256  }
  0x7c   : > { %2246 = vsyncadd (%p3042_p1), [#allocation3], 4294967040  ;;  %p3043_p2 = pmov %p3040_p0 }
  0x7d   : > { %p3044_p12 = pmov %p3040_p0 }
  0x7e   : > { %2248 = dma.done.wait (%p3043_p2), [#allocation8], 256  }
  0x7f   : > { %2250 = vsyncadd (%p3044_p12), [#allocation8], 4294967040 }
  0x80   : > { %486 = sfence }
  0x81   : > { %p528_p9 = scmp.lt.s32.totalorder %s2396_s22, 1  ;;  %vm536_vm0 = vcmask 261120   ;;  %s3045_s1 = sld [smem:[#allocation24_spill]]  ;;  %v2276_v8 = vmov 0.0   ;;  %vm2277_vm1 = vmmov 0   ;;  %v566_v13 = vlaneseq }
  0x82   : > { %s3046_s4 = sld [smem:[#allocation27_spill]]  ;;  %1908 = vmatprep.subr.bf16.mxu0 %v2276_v8  ;;  %1912 = vmatprep.mubr.msk.bf16.mxu0 %vm2277_vm1, %v2276_v8  ;;  %s3047_s2 = sld [smem:[#allocation25_spill]]  ;;  %vm648_vm4 = vcmask 64512   ;;  %vm981_vm6 = vcmask 1043456   ;;  %vm1383_vm7 = vcmask 130048   ;;  %vm1385_vm8 = vcmask 195584  }
  0x83   : > { %s529_s30 = scalar_select %p528_p9, %s2396_s22, 1  ;;  %1928 = vmatprep.subr.bf16.mxu1 %v2276_v8  ;;  %1930 = vmatprep.mubr.msk.bf16.mxu1 %vm2277_vm1, %v2276_v8  ;;  %v2553_v18 = vshrl.u32 %v566_v13, 7  ;;  %v2555_v20 = vand.u32 127, %v566_v13  ;;  %vm1662_vm13 = vcmask 785408  }
  0x84   : > { %s3048_s3 = sld [smem:[#allocation26_spill]]  ;;  %s3049_s5 = sld [smem:[#allocation28_spill]] }
  0x85   : > { %s1826_s23 = sshll.u32 %s529_s30, 3  ;;  %vm568_vm2 = vcmp.eq.s32.totalorder %v2553_v18, 0  ;;  %vm572_vm3 = vcmp.lt.s32.totalorder %v2555_v20, 16  ;;  %s2278_s28 = smov 80   ;;  %vm644_vm5 = vcmp.le.s32.totalorder %v2555_v20, %v2553_v18 }
  0x86   : > { %s2279_s30 = smov 96   ;;  %s2281_s26 = smov 72  }
  0x87   : > { %s531_s14 = scalar_lea.vmem %s3045_s1, %s1826_s23  ;;  %s2280_s23 = smov 88  }
  0x88   : > { %v2527_v0 = vld [vmem:[%s531_s14] sm:$0xff]  ;;  %v2079_v9 = vld [vmem:[%s3046_s4 + $0x8] sm:$0xff]   ;;  %s2282_s16 = smov 120   ;;  %s2283_s14 = smov 112  }
  0x89   : > { %v537_v1 = vsel %vm536_vm0, %v2527_v0, 0.0  ;;  %v2078_v7 = vld [vmem:[%s3046_s4] sm:$0xff]   ;;  %s2284_s15 = smov 104   ;;  %s2285_s20 = smov 64  }
  0x8a   : > { %538 = vadd.xlane.f32.xlu0 %v537_v1  ;;  %1909 = vmatpush3.bf16.msra.mxu0 %v2078_v7  ;;  %v1827_v15 = vld [vmem:[%s3047_s2] ss:$0 sm:$0xff]  ;;  %s2286_s18 = smov 48   ;;  %s2287_s27 = smov 40  }
  0x8b   : > { %1910 = vmatprep.subr.bf16.mxu0 %v2276_v8  ;;  %v1828_v17 = vld [vmem:[%s3048_s3] ss:$0 sm:$0xff]  ;;  %s2288_s29 = smov 56   ;;  %s909_s21 = sld [smem:[#allocation2]] }
  0x8c   : > { %v1829_v26 = vld [vmem:[%s3049_s5] ss:$0 sm:$0xff]  ;;  %s2629_s25 = sld [smem:[#allocation2 + $0x1]]  ;;  %s1838_s19 = sld [smem:[#allocation2 + $0x2]] }
  0x8d   : > { %s2672_s3 = sld [smem:[#allocation2 + $0x180]]  ;;  %s2712_s9 = sld [smem:[#allocation2 + $0x181]] }
  0x8e   : > { %1911 = vmatpush3.bf16.msra.mxu0 %v2079_v9 }
  0x8f   : > { %1916 = vmatprep.subr.bf16.mxu0 %v2276_v8 }
  0x91   : > { %s912_s24 = sshrl.u32 %s909_s21, 16  ;;  %p911_p3 = scmp.ne.f32.partialorder %s909_s21, %s909_s21 }
  0x92   : > { %s913_s17 = sand.u32 1, %s912_s24  ;;  %p927_p4 = scmp.ne.f32.partialorder %s2629_s25, %s2629_s25 }
  0x93   : > { %p944_p7 = scmp.ne.f32.partialorder %s1838_s19, %s1838_s19  ;;  %p1273_p9 = scmp.ne.f32.partialorder %s2712_s9, %s2712_s9 }
 0x117   : > { %v539_v2 = vpop.xlane.xlu0 %538 }
 0x118   : > { %v541_v3 = vmul.f32 0.03125, %v539_v2 }
 0x11a   : > { %v542_v4 = vsub.f32 %v2527_v0, %v541_v3 }
 0x11c   : > { %v543_v5 = vmul.f32 %v542_v4, %v542_v4 }
 0x11e   : > { %v544_v6 = vsel %vm536_vm0, %v543_v5, 0.0 }
 0x11f   : > { %545 = vadd.xlane.f32.xlu0 %v544_v6 }
 0x1ac   : > { %v546_v10 = vpop.xlane.xlu0 %545 }
 0x1ad   : > { %v547_v11 = vmul.f32 0.03125, %v546_v10 }
 0x1af   : > { %v548_v12 = vadd.f32 1e-05, %v547_v11 }
 0x1b1   : > { %2094 = vrsqrt.f32 %v548_v12 }
 0x1bb   : > { %v2095_v14 = vpop.eup %2094 }
 0x1bc   : > { %v550_v16 = vmul.f32 %v2095_v14, %v542_v4 }
 0x1be   : > { %v557_v19 = vmul.f32 %v1827_v15, %v550_v16 }
 0x1c0   : > { %v564_v21 = vadd.f32 %v1828_v17, %v557_v19 }
 0x1c2   : > { %v565_v22 = vrot.slane %v564_v21, 7 }
 0x1c4   : > { %v569_v23 = vsel %vm568_vm2, 0.0, %v565_v22 }
 0x1c5   : > { %v573_v24 = vsel %vm572_vm3, %v569_v23, %v564_v21 }
 0x1c6   : > { %v574_v25 = vpack.c.bf16 %v573_v24, %v573_v24 }
 0x1c8   : > { %1913 = vmatmul.mubr.msk.bf16.vlgmr.msra.gmra.mrb[0].mxu0 %vm536_vm0, %v574_v25 }
 0x1c9   : > { %1918 = vmatprep.mubr.msk.bf16.mxu0 %vm2277_vm1, %v2276_v8 }
 0x29b   : > { %v635_v27 = vpop.f32.mrb[0].mxu0 }
 0x29c   : > { %v636_v28 = vadd.f32 %v1829_v26, %v635_v27  ;;  %v1914_v29 = vpop.f32.mrb[1].mxu0 }
 0x29d   : > { %v638_v30 = vpop.f32.mrb[2].mxu0 }
 0x29e   : > { %v2565_v31 = vpack.c.bf16 %v636_v28, %v636_v28  ;;  %v1915_v32 = vpop.f32.mrb[3].mxu0  ;;  %v641_v33 = vmul.f32 0.35355338, %v636_v28 }
 0x2a0   : > { %779 = vrot.lane.b32.xlu0 %v2565_v31, %s2278_s28  ;;  %646 = vrot.lane.b32.xlu1 %v2565_v31, %s2279_s30  ;;  %v642_v34 = vpack.c.bf16 %v641_v33, %v641_v33  ;;  %s914_s28 = sadd.s32 32767, %s913_s17  ;;  %s2631_s30 = sld [smem:[#allocation2 + $0x80]] }
 0x2a4   : > { %713 = vrot.lane.b32.xlu1 %v2565_v31, %s2280_s23  ;;  %s915_s23 = sadd.s32 %s914_s28, %s909_s21  ;;  %s2643_s21 = sld [smem:[#allocation2 + $0x81]] }
 0x2a6   : > { %p1027_p6 = scmp.ne.f32.partialorder %s2631_s30, %s2631_s30 }
 0x2a8   : > { %845 = vrot.lane.b32.xlu1 %v2565_v31, %s2281_s26  ;;  %s928_s26 = sshrl.u32 %s2629_s25, 16 }
 0x2aa   : > { %p1043_p10 = scmp.ne.f32.partialorder %s2643_s21, %s2643_s21 }
 0x2ac   : > { %711 = vrot.lane.b32.xlu1 %v642_v34, %s2282_s16  ;;  %s2634_s16 = sld [smem:[#allocation2 + $0x3]] }
 0x2b0   : > { %777 = vrot.lane.b32.xlu1 %v642_v34, %s2283_s14  ;;  %s945_s14 = sshrl.u32 %s1838_s19, 16 }
 0x2b2   : > { %s962_s17 = sshrl.u32 %s2634_s16, 16  ;;  %p961_p8 = scmp.ne.f32.partialorder %s2634_s16, %s2634_s16 }
 0x2b3   : > { %s963_s2 = sand.u32 1, %s962_s17 }
 0x2b4   : > { %843 = vrot.lane.b32.xlu1 %v642_v34, %s2284_s15  ;;  %s916_s15 = sand.u32 4294901760, %s915_s23 }
 0x2b5   : > { %s3070_s15 = smov (%p911_p3, %s916_s15), 2143289344  ;;  %p1257_p3 = scmp.ne.f32.partialorder %s2672_s3, %s2672_s3 }
 0x312   : > { %v780_v35 = vpop.permute.xlu0 %779  ;;  %v647_v36 = vpop.permute.xlu1 %646 }
 0x313   : > { %v653_v37 = vsel %vm648_vm4, %v647_v36, 0  ;;  %v785_v38 = vsel %vm648_vm4, %v780_v35, 0 }
 0x314   : > { %1917 = vmatpush3.bf16.xpose.msra.mxu0 %v653_v37  ;;  %1929 = vmatpush3.bf16.xpose.msra.mxu1 %v785_v38 }
 0x315   : > { %1922 = vmatprep.subr.bf16.mxu0 %v2276_v8  ;;  %1940 = vmatprep.subr.bf16.mxu1 %v2276_v8 }
 0x316   : > { %v714_v39 = vpop.permute.xlu1 %713 }
 0x317   : > { %v719_v41 = vsel %vm648_vm4, %v714_v39, 0 }
 0x31a   : > { %v846_v40 = vpop.permute.xlu1 %845 }
 0x31b   : > { %1919 = vmatmul.mubr.msk.bf16.vlgmr.msra.gmra.mrb[4].mxu0 %vm648_vm4, %v642_v34  ;;  %v851_v44 = vsel %vm648_vm4, %v846_v40, 0 }
 0x31c   : > { %1923 = vmatpush3.bf16.xpose.msra.mxu0 %v719_v41  ;;  %1924 = vmatprep.mubr.msk.bf16.mxu0 %vm2277_vm1, %v2276_v8 }
 0x31d   : > { %1934 = vmatprep.subr.bf16.mxu0 %v2276_v8 }
 0x31e   : > { %v712_v42 = vpop.permute.xlu1 %711 }
 0x322   : > { %v778_v43 = vpop.permute.xlu1 %777 }
 0x323   : > { %1925 = vmatmul.mubr.msk.bf16.vlgmr.msra.gmra.mrb[8].mxu0 %vm648_vm4, %v712_v42  ;;  %1931 = vmatmul.mubr.msk.bf16.vlgmr.msra.gmra.mrb[0].mxu1 %vm648_vm4, %v778_v43  ;;  %v708_v42 = vld [vmem:[#allocation6] sm:$0xf] }
 0x324   : > { %1935 = vmatpush3.bf16.xpose.msra.mxu0 %v851_v44  ;;  %1936 = vmatprep.mubr.msk.bf16.mxu0 %vm2277_vm1, %v2276_v8 }
 0x325   : > { %1946 = vmatprep.subr.bf16.mxu0 %v2276_v8  ;;  %1942 = vmatprep.mubr.msk.bf16.mxu1 %vm2277_vm1, %v2276_v8 }
 0x326   : > { %v844_v45 = vpop.permute.xlu1 %843 }
 0x32b   : > { %1937 = vmatmul.mubr.msk.bf16.vlgmr.msra.gmra.mrb[12].mxu0 %vm648_vm4, %v844_v45  ;;  %v775_v45 = vld [vmem:[#allocation6 + $0x4] sm:$0xf] }
 0x32c   : > { %1948 = vmatprep.mubr.msk.bf16.mxu0 %vm2277_vm1, %v2276_v8 }
 0x3ee   : > { %v689_v46 = vpop.f32.mrb[4].mxu0 }
 0x3ef   : > { %v695_v47 = vsel %vm644_vm5, %v689_v46, -inf  ;;  %v1920_v48 = vpop.f32.mrb[5].mxu0 }
 0x3f0   : > { %v692_v49 = vpop.f32.mrb[6].mxu0  ;;  %v696_v50 = vsel %vm648_vm4, %v695_v47, -inf }
 0x3f1   : > { %697 = vmax.xlane.f32.xlu1 %v696_v50  ;;  %v1921_v51 = vpop.f32.mrb[7].mxu0 }
 0x3f2   : > { %v841_v51 = vld [vmem:[#allocation6 + $0x8] sm:$0xf] }
 0x3f6   : > { %v755_v52 = vpop.f32.mrb[8].mxu0  ;;  %v821_v53 = vpop.f32.mrb[0].mxu1 }
 0x3f7   : > { %v761_v54 = vsel %vm644_vm5, %v755_v52, -inf  ;;  %v827_v55 = vsel %vm644_vm5, %v821_v53, -inf  ;;  %v1926_v56 = vpop.f32.mrb[9].mxu0  ;;  %v1932_v57 = vpop.f32.mrb[1].mxu1 }
 0x3f8   : > { %v758_v58 = vpop.f32.mrb[10].mxu0  ;;  %v824_v59 = vpop.f32.mrb[2].mxu1  ;;  %v828_v60 = vsel %vm648_vm4, %v827_v55, -inf  ;;  %v762_v61 = vsel %vm648_vm4, %v761_v54, -inf }
 0x3f9   : > { %v1933_v62 = vpop.f32.mrb[3].mxu1  ;;  %829 = vmax.xlane.f32.xlu1 %v828_v60  ;;  %763 = vmax.xlane.f32.xlu0 %v762_v61  ;;  %v1927_v63 = vpop.f32.mrb[11].mxu0 }
 0x3fa   : > { %v907_v63 = vld [vmem:[#allocation6 + $0xc] sm:$0xf] }
 0x3fe   : > { %v887_v1 = vpop.f32.mrb[12].mxu0 }
 0x3ff   : > { %v893_v2 = vsel %vm644_vm5, %v887_v1, -inf  ;;  %v1938_v3 = vpop.f32.mrb[13].mxu0 }
 0x400   : > { %v890_v4 = vpop.f32.mrb[14].mxu0  ;;  %v894_v5 = vsel %vm648_vm4, %v893_v2, -inf }
 0x401   : > { %895 = vmax.xlane.f32.xlu0 %v894_v5  ;;  %v1939_v6 = vpop.f32.mrb[15].mxu0 }
 0x47e   : > { %v698_v7 = vpop.xlane.xlu1 %697 }
 0x47f   : > { %v699_v9 = vsub.f32 %v695_v47, %v698_v7 }
 0x481   : > { %v700_v10 = vmul.f32 1.442695, %v699_v9 }
 0x483   : > { %2096 = vpow2.f32 %v700_v10 }
 0x486   : > { %v830_v11 = vpop.xlane.xlu1 %829  ;;  %v764_v12 = vpop.xlane.xlu0 %763 }
 0x487   : > { %v831_v13 = vsub.f32 %v827_v55, %v830_v11  ;;  %v765_v14 = vsub.f32 %v761_v54, %v764_v12 }
 0x489   : > { %v832_v15 = vmul.f32 1.442695, %v831_v13  ;;  %v766_v16 = vmul.f32 1.442695, %v765_v14 }
 0x48b   : > { %2098 = vpow2.f32 %v832_v15 }
 0x48c   : > { %2100 = vpow2.f32 %v766_v16 }
 0x48d   : > { %v2609_v17 = vpop.eup %2096 }
 0x48e   : > { %v896_v19 = vpop.xlane.xlu0 %895  ;;  %v702_v20 = vsel %vm648_vm4, %v2609_v17, 0.0 }
 0x48f   : > { %v897_v21 = vsub.f32 %v893_v2, %v896_v19  ;;  %703 = vadd.xlane.f32.xlu1 %v702_v20 }
 0x491   : > { %v898_v22 = vmul.f32 1.442695, %v897_v21 }
 0x493   : > { %2102 = vpow2.f32 %v898_v22 }
 0x495   : > { %v2613_v23 = vpop.eup %2098 }
 0x496   : > { %v2615_v24 = vpop.eup %2100  ;;  %v834_v25 = vsel %vm648_vm4, %v2613_v23, 0.0 }
 0x497   : > { %835 = vadd.xlane.f32.xlu1 %v834_v25  ;;  %v768_v26 = vsel %vm648_vm4, %v2615_v24, 0.0 }
 0x498   : > { %769 = vadd.xlane.f32.xlu0 %v768_v26 }
 0x49d   : > { %v2621_v27 = vpop.eup %2102 }
 0x49e   : > { %v900_v28 = vsel %vm648_vm4, %v2621_v27, 0.0 }
 0x49f   : > { %901 = vadd.xlane.f32.xlu0 %v900_v28 }
 0x4a8   : > { %976 = vrot.lane.b32.xlu1 %v2565_v31, %s2285_s20  ;;  %s929_s20 = sand.u32 1, %s928_s26 }
 0x4ac   : > { %1207 = vrot.lane.b32.xlu1 %v2565_v31, %s2286_s18  ;;  %s946_s18 = sand.u32 1, %s945_s14  ;;  %s964_s14 = sadd.s32 32767, %s963_s2 }
 0x4ad   : > { %s947_s24 = sadd.s32 32767, %s946_s18  ;;  %s965_s18 = sadd.s32 %s2634_s16, %s964_s14 }
 0x4ae   : > { %s948_s1 = sadd.s32 %s1838_s19, %s947_s24  ;;  %s2667_s14 = sld [smem:[#allocation2 + $0x100]] }
 0x4af   : > { %s949_s26 = sand.u32 4294901760, %s948_s1  ;;  %s966_s1 = sand.u32 4294901760, %s965_s18 }
 0x4b0   : > { %1322 = vrot.lane.b32.xlu1 %v2565_v31, %s2287_s27  ;;  %s930_s27 = sadd.s32 32767, %s929_s20  ;;  %s3074_s26 = smov (%p944_p7, %s949_s26), 2143289344 }
 0x4b1   : > { %s931_s0 = sadd.s32 %s2629_s25, %s930_s27  ;;  %s2653_s25 = sld [smem:[#allocation2 + $0x82]] }
 0x4b2   : > { %s932_s23 = sand.u32 4294901760, %s931_s0  ;;  %s2656_s0 = sld [smem:[#allocation2 + $0x83]] }
 0x4b3   : > { %s3072_s23 = smov (%p927_p4, %s932_s23), 2143289344  ;;  %s3076_s1 = smov (%p961_p8, %s966_s1), 2143289344 }
 0x4b4   : > { %p1142_p13 = scmp.ne.f32.partialorder %s2667_s14, %s2667_s14 }
 0x4b5   : > { %1092 = vrot.lane.b32.xlu0 %v2565_v31, %s2288_s29  ;;  %s1028_s29 = sshrl.u32 %s2631_s30, 16 }
 0x4b6   : > { %s1029_s28 = sand.u32 1, %s1028_s29  ;;  %s1044_s29 = sshrl.u32 %s2643_s21, 16 }
 0x4b7   : > { %s1030_s20 = sadd.s32 32767, %s1029_s28  ;;  %s1045_s19 = sand.u32 1, %s1044_s29 }
 0x4b8   : > { %s1031_s27 = sadd.s32 %s2631_s30, %s1030_s20  ;;  %s1046_s24 = sadd.s32 32767, %s1045_s19 }
 0x4b9   : > { %s1032_s2 = sand.u32 4294901760, %s1031_s27  ;;  %s1061_s16 = sshrl.u32 %s2653_s25, 16 }
 0x4ba   : > { %s3078_s2 = smov (%p1027_p6, %s1032_s2), 2143289344  ;;  %s1078_s17 = sshrl.u32 %s2656_s0, 16 }
 0x4bb   : > { %s1047_s28 = sadd.s32 %s2643_s21, %s1046_s24  ;;  %s919_s20 = sshrl.u32 %s3070_s15, 16 }
 0x4bc   : > { %s1062_s18 = sand.u32 1, %s1061_s16  ;;  %s1079_s30 = sand.u32 1, %s1078_s17 }
 0x4bd   : > { %s1048_s27 = sand.u32 4294901760, %s1047_s28  ;;  %s1063_s29 = sadd.s32 32767, %s1062_s18 }
 0x4be   : > { %s920_s19 = sshll.u32 %s919_s20, 16  ;;  %s1080_s4 = sadd.s32 32767, %s1079_s30 }
 0x4bf   : > { %s3080_s27 = smov (%p1043_p10, %s1048_s27), 2143289344  ;;  %p1060_p11 = scmp.ne.f32.partialorder %s2653_s25, %s2653_s25 }
 0x4c0   : > { %s1064_s24 = sadd.s32 %s2653_s25, %s1063_s29  ;;  %s1081_s5 = sadd.s32 %s2656_s0, %s1080_s4 }
 0x4c1   : > { %s2680_s15 = sld [smem:[#allocation2 + $0x101]]  ;;  %s1143_s16 = sshrl.u32 %s2667_s14, 16 }
 0x4c2   : > { %s2683_s21 = sld [smem:[#allocation2 + $0x102]]  ;;  %s1065_s17 = sand.u32 4294901760, %s1064_s24 }
 0x4c3   : > { %p1077_p0 = scmp.ne.f32.partialorder %s2656_s0, %s2656_s0  ;;  %s935_s28 = sshrl.u32 %s3072_s23, 16 }
 0x4c4   : > { %s1082_s18 = sand.u32 4294901760, %s1081_s5  ;;  %s952_s30 = sshrl.u32 %s3074_s26, 16 }
 0x4c5   : > { %s1144_s6 = sand.u32 1, %s1143_s16  ;;  %s3082_s17 = smov (%p1060_p11, %s1065_s17), 2143289344 }
 0x4c6   : > { %s3084_s18 = smov (%p1077_p0, %s1082_s18), 2143289344  ;;  %s2693_s4 = sor.u32 %s920_s19, %s919_s20 }
 0x4c7   : > { %s1145_s25 = sadd.s32 32767, %s1144_s6  ;;  %s936_s29 = sshll.u32 %s935_s28, 16  ;;  %v922_v53 = vstv %s2693_s4 }
 0x4c8   : > { %s1159_s7 = sshrl.u32 %s2680_s15, 16  ;;  %s953_s22 = sshll.u32 %s952_s30, 16 }
 0x4c9   : > { %s1176_s24 = sshrl.u32 %s2683_s21, 16  ;;  %s969_s0 = sshrl.u32 %s3076_s1, 16 }
 0x4ca   : > { %s1146_s23 = sadd.s32 %s2667_s14, %s1145_s25  ;;  %s1160_s5 = sand.u32 1, %s1159_s7 }
 0x4cb   : > { %s2699_s26 = sld [smem:[#allocation2 + $0x103]]  ;;  %s1177_s20 = sand.u32 1, %s1176_s24 }
 0x4cc   : > { %s2703_s19 = sor.u32 %s936_s29, %s935_s28  ;;  %s1147_s6 = sand.u32 4294901760, %s1146_s23 }
 0x4cd   : > { %s2705_s16 = sor.u32 %s953_s22, %s952_s30  ;;  %s1161_s12 = sadd.s32 32767, %s1160_s5  ;;  %v938_v49 = vstv %s2703_s19 }
 0x4ce   : > { %s970_s13 = sshll.u32 %s969_s0, 16  ;;  %s1178_s10 = sadd.s32 32767, %s1177_s20  ;;  %v955_v1 = vstv %s2705_s16 }
 0x4cf   : > { %s3086_s6 = smov (%p1142_p13, %s1147_s6), 2143289344  ;;  %s1035_s1 = sshrl.u32 %s3078_s2, 16 }
 0x4d0   : > { %s1162_s7 = sadd.s32 %s2680_s15, %s1161_s12  ;;  %s1179_s25 = sadd.s32 %s2683_s21, %s1178_s10 }
 0x4d1   : > { %p1158_p1 = scmp.ne.f32.partialorder %s2680_s15, %s2680_s15  ;;  %s1193_s14 = sshrl.u32 %s2699_s26, 16 }
 0x4d2   : > { %s1163_s28 = sand.u32 4294901760, %s1162_s7  ;;  %p1175_p2 = scmp.ne.f32.partialorder %s2683_s21, %s2683_s21 }
 0x4d3   : > { %s2719_s22 = sor.u32 %s970_s13, %s969_s0  ;;  %s1180_s30 = sand.u32 4294901760, %s1179_s25 }
 0x4d4   : > { %s1051_s29 = sshrl.u32 %s3080_s27, 16  ;;  %s1194_s2 = sand.u32 1, %s1193_s14  ;;  %v972_v9 = vstv %s2719_s22 }
 0x4d5   : > { %s3088_s28 = smov (%p1158_p1, %s1163_s28), 2143289344  ;;  %s3090_s30 = smov (%p1175_p2, %s1180_s30), 2143289344 }
 0x4d6   : > { %s1036_s10 = sshll.u32 %s1035_s1, 16  ;;  %s1195_s12 = sadd.s32 32767, %s1194_s2 }
 0x4d7   : > { %s1052_s24 = sshll.u32 %s1051_s29, 16  ;;  %s1274_s15 = sshrl.u32 %s2712_s9, 16 }
 0x4d8   : > { %s1068_s23 = sshrl.u32 %s3082_s17, 16  ;;  %s1258_s5 = sshrl.u32 %s2672_s3, 16 }
 0x4d9   : > { %s1196_s13 = sadd.s32 %s2699_s26, %s1195_s12  ;;  %s2730_s21 = sld [smem:[#allocation2 + $0x182]] }
 0x4da   : > { %s1275_s27 = sand.u32 1, %s1274_s15  ;;  %s2732_s0 = sld [smem:[#allocation2 + $0x183]] }
 0x4db   : > { %p1192_p12 = scmp.ne.f32.partialorder %s2699_s26, %s2699_s26  ;;  %s1259_s20 = sand.u32 1, %s1258_s5 }
 0x4dc   : > { %s2736_s7 = sor.u32 %s1036_s10, %s1035_s1  ;;  %s1197_s25 = sand.u32 4294901760, %s1196_s13 }
 0x4dd   : > { %s2738_s14 = sor.u32 %s1052_s24, %s1051_s29  ;;  %s1276_s2 = sadd.s32 32767, %s1275_s27  ;;  %v1038_v54 = vstv %s2736_s7 }
 0x4de   : > { %s1069_s12 = sshll.u32 %s1068_s23, 16  ;;  %s1260_s11 = sadd.s32 32767, %s1259_s20  ;;  %v1054_v50 = vstv %s2738_s14 }
 0x4df   : > { %s3092_s25 = smov (%p1192_p12, %s1197_s25), 2143289344  ;;  %s1085_s15 = sshrl.u32 %s3084_s18, 16 }
 0x4e0   : > { %s1277_s8 = sadd.s32 %s2712_s9, %s1276_s2  ;;  %s1261_s26 = sadd.s32 %s2672_s3, %s1260_s11 }
 0x4e1   : > { %s1291_s5 = sshrl.u32 %s2730_s21, 16  ;;  %s1308_s1 = sshrl.u32 %s2732_s0, 16 }
 0x4e2   : > { %s1086_s29 = sshll.u32 %s1085_s15, 16  ;;  %s1278_s10 = sand.u32 4294901760, %s1277_s8 }
 0x4e3   : > { %s1292_s24 = sand.u32 1, %s1291_s5  ;;  %s1262_s18 = sand.u32 4294901760, %s1261_s26 }
 0x4e4   : > { %s1309_s11 = sand.u32 1, %s1308_s1  ;;  %s3094_s10 = smov (%p1273_p9, %s1278_s10), 2143289344 }
 0x4e5   : > { %s2758_s8 = sor.u32 %s1069_s12, %s1068_s23  ;;  %s1293_s9 = sadd.s32 32767, %s1292_s24 }
 0x4e6   : > { %s2761_s13 = sor.u32 %s1086_s29, %s1085_s15  ;;  %s1310_s27 = sadd.s32 32767, %s1309_s11  ;;  %v1071_v2 = vstv %s2758_s8 }
 0x4e7   : > { %s3096_s18 = smov (%p1257_p3, %s1262_s18), 2143289344  ;;  %s1150_s20 = sshrl.u32 %s3086_s6, 16  ;;  %v1088_v10 = vstv %s2761_s13 }
 0x4e8   : > { %s1294_s17 = sadd.s32 %s2730_s21, %s1293_s9  ;;  %s1166_s2 = sshrl.u32 %s3088_s28, 16 }
 0x4e9   : > { %s1311_s23 = sadd.s32 %s2732_s0, %s1310_s27  ;;  %s1281_s12 = sshrl.u32 %s3094_s10, 16 }
 0x4ea   : > { %p1290_p4 = scmp.ne.f32.partialorder %s2730_s21, %s2730_s21  ;;  %s1295_s3 = sand.u32 4294901760, %s1294_s17 }
 0x4eb   : > { %p1307_p7 = scmp.ne.f32.partialorder %s2732_s0, %s2732_s0  ;;  %s1167_s15 = sshll.u32 %s1166_s2, 16 }
 0x4ec   : > { %s1312_s26 = sand.u32 4294901760, %s1311_s23  ;;  %s1265_s5 = sshrl.u32 %s3096_s18, 16 }
 0x4ed   : > { %s1282_s1 = sshll.u32 %s1281_s12, 16  ;;  %s3098_s3 = smov (%p1290_p4, %s1295_s3), 2143289344 }
 0x4ee   : > { %s3100_s26 = smov (%p1307_p7, %s1312_s26), 2143289344  ;;  %s1151_s29 = sshll.u32 %s1150_s20, 16 }
 0x4ef   : > { %s2805_s21 = sor.u32 %s1167_s15, %s1166_s2  ;;  %s1183_s24 = sshrl.u32 %s3090_s30, 16 }
 0x4f0   : > { %s1200_s11 = sshrl.u32 %s3092_s25, 16  ;;  %s1266_s19 = sshll.u32 %s1265_s5, 16  ;;  %v1169_v3 = vstv %s2805_s21 }
 0x4f1   : > { %s2813_s4 = sor.u32 %s1282_s1, %s1281_s12  ;;  %s1298_s28 = sshrl.u32 %s3098_s3, 16 }
 0x4f2   : > { %s1315_s0 = sshrl.u32 %s3100_s26, 16  ;;  %s2822_s7 = sor.u32 %s1151_s29, %s1150_s20  ;;  %v1284_v7 = vstv %s2813_s4 }
 0x4f3   : > { %s1184_s14 = sshll.u32 %s1183_s24, 16  ;;  %s1201_s10 = sshll.u32 %s1200_s11, 16  ;;  %v1153_v14 = vstv %s2822_s7 }
 0x4f4   : > { %s1267_s9 = sor.u32 %s1266_s19, %s1265_s5  ;;  %s1299_s6 = sshll.u32 %s1298_s28, 16 }
 0x4f5   : > { %s1316_s16 = sshll.u32 %s1315_s0, 16  ;;  %s1185_s8 = sor.u32 %s1184_s14, %s1183_s24  ;;  %v1268_v16 = vstv %s1267_s9 }
 0x4f6   : > { %s1202_s27 = sor.u32 %s1201_s10, %s1200_s11  ;;  %s1300_s22 = sor.u32 %s1299_s6, %s1298_s28 }
 0x4f7   : > { %s1317_s18 = sor.u32 %s1316_s16, %s1315_s0  ;;  %s2289_s30 = smov 8  }
 0x4f8   : > { %s2290_s25 = smov 16   ;;  %s2291_s13 = smov 24  }
 0x4f9   : > { %s3050_s2 = sld [smem:[#allocation31_spill]]  ;;  %s3051_s3 = sld [smem:[#allocation34_spill]] }
 0x4fa   : > { %s3052_s19 = sld [smem:[#allocation32_spill]]  ;;  %s3053_s0 = sld [smem:[#allocation33_spill]] }
 0x4fb   : > { %s3054_s10 = sld [smem:[#allocation36_spill]]  ;;  %s3055_s20 = sld [smem:[#allocation35_spill]] }
 0x4fc   : > { %s3056_s23 = sld [smem:[#allocation15_spill]]  ;;  %s3057_s12 = sld [smem:[#allocation18_spill]] }
 0x4fd   : > { %s2293_s15 = smov 32   ;;  %s3058_s21 = sld [smem:[#allocation37_spill]] }
 0x4fe   : > { %s3060_s7 = sld [smem:[#allocation38_spill]]  ;;  %s2294_s16 = smov [#allocation9]  }
 0x502   : > { %s525_s26 = sand.u32 1, %s3056_s23   ;;  %s1876_s11 = sshll.u32 %s3057_s12, 7 }
 0x503   : > { %s1825_s5 = sshll.u32 %s525_s26, 3  ;;  %s1709_s9 = scalar_lea.sflag [#allocation4], %s525_s26 }
 0x504   : > { %s2933_s14 = scalar_lea.hbm %s3060_s7, %s1876_s11 }
 0x51c   : > { %v704_v29 = vpop.xlane.xlu1 %703 }
 0x51d   : > { %2104 = vrcp.f32 %v704_v29  ;;  %v1203_v29 = vstv %s1202_s27 }
 0x524   : > { %v836_v30 = vpop.xlane.xlu1 %835 }
 0x525   : > { %2106 = vrcp.f32 %v836_v30  ;;  %v770_v31 = vpop.xlane.xlu0 %769  ;;  %v1301_v30 = vstv %s1300_s22 }
 0x526   : > { %2108 = vrcp.f32 %v770_v31  ;;  %v1318_v31 = vstv %s1317_s18 }
 0x527   : > { %v2105_v33 = vpop.eup %2104 }
 0x528   : > { %v977_v32 = vpop.permute.xlu1 %976  ;;  %v706_v35 = vmul.f32 %v2105_v33, %v2609_v17 }
 0x529   : > { %v983_v34 = vsel %vm981_vm6, %v977_v32, 0 }
 0x52a   : > { %1941 = vmatpush3.bf16.msra.mxu1 %v983_v34  ;;  %v707_v39 = vpack.c.bf16 %v706_v35, %v706_v35 }
 0x52b   : > { %1952 = vmatprep.subr.bf16.mxu1 %v2276_v8 }
 0x52c   : > { %v902_v36 = vpop.xlane.xlu0 %901  ;;  %v709_v47 = vmul.bf16 %v708_v42, %v707_v39  ;;  %v1208_v62 = vpop.permute.xlu1 %1207 }
 0x52d   : > { %2110 = vrcp.f32 %v902_v36  ;;  %v1213_v32 = vsel %vm981_vm6, %v1208_v62, 0 }
 0x52e   : > { %v924_v60 = vmul.bf16 %v922_v53, %v709_v47  ;;  %v1040_v61 = vmul.bf16 %v1038_v54, %v709_v47  ;;  %v1270_v28 = vmul.bf16 %v1268_v16, %v709_v47 }
 0x52f   : > { %v2107_v37 = vpop.eup %2106 }
 0x530   : > { %v2109_v38 = vpop.eup %2108  ;;  %v838_v40 = vmul.f32 %v2107_v37, %v2613_v23  ;;  %v1093_v41 = vpop.permute.xlu0 %1092 }
 0x531   : > { %v772_v43 = vmul.f32 %v2109_v38, %v2615_v24  ;;  %v1098_v44 = vsel %vm981_vm6, %v1093_v41, 0  ;;  %v1323_v23 = vpop.permute.xlu1 %1322  ;;  %v1186_v24 = vstv %s1185_s8  ;;  %s2199_s8 = sshll.u32 %s2294_s16, 4  ;;  %s2200_s8 = int_to_ptr.vmem [resolvable:$false] %s2199_s8 }
 0x532   : > { %1947 = vmatpush3.bf16.msra.mxu0 %v1098_v44  ;;  %v839_v48 = vpack.c.bf16 %v838_v40, %v838_v40  ;;  %v1328_v33 = vsel %vm981_vm6, %v1323_v23, 0  ;;  %v2080_v44 = vld [vmem:[#allocation7] sm:$0xff]   ;;  %s2201_s27 = scalar_lea.vmem %s2200_s8, 256 }
 0x533   : > { %v773_v46 = vpack.c.bf16 %v772_v43, %v772_v43  ;;  %1958 = vmatprep.subr.bf16.mxu0 %v2276_v8  ;;  %v2085_v23 = vld [vmem:[%s3051_s3 + $0x10] ss:$8 sps:$4 sm:$0xff]  }
 0x534   : > { %v842_v58 = vmul.bf16 %v841_v51, %v839_v48 }
 0x535   : > { %v776_v52 = vmul.bf16 %v775_v45, %v773_v46  ;;  %v2081_v45 = vld [vmem:[#allocation7 + $0x8] sm:$0xff]  }
 0x536   : > { %v957_v12 = vmul.bf16 %v955_v1, %v842_v58  ;;  %v1073_v13 = vmul.bf16 %v1071_v2, %v842_v58  ;;  %v1188_v36 = vmul.bf16 %v1186_v24, %v842_v58  ;;  %v1303_v38 = vmul.bf16 %v1301_v30, %v842_v58 }
 0x537   : > { %v2111_v55 = vpop.eup %2110  ;;  %v940_v56 = vmul.bf16 %v938_v49, %v776_v52  ;;  %v1056_v57 = vmul.bf16 %v1054_v50, %v776_v52  ;;  %v1171_v15 = vmul.bf16 %v1169_v3, %v776_v52  ;;  %v1286_v17 = vmul.bf16 %v1284_v7, %v776_v52 }
 0x538   : > { %v904_v59 = vmul.f32 %v2111_v55, %v2621_v27  ;;  %v1155_v27 = vmul.bf16 %v1153_v14, %v709_v47  ;;  %v2292_v24 = vmov 0  }
 0x539   : > { %v941_v5 = vadd.bf16 %v940_v56, %v924_v60  ;;  %v1057_v6 = vadd.bf16 %v1056_v57, %v1040_v61  ;;  %v1287_v35 = vadd.bf16 %v1286_v17, %v1270_v28 }
 0x53a   : > { %v905_v4 = vpack.c.bf16 %v904_v59, %v904_v59  ;;  %v1172_v34 = vadd.bf16 %v1171_v15, %v1155_v27 }
 0x53b   : > { %v958_v19 = vadd.bf16 %v957_v12, %v941_v5  ;;  %v1074_v21 = vadd.bf16 %v1073_v13, %v1057_v6  ;;  %v1304_v41 = vadd.bf16 %v1303_v38, %v1287_v35  ;;  %v1856_v6 = vld [vmem:[%s3050_s2] ss:$0 sm:$0xff]  ;;  %v2091_v38 = vld [vmem:[%s3054_s10 + $0x18] sm:$0xff]  }
 0x53c   : > { %v908_v11 = vmul.bf16 %v907_v63, %v905_v4  ;;  %v1189_v40 = vadd.bf16 %v1188_v36, %v1172_v34  ;;  %v2088_v35 = vld [vmem:[%s3054_s10] sm:$0xff]   ;;  %v2089_v36 = vld [vmem:[%s3054_s10 + $0x8] sm:$0xff]  }
 0x53e   : > { %v974_v20 = vmul.bf16 %v972_v9, %v908_v11  ;;  %v1090_v22 = vmul.bf16 %v1088_v10, %v908_v11  ;;  %v1205_v37 = vmul.bf16 %v1203_v29, %v908_v11  ;;  %v1320_v39 = vmul.bf16 %v1318_v31, %v908_v11  ;;  %v1860_v29 = vld [vmem:[%s3052_s19] ss:$0 sm:$0xff]  ;;  %s527_s19 = scalar_lea.vmem [#allocation9], %s1825_s5 }
 0x53f   : > { %v1861_v31 = vld [vmem:[%s3053_s0] ss:$0 sm:$0xff]  ;;  %s1722_s4 = sshll.u32 %s527_s19, 4  ;;  %s2935_s4 = int_to_ptr.vmem [resolvable:$true] %s1722_s4 }
 0x540   : > { %v975_v25 = vadd.bf16 %v974_v20, %v958_v19  ;;  %v1091_v26 = vadd.bf16 %v1090_v22, %v1074_v21  ;;  %v1206_v42 = vadd.bf16 %v1205_v37, %v1189_v40  ;;  %v1321_v43 = vadd.bf16 %v1320_v39, %v1304_v41  ;;  %v2084_v21 = vld [vmem:[%s3051_s3 + $0x4] ss:$8 sps:$4 sm:$0xff]   ;;  %v2087_v22 = vld [vmem:[%s3051_s3 + $0x14] ss:$8 sps:$4 sm:$0xff]   ;;  %v1489_v41 = vld [vmem:[%s3055_s20] sm:$0x3]  ;;  %p2202_p11 = scmp.lt.s32.totalorder %s2935_s4, %s2200_s8 }
 0x541   : > { %v2090_v37 = vld [vmem:[%s3054_s10 + $0x10] sm:$0xff]   ;;  %v2092_v39 = vld [vmem:[%s3054_s10 + $0x20] sm:$0xff]   ;;  %v1493_v40 = vsub.s32 0, %v2553_v18  ;;  %s2195_s6 = scalar_lea.vmem %s2935_s4, 128 }
 0x542   : > { %1943 = vmatmul.mubr.msk.bf16.vlgmr.msra.gmra.mrb[4].mxu1 %vm648_vm4, %v975_v25  ;;  %1949 = vmatmul.mubr.msk.bf16.vlgmr.msra.gmra.mrb[16].mxu0 %vm648_vm4, %v1091_v26  ;;  %p2196_p8 = scmp.ne.s32.totalorder %s2935_s4, %s2195_s6  ;;  %p2203_p0 = scmp.lt.s32.totalorder %s2201_s27, %s2195_s6 }
 0x543   : > { %1953 = vmatpush3.bf16.msra.mxu1 %v1213_v32  ;;  %1959 = vmatpush3.bf16.msra.mxu0 %v1328_v33 }
 0x544   : > { %1954 = vmatprep.mubr.msk.bf16.mxu1 %vm2277_vm1, %v2276_v8  ;;  %1960 = vmatprep.mubr.msk.bf16.mxu0 %vm2277_vm1, %v2276_v8  ;;  %p2197_p6 = pnand %p2196_p8, %p2413_p5  ;;  %p2204_p13 = por %p2203_p0, %p2202_p11 }
 0x545   : > { %1964 = vmatprep.subr.bf16.mxu1 %v2276_v8  ;;  %1524 = vmatprep.subr.bf16.mxu0 %v2084_v21 }
 0x546   : > { %p2198_p10 = pneg %p2197_p6 }
 0x548   : > { %p2205_p1 = pnand %p2204_p13, %p2198_p10 }
 0x54a   : > { %1955 = vmatmul.mubr.msk.bf16.vlgmr.msra.gmra.mrb[8].mxu1 %vm648_vm4, %v1206_v42  ;;  %1961 = vmatmul.mubr.msk.bf16.vlgmr.msra.gmra.mrb[20].mxu0 %vm648_vm4, %v1321_v43  ;;  %v1497_v42 = vsub.s32 1, %v2553_v18  ;;  %v1494_v43 = vrot.slane %v1489_v41, %v1493_v40 }
 0x54b   : > { %1968 = vmatprep.mubr.msk.bf16.mxu1 %vm2277_vm1, %v2276_v8  ;;  %1965 = vmatpush3.bf16.msra.mxu1 %v2080_v44 }
 0x54c   : > { %1966 = vmatprep.subr.bf16.mxu1 %v2276_v8  ;;  %1556 = vmatprep.mubr.bf16.mxu0 %v2292_v24  ;;  %v1498_v44 = vrot.slane %v1489_v41, %v1497_v42 }
 0x54f   : > { %1967 = vmatpush3.bf16.msra.mxu1 %v2081_v45 }
 0x550   : > { %1972 = vmatprep.subr.bf16.mxu1 %v2276_v8 }
 0x615   : > { %v1019_v46 = vpop.f32.mrb[4].mxu1  ;;  %v1134_v47 = vpop.f32.mrb[16].mxu0 }
 0x616   : > { %v1944_v48 = vpop.f32.mrb[5].mxu1  ;;  %1371 = vrot.lane.b32.xlu0 %v1134_v47, %s2289_s30  ;;  %v1950_v49 = vpop.f32.mrb[17].mxu0 }
 0x617   : > { %v1022_v50 = vpop.f32.mrb[6].mxu1  ;;  %v1137_v51 = vpop.f32.mrb[18].mxu0 }
 0x618   : > { %v1945_v52 = vpop.f32.mrb[7].mxu1  ;;  %v1951_v53 = vpop.f32.mrb[19].mxu0 }
 0x61d   : > { %v1249_v54 = vpop.f32.mrb[8].mxu1  ;;  %v1364_v55 = vpop.f32.mrb[20].mxu0 }
 0x61e   : > { %1375 = vrot.lane.b32.xlu1 %v1249_v54, %s2290_s25  ;;  %v1956_v56 = vpop.f32.mrb[9].mxu1  ;;  %1379 = vrot.lane.b32.xlu0 %v1364_v55, %s2291_s13  ;;  %v1962_v57 = vpop.f32.mrb[21].mxu0 }
 0x61f   : > { %v1252_v58 = vpop.f32.mrb[10].mxu1  ;;  %v1367_v59 = vpop.f32.mrb[22].mxu0 }
 0x620   : > { %v1957_v60 = vpop.f32.mrb[11].mxu1  ;;  %v1963_v61 = vpop.f32.mrb[23].mxu0 }
 0x688   : > { %v1372_v62 = vpop.permute.xlu0 %1371 }
 0x689   : > { %v1382_v63 = vsel %vm648_vm4, %v1019_v46, %v1372_v62 }
 0x690   : > { %v1376_v1 = vpop.permute.xlu1 %1375  ;;  %v1380_v2 = vpop.permute.xlu0 %1379 }
 0x691   : > { %v1384_v3 = vsel %vm1383_vm7, %v1382_v63, %v1376_v1 }
 0x692   : > { %v1386_v4 = vsel %vm1385_vm8, %v1384_v3, %v1380_v2 }
 0x693   : > { %v1387_v5 = vpack.c.bf16 %v1386_v4, %v1386_v4 }
 0x695   : > { %1969 = vmatmul.mubr.msk.bf16.vlgmr.msra.gmra.mrb[12].mxu1 %vm536_vm0, %v1387_v5 }
 0x696   : > { %1984 = vmatprep.mubr.msk.bf16.mxu1 %vm2277_vm1, %v2276_v8  ;;  %1973 = vmatpush3.bf16.msra.mxu1 %v2088_v35 }
 0x697   : > { %1974 = vmatprep.subr.bf16.mxu1 %v2276_v8 }
 0x69a   : > { %1975 = vmatpush3.bf16.msra.mxu1 %v2089_v36 }
 0x69b   : > { %1976 = vmatprep.subr.bf16.mxu1 %v2276_v8 }
 0x69e   : > { %1977 = vmatpush3.bf16.msra.mxu1 %v2090_v37 }
 0x69f   : > { %1978 = vmatprep.subr.bf16.mxu1 %v2276_v8 }
 0x6a2   : > { %1979 = vmatpush3.bf16.msra.mxu1 %v2091_v38 }
 0x6a3   : > { %1980 = vmatprep.subr.bf16.mxu1 %v2276_v8 }
 0x6a6   : > { %1981 = vmatpush3.bf16.msra.mxu1 %v2092_v39 }
 0x6a7   : > { %1982 = vmatprep.subr.bf16.mxu1 %v2276_v8 }
 0x768   : > { %v1448_v7 = vpop.f32.mrb[12].mxu1 }
 0x769   : > { %v1449_v9 = vadd.f32 %v1856_v6, %v1448_v7  ;;  %v1970_v10 = vpop.f32.mrb[13].mxu1 }
 0x76a   : > { %v1451_v11 = vpop.f32.mrb[14].mxu1 }
 0x76b   : > { %v2870_v12 = vadd.f32 %v1449_v9, %v2527_v0  ;;  %v1971_v13 = vpop.f32.mrb[15].mxu1  ;;  %v2082_v0 = vld [vmem:[%s3051_s3] ss:$8 sps:$4 sm:$0xff]  }
 0x76c   : > { %1525 = vmatpush1.bf16.msra.mxu0 %v2082_v0  ;;  %v2093_v11 = vld [vmem:[%s3054_s10 + $0x28] sm:$0xff]  }
 0x76d   : > { %v1457_v14 = vsel %vm536_vm0, %v2870_v12, 0.0  ;;  %1526 = vmatprep.subr.bf16.mxu0 %v2087_v22  ;;  %1983 = vmatpush3.bf16.msra.mxu1 %v2093_v11  ;;  %v1867_v22 = vld [vmem:[%s3058_s21] ss:$0 sm:$0xff] }
 0x76e   : > { %1458 = vadd.xlane.f32.xlu1 %v1457_v14 }
 0x770   : > { %1527 = vmatpush1.bf16.msra.mxu0 %v2085_v23 }
 0x7fb   : > { %v1459_v15 = vpop.xlane.xlu1 %1458 }
 0x7fc   : > { %v1460_v16 = vmul.f32 0.03125, %v1459_v15 }
 0x7fe   : > { %v1461_v17 = vsub.f32 %v2870_v12, %v1460_v16 }
 0x800   : > { %v1462_v19 = vmul.f32 %v1461_v17, %v1461_v17 }
 0x802   : > { %v1463_v20 = vsel %vm536_vm0, %v1462_v19, 0.0 }
 0x803   : > { %1464 = vadd.xlane.f32.xlu0 %v1463_v20 }
 0x890   : > { %v1465_v25 = vpop.xlane.xlu0 %1464 }
 0x891   : > { %v1466_v26 = vmul.f32 0.03125, %v1465_v25 }
 0x893   : > { %v1467_v27 = vadd.f32 1e-05, %v1466_v26 }
 0x895   : > { %2112 = vrsqrt.f32 %v1467_v27 }
 0x89f   : > { %v2113_v28 = vpop.eup %2112 }
 0x8a0   : > { %v1469_v30 = vmul.f32 %v2113_v28, %v1461_v17 }
 0x8a2   : > { %v1476_v32 = vmul.f32 %v1860_v29, %v1469_v30 }
 0x8a4   : > { %v1483_v33 = vadd.f32 %v1861_v31, %v1476_v32 }
 0x8a6   : > { %v1484_v34 = vpack.c.bf16 %v1483_v33, %v1483_v33 }
 0x8a8   : > { %1866 = vmatmul.mubr.msk.bf16.vlgmr.msra.gmra.mrb[24].mxu0 %vm536_vm0, %v1484_v34 }
 0x97b   : > { %v1558_v45 = vpop.f32.mrb[24].mxu0 }
 0x97c   : > { %v1559_v46 = vadd.f32 %v1558_v45, %v1494_v43  ;;  %v1560_v47 = vpop.f32.mrb[25].mxu0 }
 0x97d   : > { %v1561_v48 = vadd.f32 %v1560_v47, %v1498_v44  ;;  %v1562_v49 = vpop.f32.mrb[26].mxu0 }
 0x97e   : > { %v1567_v50 = vmin.f32 %v1559_v46, 20.0  ;;  %v1563_v51 = vpop.f32.mrb[27].mxu0  ;;  %vm1565_vm10 = vcmp.gt.f32.partialorder %v1559_v46, 20.0 }
 0x97f   : > { %v1568_v52 = vmin.f32 %v1561_v48, 20.0  ;;  %vm1566_vm12 = vcmp.gt.f32.partialorder %v1561_v48, 20.0 }
 0x980   : > { %v1569_v53 = vmul.f32 1.442695, %v1567_v50 }
 0x981   : > { %v1571_v8 = vmul.f32 1.442695, %v1568_v52 }
 0x982   : > { %2114 = vpow2.f32 %v1569_v53 }
 0x983   : > { %2116 = vpow2.f32 %v1571_v8 }
 0x98c   : > { %v2115_v54 = vpop.eup %2114 }
 0x98d   : > { %v2117_v55 = vpop.eup %2116  ;;  %v1573_v56 = vadd.f32 1.0, %v2115_v54  ;;  %v1576_v18 = vmul.f32 -0.5, %v2115_v54  ;;  %v1579_v60 = vand.u32 2147483647, %v2115_v54 }
 0x98e   : > { %v1582_v57 = vadd.f32 1.0, %v2117_v55  ;;  %v1585_v58 = vmul.f32 -0.5, %v2117_v55  ;;  %v1588_v62 = vand.u32 2147483647, %v2117_v55 }
 0x98f   : > { %2118 = vlog2.f32 %v1573_v56  ;;  %v1577_v59 = vadd.f32 1.0, %v1576_v18  ;;  %vm1580_vm9 = vcmp.lt.f32.partialorder %v1579_v60, 0.0004427343 }
 0x990   : > { %2120 = vlog2.f32 %v1582_v57  ;;  %v1586_v61 = vadd.f32 1.0, %v1585_v58  ;;  %vm1589_vm11 = vcmp.lt.f32.partialorder %v1588_v62, 0.0004427343 }
 0x991   : > { %v1578_v3 = vmul.f32 %v2115_v54, %v1577_v59 }
 0x992   : > { %v1587_v5 = vmul.f32 %v2117_v55, %v1586_v61 }
 0x999   : > { %v2119_v63 = vpop.eup %2118 }
 0x99a   : > { %v2121_v1 = vpop.eup %2120  ;;  %v1575_v2 = vmul.f32 0.6931472, %v2119_v63 }
 0x99b   : > { %v1584_v4 = vmul.f32 0.6931472, %v2121_v1 }
 0x99c   : > { %v1581_v6 = vsel %vm1580_vm9, %v1578_v3, %v1575_v2 }
 0x99d   : > { %v1591_v7 = vsel %vm1565_vm10, %v1559_v46, %v1581_v6  ;;  %v1590_v9 = vsel %vm1589_vm11, %v1587_v5, %v1584_v4 }
 0x99e   : > { %2122 = vtanh.f32 %v1591_v7  ;;  %v1592_v10 = vsel %vm1566_vm12, %v1561_v48, %v1590_v9 }
 0x99f   : > { %2124 = vtanh.f32 %v1592_v10 }
 0x9a8   : > { %v2123_v13 = vpop.eup %2122 }
 0x9a9   : > { %v2125_v14 = vpop.eup %2124  ;;  %v1595_v15 = vmul.f32 %v2123_v13, %v1559_v46 }
 0x9aa   : > { %v1596_v16 = vmul.f32 %v2125_v14, %v1561_v48 }
 0x9ab   : > { %1599 = vrot.lane.b32.xlu0 %v1595_v15, %s2293_s15 }
 0x9ac   : > { %1601 = vrot.lane.b32.xlu1 %v1596_v16, %s2293_s15 }
 0xa1d   : > { %v1600_v17 = vpop.permute.xlu0 %1599 }
 0xa1e   : > { %v1602_v19 = vpop.permute.xlu1 %1601 }
 0xa1f   : > { %v1603_v20 = vsel %vm536_vm0, %v1600_v17, %v1602_v19 }
 0xa20   : > { %v1605_v21 = vmul.f32 %v1603_v20, %v1559_v46 }
 0xa22   : > { %v1606_v0 = vpack.c.bf16 %v1605_v21, %v1605_v21 }
 0xa24   : > { %1985 = vmatmul.mubr.msk.bf16.vlgmr.msra.gmra.mrb[16].mxu1 %vm1662_vm13, %v1606_v0 }
 0xaf7   : > { %v1700_v23 = vpop.f32.mrb[16].mxu1 }
 0xaf8   : > { %v1701_v24 = vadd.f32 %v1867_v22, %v1700_v23  ;;  %v1986_v25 = vpop.f32.mrb[17].mxu1 }
 0xaf9   : > { %v1703_v26 = vpop.f32.mrb[18].mxu1 }
 0xafa   : > { %v1706_v27 = vadd.f32 %v1701_v24, %v2870_v12  ;;  %v1987_v28 = vpop.f32.mrb[19].mxu1 }
 0xafc   : > { %1707 = vst.msk [vmem:[%s527_s19] sm:$0xff] %vm536_vm0, %v1706_v27 }
 0xafd   : > { %2208 = shalt.err (!%p2205_p1)
}
 0xafe   : > { %s2209_s22 = scalar_lea.hbm %s2933_s14, 128  ;;  %s2213_s25 = scalar_lea.hbm %s3060_s7, 256 }
 0xaff   : > { %p2210_p2 = scmp.ne.s32.totalorder %s2933_s14, %s2209_s22  ;;  %p2214_p3 = scmp.lt.u32.totalorder %s2933_s14, %s3060_s7 }
 0xb00   : > { %p2215_p4 = scmp.lt.u32.totalorder %s2213_s25, %s2209_s22  ;;  %p2217_p8 = scmp.lt.u32.totalorder %s2209_s22, %s2933_s14 }
 0xb01   : > { %p2211_p12 = pnand %p2210_p2, %p2413_p5 }
 0xb02   : > { %p2216_p7 = por %p2215_p4, %p2214_p3 }
 0xb03   : > { %p2212_p9 = pneg %p2211_p12 }
 0xb04   : > { %p2218_p6 = por %p2217_p8, %p2216_p7 }
 0xb06   : > { %p2219_p10 = pnand %p2218_p6, %p2212_p9 }
 0xb08   : > { %2222 = shalt.err (!%p2219_p10)
}
 0xb09   : > { %2000 = dma.vmem_to_hbm [thread:$0]  (%p2413_p5), %s2935_s4, 128, %s2933_s14, %s1709_s9  }
 0xb0a PF: > { %s3061_s17 = sld [smem:[#allocation17_spill]]  ;;  %s3062_s2 = sld [smem:[#allocation14_spill]] }
 0xb0b   : > { %s3063_s23 = sld [smem:[#allocation22_spill]] }
 0xb10   : > { %p2022_p11 = scmp.ge.s32.totalorder %s3061_s17, 2  ;;  %s1734_s12 = sand.u32 1, %s3062_s2  }
 0xb11   : > { %p3064_p0 = scmp.ne.s32.totalorder %s3063_s23, 0  ;;  %s1735_s15 = scalar_lea.sflag [#allocation4], %s1734_s12 }
 0xb13   : > { %p2013_p13 = pnand %p2022_p11, %p3064_p0 }
 0xb15   : > { %2252 = dma.done.wait (!%p2013_p13), %s1735_s15, 128  }
 0xb16   : > { %2254 = vsyncadd (!%p2013_p13), %s1735_s15, 4294967168  ;;  %s3065_s21 = sld [smem:[#allocation19_spill]]  ;;  %s3066_s18 = sld [smem:[#allocation15_spill]] }
 0xb17   : > { %s3067_s19 = sld [smem:[#allocation16_spill]]  ;;  %s3068_s20 = sld [smem:[#allocation20_spill]] }
 0xb1c   : > { %p28_p1 = scmp.ge.s32.totalorder %s3065_s21, 4  }
 0xb1e   :  { %30 = sbr.rel (!%p28_p1) target bundleno = 23 (0x17), region = 132 }
 0xb25   :  { %1740 = vsyncpa [#allocation3], 1 }
 0xb26   :  { %1742 = vsyncpa [#allocation3 + $0x1], 1 }
 0xb27   :  { %1743 = vsyncpa [#allocation8], 1 }
 0xb28   :  { %1744 = vsyncpa [#allocation4], 1 }
 0xb29   :  { %1746 = vsyncpa [#allocation4 + $0x1], 1 }
 0xb2a   :  { %1747 = vsyncpa [#allocation5], 1 }
 0xb2b   :  { %1749 = vsyncpa [#allocation5 + $0x1], 1 }

// kernel: tpu_custom_call.1
= control target key start
LH: loop header
LB: loop body
LE: loop exit
PB: predicated region body
PF: predicated region fallthrough
CT: control target
= control target key end

     0   :  { %s2976_s0 = inlined_call_operand.hbm [shape: f32[4,4], index: 0, kind: input, shape index: {}]   ;;  %s2977_s1 = inlined_call_operand.vmem [shape: f32[2,8,32], index: 1, kind: input, shape index: {}]   ;;  %s2978_s2 = inlined_call_operand.vmem [shape: f32[1,32], index: 2, kind: input, shape index: {}]   ;;  %s2979_s3 = inlined_call_operand.vmem [shape: f32[1,32], index: 3, kind: input, shape index: {}]   ;;  %s2980_s4 = inlined_call_operand.vmem [shape: bf16[32,96], index: 4, kind: input, shape index: {}]   ;;  %s2981_s5 = inlined_call_operand.vmem [shape: f32[1,96], index: 5, kind: input, shape index: {}]   ;;  %s2982_s6 = inlined_call_operand.hbm [shape: bf16[4,8,8], index: 6, kind: input, shape index: {}]   ;;  %s2983_s7 = inlined_call_operand.hbm [shape: bf16[32,32], index: 7, kind: input, shape index: {}]   ;;  %s2984_s8 = inlined_call_operand.vmem [shape: f32[1,32], index: 8, kind: input, shape index: {}]   ;;  %s2985_s9 = inlined_call_operand.vmem [shape: f32[1,32], index: 9, kind: input, shape index: {}]   ;;  %s2986_s10 = inlined_call_operand.vmem [shape: f32[1,32], index: 10, kind: input, shape index: {}]   ;;  %s2987_s11 = inlined_call_operand.vmem [shape: bf16[32,192], index: 11, kind: input, shape index: {}]   ;;  %s2988_s12 = inlined_call_operand.vmem [shape: f32[1,192], index: 12, kind: input, shape index: {}]   ;;  %s2989_s13 = inlined_call_operand.vmem [shape: bf16[96,32], index: 13, kind: input, shape index: {}]   ;;  %s2990_s14 = inlined_call_operand.vmem [shape: f32[1,32], index: 14, kind: input, shape index: {}]   ;;  %s2991_s15 = inlined_call_operand.hbm [shape: f32[2,8,32], index: 15, kind: output, shape index: {}]  }
   0x1   :  { %3006 = sst [smem:[#allocation23_spill]] %s2976_s0 }
   0x2   :  { %3007 = sst [smem:[#allocation24_spill]] %s2977_s1 }
   0x3   :  { %3008 = sst [smem:[#allocation25_spill]] %s2978_s2 }
   0x4   :  { %3009 = sst [smem:[#allocation26_spill]] %s2979_s3 }
   0x5   :  { %3010 = sst [smem:[#allocation27_spill]] %s2980_s4 }
   0x6   :  { %3011 = sst [smem:[#allocation28_spill]] %s2981_s5 }
   0x7   :  { %3012 = sst [smem:[#allocation29_spill]] %s2982_s6 }
   0x8   :  { %3013 = sst [smem:[#allocation30_spill]] %s2983_s7 }
   0x9   :  { %3014 = sst [smem:[#allocation31_spill]] %s2984_s8 }
   0xa   :  { %3015 = sst [smem:[#allocation32_spill]] %s2985_s9 }
   0xb   :  { %3016 = sst [smem:[#allocation33_spill]] %s2986_s10 }
   0xc   :  { %3017 = sst [smem:[#allocation34_spill]] %s2987_s11 }
   0xd   :  { %3018 = sst [smem:[#allocation35_spill]] %s2988_s12 }
   0xe   :  { %3019 = sst [smem:[#allocation36_spill]] %s2989_s13 }
   0xf   :  { %3020 = sst [smem:[#allocation37_spill]] %s2990_s14 }
  0x10   :  { %3021 = sst [smem:[#allocation38_spill]] %s2991_s15 }
  0x11   :  { %20 = vsyncpa [#allocation5], 0 }
  0x12   :  { %21 = vsyncpa [#allocation3], 0 }
  0x13   :  { %22 = vsyncpa [#allocation8], 0 }
  0x14   :  { %23 = vsyncpa [#allocation4], 0 }
  0x15   :  { %25 = vsyncpa [#allocation4 + $0x1], 0  ;;  %s2375_s18 = smov 0   ;;  %s2377_s19 = smov 0  }
  0x16   :  { %s2379_s20 = smov 0   ;;  %s2381_s21 = smov 0  }
  0x17 LB: > { %3022 = sst [smem:[#allocation14_spill]] %s2257_s18  ;;  %s2396_s22 = sadd.s32 4294967295, %s2269_s21   ;;  %s2269_s21 = sphi %s2381_s21, %s3065_s21   ;;  %s2265_s20 = sphi %s2379_s20, %s3068_s20   ;;  %s2261_s19 = sphi %s2377_s19, %s3067_s19   ;;  %s2257_s18 = sphi %s2375_s18, %s3066_s18  }
  0x18   : > { %3023 = sst [smem:[#allocation15_spill]] %s2261_s19  ;;  %s1815_s23 = sadd.s32 4294967294, %s2269_s21  }
  0x19   : > { %3024 = sst [smem:[#allocation16_spill]] %s2265_s20  ;;  %s2400_s24 = sadd.s32 1, %s2269_s21  }
  0x1a   : > { %3025 = sst [smem:[#allocation17_spill]] %s2269_s21  ;;  %s358_s25 = sadd.s32 1, %s2265_s20 }
  0x1b   : > { %3026 = sst [smem:[#allocation18_spill]] %s2396_s22  ;;  %s355_s26 = ssub.s32 %s2269_s21, %s2400_s24 }
  0x1c   : > { %3027 = sst [smem:[#allocation19_spill]] %s2400_s24  ;;  %p368_p0 = scmp.ne.s32.totalorder %s2265_s20, %s2261_s19 }
  0x1d   : > { %p356_p1 = scmp.eq.s32.totalorder %s355_s26, 0  ;;  %p369_p2 = scmp.eq.s32.totalorder %s2396_s22, 1 }
  0x1e   : > { %p374_p3 = scmp.ne.s32.totalorder %s2261_s19, %s2257_s18  ;;  %p375_p4 = scmp.eq.s32.totalorder %s1815_s23, 1 }
  0x1f   : > { %s2411_s27 = scalar_select %p356_p1, %s2265_s20, %s358_s25  }
  0x20   : > { %p2413_p5 = por %p369_p2, %p368_p0  ;;  %p2417_p6 = por %p375_p4, %p374_p3 }
  0x21   : > { %3028 = sst [smem:[#allocation20_spill]] %s2411_s27  ;;  %p1816_p7 = scmp.ge.s32.totalorder %s2269_s21, 1 }
  0x22   : > { %s3029_s28 = scalar_select %p2413_p5, 1, 0 }
  0x23   : > { %s3031_s29 = scalar_select %p2417_p6, 1, 0 }
  0x24   : > { %3030 = sst [smem:[#allocation21_spill]] %s3029_s28  ;;  %p382_p8 = scmp.lt.s32.totalorder %s2269_s21, 3 }
  0x25   : > { %3032 = sst [smem:[#allocation22_spill]] %s3031_s29  ;;  %p3002_p10 = scmp.eq.s32.totalorder %s2396_s22, 0 }
  0x26   : > { %p2423_p9 = pnand %p1816_p7, %p382_p8  ;;  %s2271_s16 = smov [#allocation6]  }
  0x27   : > { %s415_s17 = sshll.u32 %s2271_s16, 4  ;;  %s2272_s25 = smov [#allocation7]   ;;  %s2430_s17 = int_to_ptr.vmem [resolvable:$true] %s415_s17 }
  0x28   : > { %p2002_p11 = pneg %p2423_p9  ;;  %s428_s26 = sshll.u32 %s2272_s25, 4  ;;  %s2438_s26 = int_to_ptr.vmem [resolvable:$true] %s428_s26 }
  0x29   : > { %s3035_s0 = sld [smem:[#allocation23_spill]] }
  0x2a   : > { %p2434_p12 = pnand %p3002_p10, %p2002_p11 }
  0x2c   : > { %p2448_p0 = pneg %p2434_p12 }
  0x2f   : > { %s2126_s24 = scalar_lea.hbm %s3035_s0, 64 }
  0x30   : > { %p2127_p13 = scmp.ne.s32.totalorder %s3035_s0, %s2126_s24  ;;  %p2133_p3 = scmp.lt.u32.totalorder %s2126_s24, %s3035_s0 }
  0x32   : > { %p2129_p1 = pnand %p2448_p0, %p2127_p13 }
  0x34   : > { %p2130_p2 = pneg %p2129_p1 }
  0x36   : > { %p2135_p4 = pnand %p2133_p3, %p2130_p2 }
  0x38   : > { %2138 = shalt.err (!%p2135_p4)
}
  0x39   : > { %s2273_s20 = smov [#allocation2]   ;;  %s3037_s6 = sld [smem:[#allocation29_spill]] }
  0x3a   : > { %2005 = dma.hbm_to_smem (!%p2434_p12), %s3035_s0, 64, %s2273_s20, [#allocation5]  }
  0x3f   : > { %s2139_s28 = scalar_lea.hbm %s3037_s6, 256 }
  0x40   : > { %p2140_p7 = scmp.ne.s32.totalorder %s3037_s6, %s2139_s28  ;;  %p2146_p13 = scmp.lt.u32.totalorder %s2139_s28, %s3037_s6 }
  0x42   : > { %p2142_p8 = pnand %p2140_p7, %p2448_p0 }
  0x44   : > { %p2143_p11 = pneg %p2142_p8 }
  0x46   : > { %p2148_p1 = pnand %p2146_p13, %p2143_p11 }
  0x48   : > { %2151 = shalt.err (!%p2148_p1)
}
  0x49   : > { %s2152_s25 = scalar_lea.vmem %s2430_s17, 256  ;;  %p2160_p10 = scmp.lt.s32.totalorder %s2430_s17, %s2430_s17 }
  0x4a   : > { %p2153_p2 = scmp.ne.s32.totalorder %s2430_s17, %s2152_s25  ;;  %p2161_p6 = scmp.lt.s32.totalorder %s2152_s25, %s2152_s25 }
  0x4c   : > { %p2155_p3 = pnand %p2153_p2, %p2448_p0  ;;  %p2162_p7 = por %p2161_p6, %p2160_p10 }
  0x4e   : > { %p2156_p4 = pneg %p2155_p3 }
  0x50   : > { %p2163_p8 = pnand %p2162_p7, %p2156_p4 }
  0x52   : > { %2166 = shalt.err (!%p2163_p8)
}
  0x53   : > { %s2274_s14 = smov 64   ;;  %s2275_s15 = smov 4  }
  0x54   : > { %2008 = dma.hbm_to_vmem [thread:$0]  (!%p2434_p12), %s3037_s6, 256, %s2430_s17, [#allocation3], %s2274_s14, %s2274_s14, %s2275_s15  }
  0x55   : > { %s3038_s7 = sld [smem:[#allocation30_spill]] }
  0x5b   : > { %s2167_s27 = scalar_lea.hbm %s3038_s7, 256 }
  0x5c   : > { %p2168_p6 = scmp.ne.s32.totalorder %s3038_s7, %s2167_s27  ;;  %p2174_p13 = scmp.lt.u32.totalorder %s2167_s27, %s3038_s7 }
  0x5e   : > { %p2170_p10 = pnand %p2168_p6, %p2448_p0 }
  0x60   : > { %p2171_p11 = pneg %p2170_p10 }
  0x62   : > { %p2176_p1 = pnand %p2174_p13, %p2171_p11 }
  0x64   : > { %2179 = shalt.err (!%p2176_p1)
}
  0x65   : > { %s2180_s17 = scalar_lea.vmem %s2438_s26, 256  ;;  %p2188_p7 = scmp.lt.s32.totalorder %s2438_s26, %s2438_s26 }
  0x66   : > { %p2181_p2 = scmp.ne.s32.totalorder %s2438_s26, %s2180_s17  ;;  %p2189_p8 = scmp.lt.s32.totalorder %s2180_s17, %s2180_s17 }
  0x68   : > { %p2183_p3 = pnand %p2181_p2, %p2448_p0  ;;  %p2190_p6 = por %p2189_p8, %p2188_p7 }
  0x6a   : > { %p2184_p4 = pneg %p2183_p3 }
  0x6c   : > { %p2191_p10 = pnand %p2190_p6, %p2184_p4 }
  0x6e   : > { %2194 = shalt.err (!%p2191_p10)
}
  0x6f   : > { %2011 = dma.hbm_to_vmem [thread:$0]  (!%p2434_p12), %s3038_s7, 256, %s2438_s26, [#allocation8], %s2274_s14, %s2274_s14, %s2275_s15  }
  0x70   : > { %472 = sbr.rel (%p2423_p9) target bundleno = 2826 (0xb0a), region = 80  ;;  %p3039_p11 = scmp.eq.s32.totalorder (!%p2423_p9), %s2396_s22, 0 }
  0x77   : > { %2240 = dma.done.wait (%p3039_p11), [#allocation5], 64   ;;  %p3040_p0 = pmov %p3039_p11 }
  0x79   : > { %2242 = vsyncadd (%p3040_p0), [#allocation5], 4294967232  ;;  %p3041_p13 = pmov %p3040_p0 }
  0x7a   : > { %p3042_p1 = pmov %p3040_p0 }
  0x7b   : > { %2244 = dma.done.wait (%p3041_p13), [#allocation3], 256  }
  0x7c   : > { %2246 = vsyncadd (%p3042_p1), [#allocation3], 4294967040  ;;  %p3043_p2 = pmov %p3040_p0 }
  0x7d   : > { %p3044_p12 = pmov %p3040_p0 }
  0x7e   : > { %2248 = dma.done.wait (%p3043_p2), [#allocation8], 256  }
  0x7f   : > { %2250 = vsyncadd (%p3044_p12), [#allocation8], 4294967040 }
  0x80   : > { %486 = sfence }
  0x81   : > { %p528_p9 = scmp.lt.s32.totalorder %s2396_s22, 1  ;;  %vm536_vm0 = vcmask 261120   ;;  %s3045_s1 = sld [smem:[#allocation24_spill]]  ;;  %v2276_v8 = vmov 0.0   ;;  %vm2277_vm1 = vmmov 0   ;;  %v566_v13 = vlaneseq }
  0x82   : > { %s3046_s4 = sld [smem:[#allocation27_spill]]  ;;  %1908 = vmatprep.subr.bf16.mxu0 %v2276_v8  ;;  %1912 = vmatprep.mubr.msk.bf16.mxu0 %vm2277_vm1, %v2276_v8  ;;  %s3047_s2 = sld [smem:[#allocation25_spill]]  ;;  %vm648_vm4 = vcmask 64512   ;;  %vm981_vm6 = vcmask 1043456   ;;  %vm1383_vm7 = vcmask 130048   ;;  %vm1385_vm8 = vcmask 195584  }
  0x83   : > { %s529_s30 = scalar_select %p528_p9, %s2396_s22, 1  ;;  %1928 = vmatprep.subr.bf16.mxu1 %v2276_v8  ;;  %1930 = vmatprep.mubr.msk.bf16.mxu1 %vm2277_vm1, %v2276_v8  ;;  %v2553_v18 = vshrl.u32 %v566_v13, 7  ;;  %v2555_v20 = vand.u32 127, %v566_v13  ;;  %vm1662_vm13 = vcmask 785408  }
  0x84   : > { %s3048_s3 = sld [smem:[#allocation26_spill]]  ;;  %s3049_s5 = sld [smem:[#allocation28_spill]] }
  0x85   : > { %s1826_s23 = sshll.u32 %s529_s30, 3  ;;  %vm568_vm2 = vcmp.eq.s32.totalorder %v2553_v18, 0  ;;  %vm572_vm3 = vcmp.lt.s32.totalorder %v2555_v20, 16  ;;  %s2278_s28 = smov 80   ;;  %vm644_vm5 = vcmp.le.s32.totalorder %v2555_v20, %v2553_v18 }
  0x86   : > { %s2279_s30 = smov 96   ;;  %s2281_s26 = smov 72  }
  0x87   : > { %s531_s14 = scalar_lea.vmem %s3045_s1, %s1826_s23  ;;  %s2280_s23 = smov 88  }
  0x88   : > { %v2527_v0 = vld [vmem:[%s531_s14] sm:$0xff]  ;;  %v2079_v9 = vld [vmem:[%s3046_s4 + $0x8] sm:$0xff]   ;;  %s2282_s16 = smov 120   ;;  %s2283_s14 = smov 112  }
  0x89   : > { %v537_v1 = vsel %vm536_vm0, %v2527_v0, 0.0  ;;  %v2078_v7 = vld [vmem:[%s3046_s4] sm:$0xff]   ;;  %s2284_s15 = smov 104   ;;  %s2285_s20 = smov 64  }
  0x8a   : > { %538 = vadd.xlane.f32.xlu0 %v537_v1  ;;  %1909 = vmatpush3.bf16.msra.mxu0 %v2078_v7  ;;  %v1827_v15 = vld [vmem:[%s3047_s2] ss:$0 sm:$0xff]  ;;  %s2286_s18 = smov 48   ;;  %s2287_s27 = smov 40  }
  0x8b   : > { %1910 = vmatprep.subr.bf16.mxu0 %v2276_v8  ;;  %v1828_v17 = vld [vmem:[%s3048_s3] ss:$0 sm:$0xff]  ;;  %s2288_s29 = smov 56   ;;  %s909_s21 = sld [smem:[#allocation2]] }
  0x8c   : > { %v1829_v26 = vld [vmem:[%s3049_s5] ss:$0 sm:$0xff]  ;;  %s2629_s25 = sld [smem:[#allocation2 + $0x1]]  ;;  %s1838_s19 = sld [smem:[#allocation2 + $0x2]] }
  0x8d   : > { %s2672_s3 = sld [smem:[#allocation2 + $0x180]]  ;;  %s2712_s9 = sld [smem:[#allocation2 + $0x181]] }
  0x8e   : > { %1911 = vmatpush3.bf16.msra.mxu0 %v2079_v9 }
  0x8f   : > { %1916 = vmatprep.subr.bf16.mxu0 %v2276_v8 }
  0x91   : > { %s912_s24 = sshrl.u32 %s909_s21, 16  ;;  %p911_p3 = scmp.ne.f32.partialorder %s909_s21, %s909_s21 }
  0x92   : > { %s913_s17 = sand.u32 1, %s912_s24  ;;  %p927_p4 = scmp.ne.f32.partialorder %s2629_s25, %s2629_s25 }
  0x93   : > { %p944_p7 = scmp.ne.f32.partialorder %s1838_s19, %s1838_s19  ;;  %p1273_p9 = scmp.ne.f32.partialorder %s2712_s9, %s2712_s9 }
 0x117   : > { %v539_v2 = vpop.xlane.xlu0 %538 }
 0x118   : > { %v541_v3 = vmul.f32 0.03125, %v539_v2 }
 0x11a   : > { %v542_v4 = vsub.f32 %v2527_v0, %v541_v3 }
 0x11c   : > { %v543_v5 = vmul.f32 %v542_v4, %v542_v4 }
 0x11e   : > { %v544_v6 = vsel %vm536_vm0, %v543_v5, 0.0 }
 0x11f   : > { %545 = vadd.xlane.f32.xlu0 %v544_v6 }
 0x1ac   : > { %v546_v10 = vpop.xlane.xlu0 %545 }
 0x1ad   : > { %v547_v11 = vmul.f32 0.03125, %v546_v10 }
 0x1af   : > { %v548_v12 = vadd.f32 1e-05, %v547_v11 }
 0x1b1   : > { %2094 = vrsqrt.f32 %v548_v12 }
 0x1bb   : > { %v2095_v14 = vpop.eup %2094 }
 0x1bc   : > { %v550_v16 = vmul.f32 %v2095_v14, %v542_v4 }
 0x1be   : > { %v557_v19 = vmul.f32 %v1827_v15, %v550_v16 }
 0x1c0   : > { %v564_v21 = vadd.f32 %v1828_v17, %v557_v19 }
 0x1c2   : > { %v565_v22 = vrot.slane %v564_v21, 7 }
 0x1c4   : > { %v569_v23 = vsel %vm568_vm2, 0.0, %v565_v22 }
 0x1c5   : > { %v573_v24 = vsel %vm572_vm3, %v569_v23, %v564_v21 }
 0x1c6   : > { %v574_v25 = vpack.c.bf16 %v573_v24, %v573_v24 }
 0x1c8   : > { %1913 = vmatmul.mubr.msk.bf16.vlgmr.msra.gmra.mrb[0].mxu0 %vm536_vm0, %v574_v25 }
 0x1c9   : > { %1918 = vmatprep.mubr.msk.bf16.mxu0 %vm2277_vm1, %v2276_v8 }
 0x29b   : > { %v635_v27 = vpop.f32.mrb[0].mxu0 }
 0x29c   : > { %v636_v28 = vadd.f32 %v1829_v26, %v635_v27  ;;  %v1914_v29 = vpop.f32.mrb[1].mxu0 }
 0x29d   : > { %v638_v30 = vpop.f32.mrb[2].mxu0 }
 0x29e   : > { %v2565_v31 = vpack.c.bf16 %v636_v28, %v636_v28  ;;  %v1915_v32 = vpop.f32.mrb[3].mxu0  ;;  %v641_v33 = vmul.f32 0.35355338, %v636_v28 }
 0x2a0   : > { %779 = vrot.lane.b32.xlu0 %v2565_v31, %s2278_s28  ;;  %646 = vrot.lane.b32.xlu1 %v2565_v31, %s2279_s30  ;;  %v642_v34 = vpack.c.bf16 %v641_v33, %v641_v33  ;;  %s914_s28 = sadd.s32 32767, %s913_s17  ;;  %s2631_s30 = sld [smem:[#allocation2 + $0x80]] }
 0x2a4   : > { %713 = vrot.lane.b32.xlu1 %v2565_v31, %s2280_s23  ;;  %s915_s23 = sadd.s32 %s914_s28, %s909_s21  ;;  %s2643_s21 = sld [smem:[#allocation2 + $0x81]] }
 0x2a6   : > { %p1027_p6 = scmp.ne.f32.partialorder %s2631_s30, %s2631_s30 }
 0x2a8   : > { %845 = vrot.lane.b32.xlu1 %v2565_v31, %s2281_s26  ;;  %s928_s26 = sshrl.u32 %s2629_s25, 16 }
 0x2aa   : > { %p1043_p10 = scmp.ne.f32.partialorder %s2643_s21, %s2643_s21 }
 0x2ac   : > { %711 = vrot.lane.b32.xlu1 %v642_v34, %s2282_s16  ;;  %s2634_s16 = sld [smem:[#allocation2 + $0x3]] }
 0x2b0   : > { %777 = vrot.lane.b32.xlu1 %v642_v34, %s2283_s14  ;;  %s945_s14 = sshrl.u32 %s1838_s19, 16 }
 0x2b2   : > { %s962_s17 = sshrl.u32 %s2634_s16, 16  ;;  %p961_p8 = scmp.ne.f32.partialorder %s2634_s16, %s2634_s16 }
 0x2b3   : > { %s963_s2 = sand.u32 1, %s962_s17 }
 0x2b4   : > { %843 = vrot.lane.b32.xlu1 %v642_v34, %s2284_s15  ;;  %s916_s15 = sand.u32 4294901760, %s915_s23 }
 0x2b5   : > { %s3070_s15 = smov (%p911_p3, %s916_s15), 2143289344  ;;  %p1257_p3 = scmp.ne.f32.partialorder %s2672_s3, %s2672_s3 }
 0x312   : > { %v780_v35 = vpop.permute.xlu0 %779  ;;  %v647_v36 = vpop.permute.xlu1 %646 }
 0x313   : > { %v653_v37 = vsel %vm648_vm4, %v647_v36, 0  ;;  %v785_v38 = vsel %vm648_vm4, %v780_v35, 0 }
 0x314   : > { %1917 = vmatpush3.bf16.xpose.msra.mxu0 %v653_v37  ;;  %1929 = vmatpush3.bf16.xpose.msra.mxu1 %v785_v38 }
 0x315   : > { %1922 = vmatprep.subr.bf16.mxu0 %v2276_v8  ;;  %1940 = vmatprep.subr.bf16.mxu1 %v2276_v8 }
 0x316   : > { %v714_v39 = vpop.permute.xlu1 %713 }
 0x317   : > { %v719_v41 = vsel %vm648_vm4, %v714_v39, 0 }
 0x31a   : > { %v846_v40 = vpop.permute.xlu1 %845 }
 0x31b   : > { %1919 = vmatmul.mubr.msk.bf16.vlgmr.msra.gmra.mrb[4].mxu0 %vm648_vm4, %v642_v34  ;;  %v851_v44 = vsel %vm648_vm4, %v846_v40, 0 }
 0x31c   : > { %1923 = vmatpush3.bf16.xpose.msra.mxu0 %v719_v41  ;;  %1924 = vmatprep.mubr.msk.bf16.mxu0 %vm2277_vm1, %v2276_v8 }
 0x31d   : > { %1934 = vmatprep.subr.bf16.mxu0 %v2276_v8 }
 0x31e   : > { %v712_v42 = vpop.permute.xlu1 %711 }
 0x322   : > { %v778_v43 = vpop.permute.xlu1 %777 }
 0x323   : > { %1925 = vmatmul.mubr.msk.bf16.vlgmr.msra.gmra.mrb[8].mxu0 %vm648_vm4, %v712_v42  ;;  %1931 = vmatmul.mubr.msk.bf16.vlgmr.msra.gmra.mrb[0].mxu1 %vm648_vm4, %v778_v43  ;;  %v708_v42 = vld [vmem:[#allocation6] sm:$0xf] }
 0x324   : > { %1935 = vmatpush3.bf16.xpose.msra.mxu0 %v851_v44  ;;  %1936 = vmatprep.mubr.msk.bf16.mxu0 %vm2277_vm1, %v2276_v8 }
 0x325   : > { %1946 = vmatprep.subr.bf16.mxu0 %v2276_v8  ;;  %1942 = vmatprep.mubr.msk.bf16.mxu1 %vm2277_vm1, %v2276_v8 }
 0x326   : > { %v844_v45 = vpop.permute.xlu1 %843 }
 0x32b   : > { %1937 = vmatmul.mubr.msk.bf16.vlgmr.msra.gmra.mrb[12].mxu0 %vm648_vm4, %v844_v45  ;;  %v775_v45 = vld [vmem:[#allocation6 + $0x4] sm:$0xf] }
 0x32c   : > { %1948 = vmatprep.mubr.msk.bf16.mxu0 %vm2277_vm1, %v2276_v8 }
 0x3ee   : > { %v689_v46 = vpop.f32.mrb[4].mxu0 }
 0x3ef   : > { %v695_v47 = vsel %vm644_vm5, %v689_v46, -inf  ;;  %v1920_v48 = vpop.f32.mrb[5].mxu0 }
 0x3f0   : > { %v692_v49 = vpop.f32.mrb[6].mxu0  ;;  %v696_v50 = vsel %vm648_vm4, %v695_v47, -inf }
 0x3f1   : > { %697 = vmax.xlane.f32.xlu1 %v696_v50  ;;  %v1921_v51 = vpop.f32.mrb[7].mxu0 }
 0x3f2   : > { %v841_v51 = vld [vmem:[#allocation6 + $0x8] sm:$0xf] }
 0x3f6   : > { %v755_v52 = vpop.f32.mrb[8].mxu0  ;;  %v821_v53 = vpop.f32.mrb[0].mxu1 }
 0x3f7   : > { %v761_v54 = vsel %vm644_vm5, %v755_v52, -inf  ;;  %v827_v55 = vsel %vm644_vm5, %v821_v53, -inf  ;;  %v1926_v56 = vpop.f32.mrb[9].mxu0  ;;  %v1932_v57 = vpop.f32.mrb[1].mxu1 }
 0x3f8   : > { %v758_v58 = vpop.f32.mrb[10].mxu0  ;;  %v824_v59 = vpop.f32.mrb[2].mxu1  ;;  %v828_v60 = vsel %vm648_vm4, %v827_v55, -inf  ;;  %v762_v61 = vsel %vm648_vm4, %v761_v54, -inf }
 0x3f9   : > { %v1933_v62 = vpop.f32.mrb[3].mxu1  ;;  %829 = vmax.xlane.f32.xlu1 %v828_v60  ;;  %763 = vmax.xlane.f32.xlu0 %v762_v61  ;;  %v1927_v63 = vpop.f32.mrb[11].mxu0 }
 0x3fa   : > { %v907_v63 = vld [vmem:[#allocation6 + $0xc] sm:$0xf] }
 0x3fe   : > { %v887_v1 = vpop.f32.mrb[12].mxu0 }
 0x3ff   : > { %v893_v2 = vsel %vm644_vm5, %v887_v1, -inf  ;;  %v1938_v3 = vpop.f32.mrb[13].mxu0 }
 0x400   : > { %v890_v4 = vpop.f32.mrb[14].mxu0  ;;  %v894_v5 = vsel %vm648_vm4, %v893_v2, -inf }
 0x401   : > { %895 = vmax.xlane.f32.xlu0 %v894_v5  ;;  %v1939_v6 = vpop.f32.mrb[15].mxu0 }
 0x47e   : > { %v698_v7 = vpop.xlane.xlu1 %697 }
 0x47f   : > { %v699_v9 = vsub.f32 %v695_v47, %v698_v7 }
 0x481   : > { %v700_v10 = vmul.f32 1.442695, %v699_v9 }
 0x483   : > { %2096 = vpow2.f32 %v700_v10 }
 0x486   : > { %v830_v11 = vpop.xlane.xlu1 %829  ;;  %v764_v12 = vpop.xlane.xlu0 %763 }
 0x487   : > { %v831_v13 = vsub.f32 %v827_v55, %v830_v11  ;;  %v765_v14 = vsub.f32 %v761_v54, %v764_v12 }
 0x489   : > { %v832_v15 = vmul.f32 1.442695, %v831_v13  ;;  %v766_v16 = vmul.f32 1.442695, %v765_v14 }
 0x48b   : > { %2098 = vpow2.f32 %v832_v15 }
 0x48c   : > { %2100 = vpow2.f32 %v766_v16 }
 0x48d   : > { %v2609_v17 = vpop.eup %2096 }
 0x48e   : > { %v896_v19 = vpop.xlane.xlu0 %895  ;;  %v702_v20 = vsel %vm648_vm4, %v2609_v17, 0.0 }
 0x48f   : > { %v897_v21 = vsub.f32 %v893_v2, %v896_v19  ;;  %703 = vadd.xlane.f32.xlu1 %v702_v20 }
 0x491   : > { %v898_v22 = vmul.f32 1.442695, %v897_v21 }
 0x493   : > { %2102 = vpow2.f32 %v898_v22 }
 0x495   : > { %v2613_v23 = vpop.eup %2098 }
 0x496   : > { %v2615_v24 = vpop.eup %2100  ;;  %v834_v25 = vsel %vm648_vm4, %v2613_v23, 0.0 }
 0x497   : > { %835 = vadd.xlane.f32.xlu1 %v834_v25  ;;  %v768_v26 = vsel %vm648_vm4, %v2615_v24, 0.0 }
 0x498   : > { %769 = vadd.xlane.f32.xlu0 %v768_v26 }
 0x49d   : > { %v2621_v27 = vpop.eup %2102 }
 0x49e   : > { %v900_v28 = vsel %vm648_vm4, %v2621_v27, 0.0 }
 0x49f   : > { %901 = vadd.xlane.f32.xlu0 %v900_v28 }
 0x4a8   : > { %976 = vrot.lane.b32.xlu1 %v2565_v31, %s2285_s20  ;;  %s929_s20 = sand.u32 1, %s928_s26 }
 0x4ac   : > { %1207 = vrot.lane.b32.xlu1 %v2565_v31, %s2286_s18  ;;  %s946_s18 = sand.u32 1, %s945_s14  ;;  %s964_s14 = sadd.s32 32767, %s963_s2 }
 0x4ad   : > { %s947_s24 = sadd.s32 32767, %s946_s18  ;;  %s965_s18 = sadd.s32 %s2634_s16, %s964_s14 }
 0x4ae   : > { %s948_s1 = sadd.s32 %s1838_s19, %s947_s24  ;;  %s2667_s14 = sld [smem:[#allocation2 + $0x100]] }
 0x4af   : > { %s949_s26 = sand.u32 4294901760, %s948_s1  ;;  %s966_s1 = sand.u32 4294901760, %s965_s18 }
 0x4b0   : > { %1322 = vrot.lane.b32.xlu1 %v2565_v31, %s2287_s27  ;;  %s930_s27 = sadd.s32 32767, %s929_s20  ;;  %s3074_s26 = smov (%p944_p7, %s949_s26), 2143289344 }
 0x4b1   : > { %s931_s0 = sadd.s32 %s2629_s25, %s930_s27  ;;  %s2653_s25 = sld [smem:[#allocation2 + $0x82]] }
 0x4b2   : > { %s932_s23 = sand.u32 4294901760, %s931_s0  ;;  %s2656_s0 = sld [smem:[#allocation2 + $0x83]] }
 0x4b3   : > { %s3072_s23 = smov (%p927_p4, %s932_s23), 2143289344  ;;  %s3076_s1 = smov (%p961_p8, %s966_s1), 2143289344 }
 0x4b4   : > { %p1142_p13 = scmp.ne.f32.partialorder %s2667_s14, %s2667_s14 }
 0x4b5   : > { %1092 = vrot.lane.b32.xlu0 %v2565_v31, %s2288_s29  ;;  %s1028_s29 = sshrl.u32 %s2631_s30, 16 }
 0x4b6   : > { %s1029_s28 = sand.u32 1, %s1028_s29  ;;  %s1044_s29 = sshrl.u32 %s2643_s21, 16 }
 0x4b7   : > { %s1030_s20 = sadd.s32 32767, %s1029_s28  ;;  %s1045_s19 = sand.u32 1, %s1044_s29 }
 0x4b8   : > { %s1031_s27 = sadd.s32 %s2631_s30, %s1030_s20  ;;  %s1046_s24 = sadd.s32 32767, %s1045_s19 }
 0x4b9   : > { %s1032_s2 = sand.u32 4294901760, %s1031_s27  ;;  %s1061_s16 = sshrl.u32 %s2653_s25, 16 }
 0x4ba   : > { %s3078_s2 = smov (%p1027_p6, %s1032_s2), 2143289344  ;;  %s1078_s17 = sshrl.u32 %s2656_s0, 16 }
 0x4bb   : > { %s1047_s28 = sadd.s32 %s2643_s21, %s1046_s24  ;;  %s919_s20 = sshrl.u32 %s3070_s15, 16 }
 0x4bc   : > { %s1062_s18 = sand.u32 1, %s1061_s16  ;;  %s1079_s30 = sand.u32 1, %s1078_s17 }
 0x4bd   : > { %s1048_s27 = sand.u32 4294901760, %s1047_s28  ;;  %s1063_s29 = sadd.s32 32767, %s1062_s18 }
 0x4be   : > { %s920_s19 = sshll.u32 %s919_s20, 16  ;;  %s1080_s4 = sadd.s32 32767, %s1079_s30 }
 0x4bf   : > { %s3080_s27 = smov (%p1043_p10, %s1048_s27), 2143289344  ;;  %p1060_p11 = scmp.ne.f32.partialorder %s2653_s25, %s2653_s25 }
 0x4c0   : > { %s1064_s24 = sadd.s32 %s2653_s25, %s1063_s29  ;;  %s1081_s5 = sadd.s32 %s2656_s0, %s1080_s4 }
 0x4c1   : > { %s2680_s15 = sld [smem:[#allocation2 + $0x101]]  ;;  %s1143_s16 = sshrl.u32 %s2667_s14, 16 }
 0x4c2   : > { %s2683_s21 = sld [smem:[#allocation2 + $0x102]]  ;;  %s1065_s17 = sand.u32 4294901760, %s1064_s24 }
 0x4c3   : > { %p1077_p0 = scmp.ne.f32.partialorder %s2656_s0, %s2656_s0  ;;  %s935_s28 = sshrl.u32 %s3072_s23, 16 }
 0x4c4   : > { %s1082_s18 = sand.u32 4294901760, %s1081_s5  ;;  %s952_s30 = sshrl.u32 %s3074_s26, 16 }
 0x4c5   : > { %s1144_s6 = sand.u32 1, %s1143_s16  ;;  %s3082_s17 = smov (%p1060_p11, %s1065_s17), 2143289344 }
 0x4c6   : > { %s3084_s18 = smov (%p1077_p0, %s1082_s18), 2143289344  ;;  %s2693_s4 = sor.u32 %s920_s19, %s919_s20 }
 0x4c7   : > { %s1145_s25 = sadd.s32 32767, %s1144_s6  ;;  %s936_s29 = sshll.u32 %s935_s28, 16  ;;  %v922_v53 = vstv %s2693_s4 }
 0x4c8   : > { %s1159_s7 = sshrl.u32 %s2680_s15, 16  ;;  %s953_s22 = sshll.u32 %s952_s30, 16 }
 0x4c9   : > { %s1176_s24 = sshrl.u32 %s2683_s21, 16  ;;  %s969_s0 = sshrl.u32 %s3076_s1, 16 }
 0x4ca   : > { %s1146_s23 = sadd.s32 %s2667_s14, %s1145_s25  ;;  %s1160_s5 = sand.u32 1, %s1159_s7 }
 0x4cb   : > { %s2699_s26 = sld [smem:[#allocation2 + $0x103]]  ;;  %s1177_s20 = sand.u32 1, %s1176_s24 }
 0x4cc   : > { %s2703_s19 = sor.u32 %s936_s29, %s935_s28  ;;  %s1147_s6 = sand.u32 4294901760, %s1146_s23 }
 0x4cd   : > { %s2705_s16 = sor.u32 %s953_s22, %s952_s30  ;;  %s1161_s12 = sadd.s32 32767, %s1160_s5  ;;  %v938_v49 = vstv %s2703_s19 }
 0x4ce   : > { %s970_s13 = sshll.u32 %s969_s0, 16  ;;  %s1178_s10 = sadd.s32 32767, %s1177_s20  ;;  %v955_v1 = vstv %s2705_s16 }
 0x4cf   : > { %s3086_s6 = smov (%p1142_p13, %s1147_s6), 2143289344  ;;  %s1035_s1 = sshrl.u32 %s3078_s2, 16 }
 0x4d0   : > { %s1162_s7 = sadd.s32 %s2680_s15, %s1161_s12  ;;  %s1179_s25 = sadd.s32 %s2683_s21, %s1178_s10 }
 0x4d1   : > { %p1158_p1 = scmp.ne.f32.partialorder %s2680_s15, %s2680_s15  ;;  %s1193_s14 = sshrl.u32 %s2699_s26, 16 }
 0x4d2   : > { %s1163_s28 = sand.u32 4294901760, %s1162_s7  ;;  %p1175_p2 = scmp.ne.f32.partialorder %s2683_s21, %s2683_s21 }
 0x4d3   : > { %s2719_s22 = sor.u32 %s970_s13, %s969_s0  ;;  %s1180_s30 = sand.u32 4294901760, %s1179_s25 }
 0x4d4   : > { %s1051_s29 = sshrl.u32 %s3080_s27, 16  ;;  %s1194_s2 = sand.u32 1, %s1193_s14  ;;  %v972_v9 = vstv %s2719_s22 }
 0x4d5   : > { %s3088_s28 = smov (%p1158_p1, %s1163_s28), 2143289344  ;;  %s3090_s30 = smov (%p1175_p2, %s1180_s30), 2143289344 }
 0x4d6   : > { %s1036_s10 = sshll.u32 %s1035_s1, 16  ;;  %s1195_s12 = sadd.s32 32767, %s1194_s2 }
 0x4d7   : > { %s1052_s24 = sshll.u32 %s1051_s29, 16  ;;  %s1274_s15 = sshrl.u32 %s2712_s9, 16 }
 0x4d8   : > { %s1068_s23 = sshrl.u32 %s3082_s17, 16  ;;  %s1258_s5 = sshrl.u32 %s2672_s3, 16 }
 0x4d9   : > { %s1196_s13 = sadd.s32 %s2699_s26, %s1195_s12  ;;  %s2730_s21 = sld [smem:[#allocation2 + $0x182]] }
 0x4da   : > { %s1275_s27 = sand.u32 1, %s1274_s15  ;;  %s2732_s0 = sld [smem:[#allocation2 + $0x183]] }
 0x4db   : > { %p1192_p12 = scmp.ne.f32.partialorder %s2699_s26, %s2699_s26  ;;  %s1259_s20 = sand.u32 1, %s1258_s5 }
 0x4dc   : > { %s2736_s7 = sor.u32 %s1036_s10, %s1035_s1  ;;  %s1197_s25 = sand.u32 4294901760, %s1196_s13 }
 0x4dd   : > { %s2738_s14 = sor.u32 %s1052_s24, %s1051_s29  ;;  %s1276_s2 = sadd.s32 32767, %s1275_s27  ;;  %v1038_v54 = vstv %s2736_s7 }
 0x4de   : > { %s1069_s12 = sshll.u32 %s1068_s23, 16  ;;  %s1260_s11 = sadd.s32 32767, %s1259_s20  ;;  %v1054_v50 = vstv %s2738_s14 }
 0x4df   : > { %s3092_s25 = smov (%p1192_p12, %s1197_s25), 2143289344  ;;  %s1085_s15 = sshrl.u32 %s3084_s18, 16 }
 0x4e0   : > { %s1277_s8 = sadd.s32 %s2712_s9, %s1276_s2  ;;  %s1261_s26 = sadd.s32 %s2672_s3, %s1260_s11 }
 0x4e1   : > { %s1291_s5 = sshrl.u32 %s2730_s21, 16  ;;  %s1308_s1 = sshrl.u32 %s2732_s0, 16 }
 0x4e2   : > { %s1086_s29 = sshll.u32 %s1085_s15, 16  ;;  %s1278_s10 = sand.u32 4294901760, %s1277_s8 }
 0x4e3   : > { %s1292_s24 = sand.u32 1, %s1291_s5  ;;  %s1262_s18 = sand.u32 4294901760, %s1261_s26 }
 0x4e4   : > { %s1309_s11 = sand.u32 1, %s1308_s1  ;;  %s3094_s10 = smov (%p1273_p9, %s1278_s10), 2143289344 }
 0x4e5   : > { %s2758_s8 = sor.u32 %s1069_s12, %s1068_s23  ;;  %s1293_s9 = sadd.s32 32767, %s1292_s24 }
 0x4e6   : > { %s2761_s13 = sor.u32 %s1086_s29, %s1085_s15  ;;  %s1310_s27 = sadd.s32 32767, %s1309_s11  ;;  %v1071_v2 = vstv %s2758_s8 }
 0x4e7   : > { %s3096_s18 = smov (%p1257_p3, %s1262_s18), 2143289344  ;;  %s1150_s20 = sshrl.u32 %s3086_s6, 16  ;;  %v1088_v10 = vstv %s2761_s13 }
 0x4e8   : > { %s1294_s17 = sadd.s32 %s2730_s21, %s1293_s9  ;;  %s1166_s2 = sshrl.u32 %s3088_s28, 16 }
 0x4e9   : > { %s1311_s23 = sadd.s32 %s2732_s0, %s1310_s27  ;;  %s1281_s12 = sshrl.u32 %s3094_s10, 16 }
 0x4ea   : > { %p1290_p4 = scmp.ne.f32.partialorder %s2730_s21, %s2730_s21  ;;  %s1295_s3 = sand.u32 4294901760, %s1294_s17 }
 0x4eb   : > { %p1307_p7 = scmp.ne.f32.partialorder %s2732_s0, %s2732_s0  ;;  %s1167_s15 = sshll.u32 %s1166_s2, 16 }
 0x4ec   : > { %s1312_s26 = sand.u32 4294901760, %s1311_s23  ;;  %s1265_s5 = sshrl.u32 %s3096_s18, 16 }
 0x4ed   : > { %s1282_s1 = sshll.u32 %s1281_s12, 16  ;;  %s3098_s3 = smov (%p1290_p4, %s1295_s3), 2143289344 }
 0x4ee   : > { %s3100_s26 = smov (%p1307_p7, %s1312_s26), 2143289344  ;;  %s1151_s29 = sshll.u32 %s1150_s20, 16 }
 0x4ef   : > { %s2805_s21 = sor.u32 %s1167_s15, %s1166_s2  ;;  %s1183_s24 = sshrl.u32 %s3090_s30, 16 }
 0x4f0   : > { %s1200_s11 = sshrl.u32 %s3092_s25, 16  ;;  %s1266_s19 = sshll.u32 %s1265_s5, 16  ;;  %v1169_v3 = vstv %s2805_s21 }
 0x4f1   : > { %s2813_s4 = sor.u32 %s1282_s1, %s1281_s12  ;;  %s1298_s28 = sshrl.u32 %s3098_s3, 16 }
 0x4f2   : > { %s1315_s0 = sshrl.u32 %s3100_s26, 16  ;;  %s2822_s7 = sor.u32 %s1151_s29, %s1150_s20  ;;  %v1284_v7 = vstv %s2813_s4 }
 0x4f3   : > { %s1184_s14 = sshll.u32 %s1183_s24, 16  ;;  %s1201_s10 = sshll.u32 %s1200_s11, 16  ;;  %v1153_v14 = vstv %s2822_s7 }
 0x4f4   : > { %s1267_s9 = sor.u32 %s1266_s19, %s1265_s5  ;;  %s1299_s6 = sshll.u32 %s1298_s28, 16 }
 0x4f5   : > { %s1316_s16 = sshll.u32 %s1315_s0, 16  ;;  %s1185_s8 = sor.u32 %s1184_s14, %s1183_s24  ;;  %v1268_v16 = vstv %s1267_s9 }
 0x4f6   : > { %s1202_s27 = sor.u32 %s1201_s10, %s1200_s11  ;;  %s1300_s22 = sor.u32 %s1299_s6, %s1298_s28 }
 0x4f7   : > { %s1317_s18 = sor.u32 %s1316_s16, %s1315_s0  ;;  %s2289_s30 = smov 8  }
 0x4f8   : > { %s2290_s25 = smov 16   ;;  %s2291_s13 = smov 24  }
 0x4f9   : > { %s3050_s2 = sld [smem:[#allocation31_spill]]  ;;  %s3051_s3 = sld [smem:[#allocation34_spill]] }
 0x4fa   : > { %s3052_s19 = sld [smem:[#allocation32_spill]]  ;;  %s3053_s0 = sld [smem:[#allocation33_spill]] }
 0x4fb   : > { %s3054_s10 = sld [smem:[#allocation36_spill]]  ;;  %s3055_s20 = sld [smem:[#allocation35_spill]] }
 0x4fc   : > { %s3056_s23 = sld [smem:[#allocation15_spill]]  ;;  %s3057_s12 = sld [smem:[#allocation18_spill]] }
 0x4fd   : > { %s2293_s15 = smov 32   ;;  %s3058_s21 = sld [smem:[#allocation37_spill]] }
 0x4fe   : > { %s3060_s7 = sld [smem:[#allocation38_spill]]  ;;  %s2294_s16 = smov [#allocation9]  }
 0x502   : > { %s525_s26 = sand.u32 1, %s3056_s23   ;;  %s1876_s11 = sshll.u32 %s3057_s12, 7 }
 0x503   : > { %s1825_s5 = sshll.u32 %s525_s26, 3  ;;  %s1709_s9 = scalar_lea.sflag [#allocation4], %s525_s26 }
 0x504   : > { %s2933_s14 = scalar_lea.hbm %s3060_s7, %s1876_s11 }
 0x51c   : > { %v704_v29 = vpop.xlane.xlu1 %703 }
 0x51d   : > { %2104 = vrcp.f32 %v704_v29  ;;  %v1203_v29 = vstv %s1202_s27 }
 0x524   : > { %v836_v30 = vpop.xlane.xlu1 %835 }
 0x525   : > { %2106 = vrcp.f32 %v836_v30  ;;  %v770_v31 = vpop.xlane.xlu0 %769  ;;  %v1301_v30 = vstv %s1300_s22 }
 0x526   : > { %2108 = vrcp.f32 %v770_v31  ;;  %v1318_v31 = vstv %s1317_s18 }
 0x527   : > { %v2105_v33 = vpop.eup %2104 }
 0x528   : > { %v977_v32 = vpop.permute.xlu1 %976  ;;  %v706_v35 = vmul.f32 %v2105_v33, %v2609_v17 }
 0x529   : > { %v983_v34 = vsel %vm981_vm6, %v977_v32, 0 }
 0x52a   : > { %1941 = vmatpush3.bf16.msra.mxu1 %v983_v34  ;;  %v707_v39 = vpack.c.bf16 %v706_v35, %v706_v35 }
 0x52b   : > { %1952 = vmatprep.subr.bf16.mxu1 %v2276_v8 }
 0x52c   : > { %v902_v36 = vpop.xlane.xlu0 %901  ;;  %v709_v47 = vmul.bf16 %v708_v42, %v707_v39  ;;  %v1208_v62 = vpop.permute.xlu1 %1207 }
 0x52d   : > { %2110 = vrcp.f32 %v902_v36  ;;  %v1213_v32 = vsel %vm981_vm6, %v1208_v62, 0 }
 0x52e   : > { %v924_v60 = vmul.bf16 %v922_v53, %v709_v47  ;;  %v1040_v61 = vmul.bf16 %v1038_v54, %v709_v47  ;;  %v1270_v28 = vmul.bf16 %v1268_v16, %v709_v47 }
 0x52f   : > { %v2107_v37 = vpop.eup %2106 }
 0x530   : > { %v2109_v38 = vpop.eup %2108  ;;  %v838_v40 = vmul.f32 %v2107_v37, %v2613_v23  ;;  %v1093_v41 = vpop.permute.xlu0 %1092 }
 0x531   : > { %v772_v43 = vmul.f32 %v2109_v38, %v2615_v24  ;;  %v1098_v44 = vsel %vm981_vm6, %v1093_v41, 0  ;;  %v1323_v23 = vpop.permute.xlu1 %1322  ;;  %v1186_v24 = vstv %s1185_s8  ;;  %s2199_s8 = sshll.u32 %s2294_s16, 4  ;;  %s2200_s8 = int_to_ptr.vmem [resolvable:$false] %s2199_s8 }
 0x532   : > { %1947 = vmatpush3.bf16.msra.mxu0 %v1098_v44  ;;  %v839_v48 = vpack.c.bf16 %v838_v40, %v838_v40  ;;  %v1328_v33 = vsel %vm981_vm6, %v1323_v23, 0  ;;  %v2080_v44 = vld [vmem:[#allocation7] sm:$0xff]   ;;  %s2201_s27 = scalar_lea.vmem %s2200_s8, 256 }
 0x533   : > { %v773_v46 = vpack.c.bf16 %v772_v43, %v772_v43  ;;  %1958 = vmatprep.subr.bf16.mxu0 %v2276_v8  ;;  %v2085_v23 = vld [vmem:[%s3051_s3 + $0x10] ss:$8 sps:$4 sm:$0xff]  }
 0x534   : > { %v842_v58 = vmul.bf16 %v841_v51, %v839_v48 }
 0x535   : > { %v776_v52 = vmul.bf16 %v775_v45, %v773_v46  ;;  %v2081_v45 = vld [vmem:[#allocation7 + $0x8] sm:$0xff]  }
 0x536   : > { %v957_v12 = vmul.bf16 %v955_v1, %v842_v58  ;;  %v1073_v13 = vmul.bf16 %v1071_v2, %v842_v58  ;;  %v1188_v36 = vmul.bf16 %v1186_v24, %v842_v58  ;;  %v1303_v38 = vmul.bf16 %v1301_v30, %v842_v58 }
 0x537   : > { %v2111_v55 = vpop.eup %2110  ;;  %v940_v56 = vmul.bf16 %v938_v49, %v776_v52  ;;  %v1056_v57 = vmul.bf16 %v1054_v50, %v776_v52  ;;  %v1171_v15 = vmul.bf16 %v1169_v3, %v776_v52  ;;  %v1286_v17 = vmul.bf16 %v1284_v7, %v776_v52 }
 0x538   : > { %v904_v59 = vmul.f32 %v2111_v55, %v2621_v27  ;;  %v1155_v27 = vmul.bf16 %v1153_v14, %v709_v47  ;;  %v2292_v24 = vmov 0  }
 0x539   : > { %v941_v5 = vadd.bf16 %v940_v56, %v924_v60  ;;  %v1057_v6 = vadd.bf16 %v1056_v57, %v1040_v61  ;;  %v1287_v35 = vadd.bf16 %v1286_v17, %v1270_v28 }
 0x53a   : > { %v905_v4 = vpack.c.bf16 %v904_v59, %v904_v59  ;;  %v1172_v34 = vadd.bf16 %v1171_v15, %v1155_v27 }
 0x53b   : > { %v958_v19 = vadd.bf16 %v957_v12, %v941_v5  ;;  %v1074_v21 = vadd.bf16 %v1073_v13, %v1057_v6  ;;  %v1304_v41 = vadd.bf16 %v1303_v38, %v1287_v35  ;;  %v1856_v6 = vld [vmem:[%s3050_s2] ss:$0 sm:$0xff]  ;;  %v2091_v38 = vld [vmem:[%s3054_s10 + $0x18] sm:$0xff]  }
 0x53c   : > { %v908_v11 = vmul.bf16 %v907_v63, %v905_v4  ;;  %v1189_v40 = vadd.bf16 %v1188_v36, %v1172_v34  ;;  %v2088_v35 = vld [vmem:[%s3054_s10] sm:$0xff]   ;;  %v2089_v36 = vld [vmem:[%s3054_s10 + $0x8] sm:$0xff]  }
 0x53e   : > { %v974_v20 = vmul.bf16 %v972_v9, %v908_v11  ;;  %v1090_v22 = vmul.bf16 %v1088_v10, %v908_v11  ;;  %v1205_v37 = vmul.bf16 %v1203_v29, %v908_v11  ;;  %v1320_v39 = vmul.bf16 %v1318_v31, %v908_v11  ;;  %v1860_v29 = vld [vmem:[%s3052_s19] ss:$0 sm:$0xff]  ;;  %s527_s19 = scalar_lea.vmem [#allocation9], %s1825_s5 }
 0x53f   : > { %v1861_v31 = vld [vmem:[%s3053_s0] ss:$0 sm:$0xff]  ;;  %s1722_s4 = sshll.u32 %s527_s19, 4  ;;  %s2935_s4 = int_to_ptr.vmem [resolvable:$true] %s1722_s4 }
 0x540   : > { %v975_v25 = vadd.bf16 %v974_v20, %v958_v19  ;;  %v1091_v26 = vadd.bf16 %v1090_v22, %v1074_v21  ;;  %v1206_v42 = vadd.bf16 %v1205_v37, %v1189_v40  ;;  %v1321_v43 = vadd.bf16 %v1320_v39, %v1304_v41  ;;  %v2084_v21 = vld [vmem:[%s3051_s3 + $0x4] ss:$8 sps:$4 sm:$0xff]   ;;  %v2087_v22 = vld [vmem:[%s3051_s3 + $0x14] ss:$8 sps:$4 sm:$0xff]   ;;  %v1489_v41 = vld [vmem:[%s3055_s20] sm:$0x3]  ;;  %p2202_p11 = scmp.lt.s32.totalorder %s2935_s4, %s2200_s8 }
 0x541   : > { %v2090_v37 = vld [vmem:[%s3054_s10 + $0x10] sm:$0xff]   ;;  %v2092_v39 = vld [vmem:[%s3054_s10 + $0x20] sm:$0xff]   ;;  %v1493_v40 = vsub.s32 0, %v2553_v18  ;;  %s2195_s6 = scalar_lea.vmem %s2935_s4, 128 }
 0x542   : > { %1943 = vmatmul.mubr.msk.bf16.vlgmr.msra.gmra.mrb[4].mxu1 %vm648_vm4, %v975_v25  ;;  %1949 = vmatmul.mubr.msk.bf16.vlgmr.msra.gmra.mrb[16].mxu0 %vm648_vm4, %v1091_v26  ;;  %p2196_p8 = scmp.ne.s32.totalorder %s2935_s4, %s2195_s6  ;;  %p2203_p0 = scmp.lt.s32.totalorder %s2201_s27, %s2195_s6 }
 0x543   : > { %1953 = vmatpush3.bf16.msra.mxu1 %v1213_v32  ;;  %1959 = vmatpush3.bf16.msra.mxu0 %v1328_v33 }
 0x544   : > { %1954 = vmatprep.mubr.msk.bf16.mxu1 %vm2277_vm1, %v2276_v8  ;;  %1960 = vmatprep.mubr.msk.bf16.mxu0 %vm2277_vm1, %v2276_v8  ;;  %p2197_p6 = pnand %p2196_p8, %p2413_p5  ;;  %p2204_p13 = por %p2203_p0, %p2202_p11 }
 0x545   : > { %1964 = vmatprep.subr.bf16.mxu1 %v2276_v8  ;;  %1524 = vmatprep.subr.bf16.mxu0 %v2084_v21 }
 0x546   : > { %p2198_p10 = pneg %p2197_p6 }
 0x548   : > { %p2205_p1 = pnand %p2204_p13, %p2198_p10 }
 0x54a   : > { %1955 = vmatmul.mubr.msk.bf16.vlgmr.msra.gmra.mrb[8].mxu1 %vm648_vm4, %v1206_v42  ;;  %1961 = vmatmul.mubr.msk.bf16.vlgmr.msra.gmra.mrb[20].mxu0 %vm648_vm4, %v1321_v43  ;;  %v1497_v42 = vsub.s32 1, %v2553_v18  ;;  %v1494_v43 = vrot.slane %v1489_v41, %v1493_v40 }
 0x54b   : > { %1968 = vmatprep.mubr.msk.bf16.mxu1 %vm2277_vm1, %v2276_v8  ;;  %1965 = vmatpush3.bf16.msra.mxu1 %v2080_v44 }
 0x54c   : > { %1966 = vmatprep.subr.bf16.mxu1 %v2276_v8  ;;  %1556 = vmatprep.mubr.bf16.mxu0 %v2292_v24  ;;  %v1498_v44 = vrot.slane %v1489_v41, %v1497_v42 }
 0x54f   : > { %1967 = vmatpush3.bf16.msra.mxu1 %v2081_v45 }
 0x550   : > { %1972 = vmatprep.subr.bf16.mxu1 %v2276_v8 }
 0x615   : > { %v1019_v46 = vpop.f32.mrb[4].mxu1  ;;  %v1134_v47 = vpop.f32.mrb[16].mxu0 }
 0x616   : > { %v1944_v48 = vpop.f32.mrb[5].mxu1  ;;  %1371 = vrot.lane.b32.xlu0 %v1134_v47, %s2289_s30  ;;  %v1950_v49 = vpop.f32.mrb[17].mxu0 }
 0x617   : > { %v1022_v50 = vpop.f32.mrb[6].mxu1  ;;  %v1137_v51 = vpop.f32.mrb[18].mxu0 }
 0x618   : > { %v1945_v52 = vpop.f32.mrb[7].mxu1  ;;  %v1951_v53 = vpop.f32.mrb[19].mxu0 }
 0x61d   : > { %v1249_v54 = vpop.f32.mrb[8].mxu1  ;;  %v1364_v55 = vpop.f32.mrb[20].mxu0 }
 0x61e   : > { %1375 = vrot.lane.b32.xlu1 %v1249_v54, %s2290_s25  ;;  %v1956_v56 = vpop.f32.mrb[9].mxu1  ;;  %1379 = vrot.lane.b32.xlu0 %v1364_v55, %s2291_s13  ;;  %v1962_v57 = vpop.f32.mrb[21].mxu0 }
 0x61f   : > { %v1252_v58 = vpop.f32.mrb[10].mxu1  ;;  %v1367_v59 = vpop.f32.mrb[22].mxu0 }
 0x620   : > { %v1957_v60 = vpop.f32.mrb[11].mxu1  ;;  %v1963_v61 = vpop.f32.mrb[23].mxu0 }
 0x688   : > { %v1372_v62 = vpop.permute.xlu0 %1371 }
 0x689   : > { %v1382_v63 = vsel %vm648_vm4, %v1019_v46, %v1372_v62 }
 0x690   : > { %v1376_v1 = vpop.permute.xlu1 %1375  ;;  %v1380_v2 = vpop.permute.xlu0 %1379 }
 0x691   : > { %v1384_v3 = vsel %vm1383_vm7, %v1382_v63, %v1376_v1 }
 0x692   : > { %v1386_v4 = vsel %vm1385_vm8, %v1384_v3, %v1380_v2 }
 0x693   : > { %v1387_v5 = vpack.c.bf16 %v1386_v4, %v1386_v4 }
 0x695   : > { %1969 = vmatmul.mubr.msk.bf16.vlgmr.msra.gmra.mrb[12].mxu1 %vm536_vm0, %v1387_v5 }
 0x696   : > { %1984 = vmatprep.mubr.msk.bf16.mxu1 %vm2277_vm1, %v2276_v8  ;;  %1973 = vmatpush3.bf16.msra.mxu1 %v2088_v35 }
 0x697   : > { %1974 = vmatprep.subr.bf16.mxu1 %v2276_v8 }
 0x69a   : > { %1975 = vmatpush3.bf16.msra.mxu1 %v2089_v36 }
 0x69b   : > { %1976 = vmatprep.subr.bf16.mxu1 %v2276_v8 }
 0x69e   : > { %1977 = vmatpush3.bf16.msra.mxu1 %v2090_v37 }
 0x69f   : > { %1978 = vmatprep.subr.bf16.mxu1 %v2276_v8 }
 0x6a2   : > { %1979 = vmatpush3.bf16.msra.mxu1 %v2091_v38 }
 0x6a3   : > { %1980 = vmatprep.subr.bf16.mxu1 %v2276_v8 }
 0x6a6   : > { %1981 = vmatpush3.bf16.msra.mxu1 %v2092_v39 }
 0x6a7   : > { %1982 = vmatprep.subr.bf16.mxu1 %v2276_v8 }
 0x768   : > { %v1448_v7 = vpop.f32.mrb[12].mxu1 }
 0x769   : > { %v1449_v9 = vadd.f32 %v1856_v6, %v1448_v7  ;;  %v1970_v10 = vpop.f32.mrb[13].mxu1 }
 0x76a   : > { %v1451_v11 = vpop.f32.mrb[14].mxu1 }
 0x76b   : > { %v2870_v12 = vadd.f32 %v1449_v9, %v2527_v0  ;;  %v1971_v13 = vpop.f32.mrb[15].mxu1  ;;  %v2082_v0 = vld [vmem:[%s3051_s3] ss:$8 sps:$4 sm:$0xff]  }
 0x76c   : > { %1525 = vmatpush1.bf16.msra.mxu0 %v2082_v0  ;;  %v2093_v11 = vld [vmem:[%s3054_s10 + $0x28] sm:$0xff]  }
 0x76d   : > { %v1457_v14 = vsel %vm536_vm0, %v2870_v12, 0.0  ;;  %1526 = vmatprep.subr.bf16.mxu0 %v2087_v22  ;;  %1983 = vmatpush3.bf16.msra.mxu1 %v2093_v11  ;;  %v1867_v22 = vld [vmem:[%s3058_s21] ss:$0 sm:$0xff] }
 0x76e   : > { %1458 = vadd.xlane.f32.xlu1 %v1457_v14 }
 0x770   : > { %1527 = vmatpush1.bf16.msra.mxu0 %v2085_v23 }
 0x7fb   : > { %v1459_v15 = vpop.xlane.xlu1 %1458 }
 0x7fc   : > { %v1460_v16 = vmul.f32 0.03125, %v1459_v15 }
 0x7fe   : > { %v1461_v17 = vsub.f32 %v2870_v12, %v1460_v16 }
 0x800   : > { %v1462_v19 = vmul.f32 %v1461_v17, %v1461_v17 }
 0x802   : > { %v1463_v20 = vsel %vm536_vm0, %v1462_v19, 0.0 }
 0x803   : > { %1464 = vadd.xlane.f32.xlu0 %v1463_v20 }
 0x890   : > { %v1465_v25 = vpop.xlane.xlu0 %1464 }
 0x891   : > { %v1466_v26 = vmul.f32 0.03125, %v1465_v25 }
 0x893   : > { %v1467_v27 = vadd.f32 1e-05, %v1466_v26 }
 0x895   : > { %2112 = vrsqrt.f32 %v1467_v27 }
 0x89f   : > { %v2113_v28 = vpop.eup %2112 }
 0x8a0   : > { %v1469_v30 = vmul.f32 %v2113_v28, %v1461_v17 }
 0x8a2   : > { %v1476_v32 = vmul.f32 %v1860_v29, %v1469_v30 }
 0x8a4   : > { %v1483_v33 = vadd.f32 %v1861_v31, %v1476_v32 }
 0x8a6   : > { %v1484_v34 = vpack.c.bf16 %v1483_v33, %v1483_v33 }
 0x8a8   : > { %1866 = vmatmul.mubr.msk.bf16.vlgmr.msra.gmra.mrb[24].mxu0 %vm536_vm0, %v1484_v34 }
 0x97b   : > { %v1558_v45 = vpop.f32.mrb[24].mxu0 }
 0x97c   : > { %v1559_v46 = vadd.f32 %v1558_v45, %v1494_v43  ;;  %v1560_v47 = vpop.f32.mrb[25].mxu0 }
 0x97d   : > { %v1561_v48 = vadd.f32 %v1560_v47, %v1498_v44  ;;  %v1562_v49 = vpop.f32.mrb[26].mxu0 }
 0x97e   : > { %v1567_v50 = vmin.f32 %v1559_v46, 20.0  ;;  %v1563_v51 = vpop.f32.mrb[27].mxu0  ;;  %vm1565_vm10 = vcmp.gt.f32.partialorder %v1559_v46, 20.0 }
 0x97f   : > { %v1568_v52 = vmin.f32 %v1561_v48, 20.0  ;;  %vm1566_vm12 = vcmp.gt.f32.partialorder %v1561_v48, 20.0 }
 0x980   : > { %v1569_v53 = vmul.f32 1.442695, %v1567_v50 }
 0x981   : > { %v1571_v8 = vmul.f32 1.442695, %v1568_v52 }
 0x982   : > { %2114 = vpow2.f32 %v1569_v53 }
 0x983   : > { %2116 = vpow2.f32 %v1571_v8 }
 0x98c   : > { %v2115_v54 = vpop.eup %2114 }
 0x98d   : > { %v2117_v55 = vpop.eup %2116  ;;  %v1573_v56 = vadd.f32 1.0, %v2115_v54  ;;  %v1576_v18 = vmul.f32 -0.5, %v2115_v54  ;;  %v1579_v60 = vand.u32 2147483647, %v2115_v54 }
 0x98e   : > { %v1582_v57 = vadd.f32 1.0, %v2117_v55  ;;  %v1585_v58 = vmul.f32 -0.5, %v2117_v55  ;;  %v1588_v62 = vand.u32 2147483647, %v2117_v55 }
 0x98f   : > { %2118 = vlog2.f32 %v1573_v56  ;;  %v1577_v59 = vadd.f32 1.0, %v1576_v18  ;;  %vm1580_vm9 = vcmp.lt.f32.partialorder %v1579_v60, 0.0004427343 }
 0x990   : > { %2120 = vlog2.f32 %v1582_v57  ;;  %v1586_v61 = vadd.f32 1.0, %v1585_v58  ;;  %vm1589_vm11 = vcmp.lt.f32.partialorder %v1588_v62, 0.0004427343 }
 0x991   : > { %v1578_v3 = vmul.f32 %v2115_v54, %v1577_v59 }
 0x992   : > { %v1587_v5 = vmul.f32 %v2117_v55, %v1586_v61 }
 0x999   : > { %v2119_v63 = vpop.eup %2118 }
 0x99a   : > { %v2121_v1 = vpop.eup %2120  ;;  %v1575_v2 = vmul.f32 0.6931472, %v2119_v63 }
 0x99b   : > { %v1584_v4 = vmul.f32 0.6931472, %v2121_v1 }
 0x99c   : > { %v1581_v6 = vsel %vm1580_vm9, %v1578_v3, %v1575_v2 }
 0x99d   : > { %v1591_v7 = vsel %vm1565_vm10, %v1559_v46, %v1581_v6  ;;  %v1590_v9 = vsel %vm1589_vm11, %v1587_v5, %v1584_v4 }
 0x99e   : > { %2122 = vtanh.f32 %v1591_v7  ;;  %v1592_v10 = vsel %vm1566_vm12, %v1561_v48, %v1590_v9 }
 0x99f   : > { %2124 = vtanh.f32 %v1592_v10 }
 0x9a8   : > { %v2123_v13 = vpop.eup %2122 }
 0x9a9   : > { %v2125_v14 = vpop.eup %2124  ;;  %v1595_v15 = vmul.f32 %v2123_v13, %v1559_v46 }
 0x9aa   : > { %v1596_v16 = vmul.f32 %v2125_v14, %v1561_v48 }
 0x9ab   : > { %1599 = vrot.lane.b32.xlu0 %v1595_v15, %s2293_s15 }
 0x9ac   : > { %1601 = vrot.lane.b32.xlu1 %v1596_v16, %s2293_s15 }
 0xa1d   : > { %v1600_v17 = vpop.permute.xlu0 %1599 }
 0xa1e   : > { %v1602_v19 = vpop.permute.xlu1 %1601 }
 0xa1f   : > { %v1603_v20 = vsel %vm536_vm0, %v1600_v17, %v1602_v19 }
 0xa20   : > { %v1605_v21 = vmul.f32 %v1603_v20, %v1559_v46 }
 0xa22   : > { %v1606_v0 = vpack.c.bf16 %v1605_v21, %v1605_v21 }
 0xa24   : > { %1985 = vmatmul.mubr.msk.bf16.vlgmr.msra.gmra.mrb[16].mxu1 %vm1662_vm13, %v1606_v0 }
 0xaf7   : > { %v1700_v23 = vpop.f32.mrb[16].mxu1 }
 0xaf8   : > { %v1701_v24 = vadd.f32 %v1867_v22, %v1700_v23  ;;  %v1986_v25 = vpop.f32.mrb[17].mxu1 }
 0xaf9   : > { %v1703_v26 = vpop.f32.mrb[18].mxu1 }
 0xafa   : > { %v1706_v27 = vadd.f32 %v1701_v24, %v2870_v12  ;;  %v1987_v28 = vpop.f32.mrb[19].mxu1 }
 0xafc   : > { %1707 = vst.msk [vmem:[%s527_s19] sm:$0xff] %vm536_vm0, %v1706_v27 }
 0xafd   : > { %2208 = shalt.err (!%p2205_p1)
}
 0xafe   : > { %s2209_s22 = scalar_lea.hbm %s2933_s14, 128  ;;  %s2213_s25 = scalar_lea.hbm %s3060_s7, 256 }
 0xaff   : > { %p2210_p2 = scmp.ne.s32.totalorder %s2933_s14, %s2209_s22  ;;  %p2214_p3 = scmp.lt.u32.totalorder %s2933_s14, %s3060_s7 }
 0xb00   : > { %p2215_p4 = scmp.lt.u32.totalorder %s2213_s25, %s2209_s22  ;;  %p2217_p8 = scmp.lt.u32.totalorder %s2209_s22, %s2933_s14 }
 0xb01   : > { %p2211_p12 = pnand %p2210_p2, %p2413_p5 }
 0xb02   : > { %p2216_p7 = por %p2215_p4, %p2214_p3 }
 0xb03   : > { %p2212_p9 = pneg %p2211_p12 }
 0xb04   : > { %p2218_p6 = por %p2217_p8, %p2216_p7 }
 0xb06   : > { %p2219_p10 = pnand %p2218_p6, %p2212_p9 }
 0xb08   : > { %2222 = shalt.err (!%p2219_p10)
}
 0xb09   : > { %2000 = dma.vmem_to_hbm [thread:$0]  (%p2413_p5), %s2935_s4, 128, %s2933_s14, %s1709_s9  }
 0xb0a PF: > { %s3061_s17 = sld [smem:[#allocation17_spill]]  ;;  %s3062_s2 = sld [smem:[#allocation14_spill]] }
 0xb0b   : > { %s3063_s23 = sld [smem:[#allocation22_spill]] }
 0xb10   : > { %p2022_p11 = scmp.ge.s32.totalorder %s3061_s17, 2  ;;  %s1734_s12 = sand.u32 1, %s3062_s2  }
 0xb11   : > { %p3064_p0 = scmp.ne.s32.totalorder %s3063_s23, 0  ;;  %s1735_s15 = scalar_lea.sflag [#allocation4], %s1734_s12 }
 0xb13   : > { %p2013_p13 = pnand %p2022_p11, %p3064_p0 }
 0xb15   : > { %2252 = dma.done.wait (!%p2013_p13), %s1735_s15, 128  }
 0xb16   : > { %2254 = vsyncadd (!%p2013_p13), %s1735_s15, 4294967168  ;;  %s3065_s21 = sld [smem:[#allocation19_spill]]  ;;  %s3066_s18 = sld [smem:[#allocation15_spill]] }
 0xb17   : > { %s3067_s19 = sld [smem:[#allocation16_spill]]  ;;  %s3068_s20 = sld [smem:[#allocation20_spill]] }
 0xb1c   : > { %p28_p1 = scmp.ge.s32.totalorder %s3065_s21, 4  }
 0xb1e   :  { %30 = sbr.rel (!%p28_p1) target bundleno = 23 (0x17), region = 132 }
 0xb25   :  { %1740 = vsyncpa [#allocation3], 1 }
 0xb26   :  { %1742 = vsyncpa [#allocation3 + $0x1], 1 }
 0xb27   :  { %1743 = vsyncpa [#allocation8], 1 }
 0xb28   :  { %1744 = vsyncpa [#allocation4], 1 }
 0xb29   :  { %1746 = vsyncpa [#allocation4 + $0x1], 1 }
 0xb2a   :  { %1747 = vsyncpa [#allocation5], 1 }
 0xb2b   :  { %1749 = vsyncpa [#allocation5 + $0x1], 1 }

</bundles_post_ra>
